<compile_context>
chip_gen: v7x
topology: tpu7x:2x2x1
jax: 0.10.0
libtpu: 0.0.40
codegen_flags: <defaults>
</compile_context>

<pallas_src>
import numpy as np
import jax
import jax.numpy as jnp
from jax import lax
from jax.experimental import pallas as pl
from jax.experimental.pallas import tpu as pltpu


# ---------------- static network geometry (28x28 input, implied by Linear(64*4*4, 256)) ----------
H_IN, W_IN = 28, 28
C_IN = 3
C1, C2 = 32, 64
HID = 256
N_CLASSES = 10

H1, W1 = H_IN - 2, W_IN - 2                       # 26, 26   conv1 (VALID)
HP1, WP1 = (H1 - 3) // 2 + 1, (W1 - 3) // 2 + 1   # 12, 12   pool1 (k=3, s=2)
H2, W2 = HP1 - 2, WP1 - 2                         # 10, 10   conv2 (VALID)
HP2, WP2 = (H2 - 3) // 2 + 1, (W2 - 3) // 2 + 1   # 4, 4     pool2 (k=3, s=2)

WS1 = W1 - 2                                      # 24  horizontal window starts, block 1
WS2 = W2 - 2                                      # 8   horizontal window starts, block 2
R2 = H2 * WP1                                     # 120 rows of the padded-width conv2 accumulator
P1_ROWS = HP1 * WP1                               # 144 pool1 rows (flat, row = y*WP1 + x)
P1_PAD = 8                                        # zero rows so conv2 tap slices stay in-bounds


# ------------------------------------- fused Pallas kernel ---------------------------------------

def fused_convnet_kernel(patch_ref, w1c_ref, s1_ref, w2c_ref, s2_ref,
                         w1d_ref, b1_ref, w2d_ref, b2_ref,
                         o_ref,
                         conv1_s, pool1_s, conv2_s):
    f32 = jnp.float32

    # ---- block 1: conv(3x3, VALID) + folded-BN shift + ReLU : ONE MXU matmul -------------------
    x = patch_ref[0]                                                    # (676, 27) im2col'ed image
    a1 = jnp.dot(x, w1c_ref[...], preferred_element_type=f32)           # (676, 32)
    conv1_s[...] = jnp.maximum(a1 + s1_ref[...], 0.0)                   # BN scale already in weights

    # ---- block 1: MaxPool 3x3 stride 2 (stride-2 column pick via tiny 0/1 selection matmul) ----
    sel1 = (lax.broadcasted_iota(jnp.int32, (WP1, WS1), 1)
            == 2 * lax.broadcasted_iota(jnp.int32, (WP1, WS1), 0)).astype(f32)

    # zero the padding rows of pool1 (only ever read by the never-used garbage columns of conv2)
    pool1_s[pl.ds(P1_ROWS, P1_PAD), :] = jnp.zeros((P1_PAD, C1), f32)

    for j in range(HP1):                                                # static -> fully unrolled
        r0 = conv1_s[pl.ds((2 * j + 0) * W1, W1), :]                    # (26, 32)
        r1 = conv1_s[pl.ds((2 * j + 1) * W1, W1), :]
        r2 = conv1_s[pl.ds((2 * j + 2) * W1, W1), :]
        r = jnp.maximum(jnp.maximum(r0, r1), r2)                        # vertical max
        hm = jnp.maximum(jnp.maximum(r[0:WS1, :], r[1:WS1 + 1, :]),
                         r[2:WS1 + 2, :])                               # (24, 32) horizontal max
        pool1_s[pl.ds(j * WP1, WP1), :] = jnp.dot(sel1, hm,
                                                  preferred_element_type=f32)   # (12, 32)

    # ---- block 2: conv(3x3) as 9 whole-image tap matmuls over the flat pool1 layout ------------
    # pool1 row = y*WP1 + x.  Output row r = h*WP1 + w (h in [0,H2), w in [0,WP1)); columns
    # w >= W2 are wrap-around garbage and are never consumed by the pooling below.
    a2 = jnp.zeros((R2, C2), f32)
    for kh in range(3):
        for kw in range(3):
            t = kh * 3 + kw
            lhs = pool1_s[pl.ds(kh * WP1 + kw, R2), :]                  # (120, 32)
            a2 = a2 + jnp.dot(lhs, w2c_ref[pl.ds(t * C1, C1), :],
                              preferred_element_type=f32)               # (120, 64)
    conv2_s[...] = jnp.maximum(a2 + s2_ref[...], 0.0)

    # ---- block 2 pool + decoder Linear(1024,256), fused (no flatten materialized) --------------
    sel2 = (lax.broadcasted_iota(jnp.int32, (WP2, WS2), 1)
            == 2 * lax.broadcasted_iota(jnp.int32, (WP2, WS2), 0)).astype(f32)

    hid = b1_ref[...]                                                   # (1, 256)
    for j in range(HP2):
        r0 = conv2_s[pl.ds((2 * j + 0) * WP1, WP1), :]                  # (12, 64)
        r1 = conv2_s[pl.ds((2 * j + 1) * WP1, WP1), :]
        r2 = conv2_s[pl.ds((2 * j + 2) * WP1, WP1), :]
        r = jnp.maximum(jnp.maximum(r0, r1), r2)
        hm = jnp.maximum(jnp.maximum(r[0:WS2, :], r[1:WS2 + 1, :]),
                         r[2:WS2 + 2, :])                               # (8, 64)
        p = jnp.dot(sel2, hm, preferred_element_type=f32)               # (4, 64) pooled row j
        # w1d rows are pre-permuted to NHWC flatten order at init, so PyTorch's
        # NCHW view(N,-1) never needs a transpose here.
        for w in range(WP2):
            row = j * WP2 + w
            hid = hid + jnp.dot(p[w:w + 1, :],
                                w1d_ref[pl.ds(row * C2, C2), :],
                                preferred_element_type=f32)             # (1, 256)

    # TODO(synk): nn.Dropout(p=0.2) treated as inference-mode identity here.
    logits = jnp.dot(hid, w2d_ref[...], preferred_element_type=f32) + b2_ref[...]   # (1, 10)
    s = logits - jnp.max(logits, axis=-1, keepdims=True)
    o_ref[0] = (s - jnp.log(jnp.sum(jnp.exp(s), axis=-1, keepdims=True))).astype(o_ref.dtype)


# ------------------------------------------ wrapper ----------------------------------------------

def convnet_pallas(kp, x_nchw):
    N = x_nchw.shape[0]
    x = jnp.transpose(x_nchw, (0, 2, 3, 1))                             # NCHW -> NHWC
    # layer-1 im2col in XLA: (N, H1*W1, 9*C_IN); channel = (kh*3 + kw)*C_IN + ci
    # (matches the HWIO-reshaped, BN-folded weight ordering).
    patches = jnp.concatenate(
        [x[:, kh:kh + H1, kw:kw + W1, :] for kh in range(3) for kw in range(3)],
        axis=-1).reshape(N, H1 * W1, 9 * C_IN)

    grid_spec = pltpu.PrefetchScalarGridSpec(
        num_scalar_prefetch=0,
        grid=(N,),
        in_specs=[
            pl.BlockSpec((1, H1 * W1, 9 * C_IN), lambda n: (n, 0, 0)),  # im2col'ed image
            pl.BlockSpec((9 * C_IN, C1), lambda n: (0, 0)),             # conv1 W (BN-folded)
            pl.BlockSpec((1, C1), lambda n: (0, 0)),                    # conv1 shift
            pl.BlockSpec((9 * C1, C2), lambda n: (0, 0)),               # conv2 W (BN-folded)
            pl.BlockSpec((1, C2), lambda n: (0, 0)),                    # conv2 shift
            pl.BlockSpec((HP2 * WP2 * C2, HID), lambda n: (0, 0)),      # Linear1 W (NHWC-permuted)
            pl.BlockSpec((1, HID), lambda n: (0, 0)),                   # Linear1 b
            pl.BlockSpec((HID, N_CLASSES), lambda n: (0, 0)),           # Linear2 W
            pl.BlockSpec((1, N_CLASSES), lambda n: (0, 0)),             # Linear2 b
        ],
        out_specs=pl.BlockSpec((1, 1, N_CLASSES), lambda n: (n, 0, 0)),
        scratch_shapes=[
            pltpu.VMEM((H1 * W1, C1), jnp.float32),                     # conv1 activation (flat)
            pltpu.VMEM((P1_ROWS + P1_PAD, C1), jnp.float32),            # pool1 (flat, zero-padded)
            pltpu.VMEM((R2, C2), jnp.float32),                          # conv2 activation (flat)
        ],
    )
    out = pl.pallas_call(
        fused_convnet_kernel,
        out_shape=jax.ShapeDtypeStruct((N, 1, N_CLASSES), jnp.float32),
        grid_spec=grid_spec,
        compiler_params=pltpu.CompilerParams(dimension_semantics=("parallel",)),
    )(patches, kp["w1c"], kp["s1"], kp["w2c"], kp["s2"],
      kp["w1d"], kp["b1"], kp["w2d"], kp["b2"])
    return out.reshape(N, N_CLASSES)


# -------------------------------- parameter init / folding ---------------------------------------

def init_raw_params(key, eps=1e-5):
    """PyTorch-equivalent (inference) parameters, un-folded."""
    ks = jax.random.split(key, 16)
    i = 0
    blocks = []
    for cin, cout in zip((C_IN, C1), (C1, C2)):
        w = jax.random.normal(ks[i], (3, 3, cin, cout), jnp.float32) / np.sqrt(9 * cin); i += 1
        b = 0.1 * jax.random.normal(ks[i], (cout,), jnp.float32); i += 1
        gamma = 1.0 + 0.1 * jax.random.normal(ks[i], (cout,), jnp.float32); i += 1
        beta = 0.1 * jax.random.normal(ks[i], (cout,), jnp.float32); i += 1
        mean = 0.1 * jax.random.normal(ks[i], (cout,), jnp.float32); i += 1
        var = 1.0 + 0.1 * jax.random.uniform(ks[i], (cout,), jnp.float32); i += 1
        blocks.append(dict(w=w, b=b, gamma=gamma, beta=beta, mean=mean, var=var))
    feat = C2 * HP2 * WP2
    w1 = jax.random.normal(ks[i], (feat, HID), jnp.float32) / np.sqrt(feat); i += 1
    b1 = 0.1 * jax.random.normal(ks[i], (HID,), jnp.float32); i += 1
    w2 = jax.random.normal(ks[i], (HID, N_CLASSES), jnp.float32) / np.sqrt(HID); i += 1
    b2 = 0.1 * jax.random.normal(ks[i], (N_CLASSES,), jnp.float32); i += 1
    return dict(blocks=blocks, w1=w1, b1=b1, w2=w2, b2=b2, eps=eps)


def prepare_kernel_params(raw):
    """Fold BN into the conv weights, reshape to matmul form, permute Linear1 rows to NHWC order."""
    eps = raw["eps"]
    kp = {}
    for blk, (wn, sn) in zip(raw["blocks"], [("w1c", "s1"), ("w2c", "s2")]):
        scale = blk["gamma"] / jnp.sqrt(blk["var"] + eps)
        shift = blk["beta"] + scale * (blk["b"] - blk["mean"])
        wf = blk["w"] * scale                          # (3,3,Cin,Cout) * (Cout,)  -> BN folded
        cout = wf.shape[-1]
        kp[wn] = wf.reshape(-1, cout)                  # (9*Cin, Cout), row = (kh*3+kw)*Cin + ci
        kp[sn] = shift.reshape(1, cout)
    # PyTorch flattens NCHW; our kernel produces NHWC-ordered features, so permute W1's rows once.
    idx = np.arange(C2 * HP2 * WP2).reshape(C2, HP2, WP2)
    perm = np.transpose(idx, (1, 2, 0)).reshape(-1)    # NHWC flat index -> NCHW flat index
    kp["w1d"] = raw["w1"][perm, :]
    kp["b1"] = raw["b1"].reshape(1, HID)
    kp["w2d"] = raw["w2"]
    kp["b2"] = raw["b2"].reshape(1, N_CLASSES)
    return kp


# ------------------------------------- pure-JAX reference ----------------------------------------

def convnet_reference(raw, x_nchw):
    """Mirrors the PyTorch module exactly (inference mode); used only for a numerical check."""
    eps = raw["eps"]
    x = jnp.transpose(x_nchw, (0, 2, 3, 1))
    for blk in raw["blocks"]:
        y = lax.conv_general_dilated(x, blk["w"], (1, 1), "VALID",
                                     dimension_numbers=("NHWC", "HWIO", "NHWC")) + blk["b"]
        y = blk["gamma"] * (y - blk["mean"]) / jnp.sqrt(blk["var"] + eps) + blk["beta"]
        y = jnp.maximum(y, 0.0)
        x = lax.reduce_window(y, -jnp.inf, lax.max, (1, 3, 3, 1), (1, 2, 2, 1), "VALID")
    feats = jnp.transpose(x, (0, 3, 1, 2)).reshape(x.shape[0], -1)      # torch NCHW flatten
    h = feats @ raw["w1"] + raw["b1"]                                   # Dropout = identity (eval)
    logits = h @ raw["w2"] + raw["b2"]
    return jax.nn.log_softmax(logits, axis=-1)


# ----------------------------------------------- main --------------------------------------------

if __name__ == "__main__":
    key = jax.random.PRNGKey(0)
    pkey, xkey = jax.random.split(key)

    raw = init_raw_params(pkey)
    kp = prepare_kernel_params(raw)
    # 28x28 input -> conv 26 -> pool 12 -> conv 10 -> pool 4 -> 64*4*4 = 1024 features
    x = jax.random.normal(xkey, (2, C_IN, H_IN, W_IN), jnp.float32)     # NCHW, batch=2

    out = jax.block_until_ready(jax.jit(convnet_pallas)(kp, x))
    ref = jax.block_until_ready(convnet_reference(raw, x))

    assert out.shape == (2, N_CLASSES)
    np.testing.assert_allclose(np.asarray(out), np.asarray(ref), atol=1e-2, rtol=1e-2)
    print("KERNEL_OK")
</pallas_src>

<mosaic_0001>
module attributes {stable_mosaic.version = 11 : i64} {
  func.func @fused_convnet_kernel(%arg0: i32, %arg1: memref<1x676x27xf32, #tpu.memory_space<vmem>>, %arg2: memref<27x32xf32, #tpu.memory_space<vmem>>, %arg3: memref<1x32xf32, #tpu.memory_space<vmem>>, %arg4: memref<288x64xf32, #tpu.memory_space<vmem>>, %arg5: memref<1x64xf32, #tpu.memory_space<vmem>>, %arg6: memref<1024x256xf32, #tpu.memory_space<vmem>>, %arg7: memref<1x256xf32, #tpu.memory_space<vmem>>, %arg8: memref<256x10xf32, #tpu.memory_space<vmem>>, %arg9: memref<1x10xf32, #tpu.memory_space<vmem>>, %arg10: memref<1x1x10xf32, #tpu.memory_space<vmem>>, %arg11: memref<676x32xf32, #tpu.memory_space<vmem>>, %arg12: memref<152x32xf32, #tpu.memory_space<vmem>>, %arg13: memref<120x64xf32, #tpu.memory_space<vmem>>) attributes {dimension_semantics = [#tpu.dimension_semantics<parallel>], iteration_bounds = array<i64: 2>, scalar_prefetch = 0 : i64, scratch_operands = 3 : i64, tpu.core_type = #tpu.core_type<tc>, window_params = [{transform_indices = @transform_0, window_bounds = array<i64: 1, 676, 27>}, {pipeline_mode = #tpu.pipeline_mode<synchronous>, transform_indices = @transform_1, window_bounds = array<i64: 27, 32>}, {pipeline_mode = #tpu.pipeline_mode<synchronous>, transform_indices = @transform_2, window_bounds = array<i64: 1, 32>}, {pipeline_mode = #tpu.pipeline_mode<synchronous>, transform_indices = @transform_3, window_bounds = array<i64: 288, 64>}, {pipeline_mode = #tpu.pipeline_mode<synchronous>, transform_indices = @transform_4, window_bounds = array<i64: 1, 64>}, {pipeline_mode = #tpu.pipeline_mode<synchronous>, transform_indices = @transform_5, window_bounds = array<i64: 1024, 256>}, {pipeline_mode = #tpu.pipeline_mode<synchronous>, transform_indices = @transform_6, window_bounds = array<i64: 1, 256>}, {pipeline_mode = #tpu.pipeline_mode<synchronous>, transform_indices = @transform_7, window_bounds = array<i64: 256, 10>}, {pipeline_mode = #tpu.pipeline_mode<synchronous>, transform_indices = @transform_8, window_bounds = array<i64: 1, 10>}, {transform_indices = @transform_9, window_bounds = array<i64: 1, 1, 10>}]} {
    %c0 = arith.constant 0 : index
    %c0_0 = arith.constant 0 : index
    %c0_1 = arith.constant 0 : index
    %0 = vector.load %arg1[%c0, %c0_0, %c0_1] : memref<1x676x27xf32, #tpu.memory_space<vmem>>, vector<1x676x27xf32>
    %1 = vector.shape_cast %0 : vector<1x676x27xf32> to vector<676x27xf32>
    %c0_2 = arith.constant 0 : index
    %c0_3 = arith.constant 0 : index
    %2 = vector.load %arg2[%c0_2, %c0_3] : memref<27x32xf32, #tpu.memory_space<vmem>>, vector<27x32xf32>
    %cst = arith.constant dense<0.000000e+00> : vector<676x32xf32>
    %3 = tpu.matmul %1, %2, %cst {dimension_numbers = #tpu.dot_dimension_numbers<[1], [0], [0], [1], [0, 0, 1, 1], [], []>} : vector<676x27xf32>, vector<27x32xf32>, vector<676x32xf32> -> vector<676x32xf32>
    %c0_4 = arith.constant 0 : index
    %c0_5 = arith.constant 0 : index
    %4 = vector.load %arg3[%c0_4, %c0_5] : memref<1x32xf32, #tpu.memory_space<vmem>>, vector<1x32xf32>
    %5 = vector.broadcast %4 : vector<1x32xf32> to vector<676x32xf32>
    %6 = arith.addf %3, %5 : vector<676x32xf32>
    %cst_6 = arith.constant 0.000000e+00 : f32
    %7 = vector.broadcast %cst_6 : f32 to vector<676x32xf32>
    %8 = arith.maximumf %6, %7 : vector<676x32xf32>
    %c0_7 = arith.constant 0 : index
    %c0_8 = arith.constant 0 : index
    %9 = vector.load %arg11[%c0_7, %c0_8] : memref<676x32xf32, #tpu.memory_space<vmem>>, vector<676x32xf32>
    tpu.vector_store %arg11[%c0_7, %c0_8], %8 {strides = array<i32>} : memref<676x32xf32, #tpu.memory_space<vmem>>, vector<676x32xf32>,
    %10 = tpu.iota {dimensions = array<i32: 1>} : vector<12x24xi32>
    %11 = tpu.iota {dimensions = array<i32: 0>} : vector<12x24xi32>
    %c2_i32 = arith.constant 2 : i32
    %12 = vector.broadcast %c2_i32 : i32 to vector<12x24xi32>
    %13 = arith.muli %12, %11 : vector<12x24xi32>
    %14 = arith.cmpi eq, %10, %13 : vector<12x24xi32>
    %15 = arith.extui %14 : vector<12x24xi1> to vector<12x24xi32>
    %16 = arith.sitofp %15 : vector<12x24xi32> to vector<12x24xf32>
    %cst_9 = arith.constant 0.000000e+00 : f32
    %17 = vector.broadcast %cst_9 : f32 to vector<8x32xf32>
    %c144 = arith.constant 144 : index
    %c0_10 = arith.constant 0 : index
    %18 = vector.load %arg12[%c144, %c0_10] : memref<152x32xf32, #tpu.memory_space<vmem>>, vector<8x32xf32>
    tpu.vector_store %arg12[%c144, %c0_10], %17 {strides = array<i32>} : memref<152x32xf32, #tpu.memory_space<vmem>>, vector<8x32xf32>,
    %c0_11 = arith.constant 0 : index
    %c0_12 = arith.constant 0 : index
    %19 = vector.load %arg11[%c0_11, %c0_12] : memref<676x32xf32, #tpu.memory_space<vmem>>, vector<26x32xf32>
    %c26 = arith.constant 26 : index
    %c0_13 = arith.constant 0 : index
    %20 = vector.load %arg11[%c26, %c0_13] : memref<676x32xf32, #tpu.memory_space<vmem>>, vector<26x32xf32>
    %c52 = arith.constant 52 : index
    %c0_14 = arith.constant 0 : index
    %21 = vector.load %arg11[%c52, %c0_14] : memref<676x32xf32, #tpu.memory_space<vmem>>, vector<26x32xf32>
    %22 = arith.maximumf %19, %20 : vector<26x32xf32>
    %23 = arith.maximumf %22, %21 : vector<26x32xf32>
    %24 = vector.extract_strided_slice %23 {offsets = [0, 0], sizes = [24, 32], strides = [1, 1]} : vector<26x32xf32> to vector<24x32xf32>
    %25 = vector.extract_strided_slice %23 {offsets = [1, 0], sizes = [24, 32], strides = [1, 1]} : vector<26x32xf32> to vector<24x32xf32>
    %26 = arith.maximumf %24, %25 : vector<24x32xf32>
    %27 = vector.extract_strided_slice %23 {offsets = [2, 0], sizes = [24, 32], strides = [1, 1]} : vector<26x32xf32> to vector<24x32xf32>
    %28 = arith.maximumf %26, %27 : vector<24x32xf32>
    %cst_15 = arith.constant dense<0.000000e+00> : vector<12x32xf32>
    %29 = tpu.matmul %16, %28, %cst_15 {dimension_numbers = #tpu.dot_dimension_numbers<[1], [0], [0], [1], [0, 0, 1, 1], [], []>} : vector<12x24xf32>, vector<24x32xf32>, vector<12x32xf32> -> vector<12x32xf32>
    %c0_16 = arith.constant 0 : index
    %c0_17 = arith.constant 0 : index
    %30 = vector.load %arg12[%c0_16, %c0_17] : memref<152x32xf32, #tpu.memory_space<vmem>>, vector<12x32xf32>
    tpu.vector_store %arg12[%c0_16, %c0_17], %29 {strides = array<i32>} : memref<152x32xf32, #tpu.memory_space<vmem>>, vector<12x32xf32>,
    %c52_18 = arith.constant 52 : index
    %c0_19 = arith.constant 0 : index
    %31 = vector.load %arg11[%c52_18, %c0_19] : memref<676x32xf32, #tpu.memory_space<vmem>>, vector<26x32xf32>
    %c78 = arith.constant 78 : index
    %c0_20 = arith.constant 0 : index
    %32 = vector.load %arg11[%c78, %c0_20] : memref<676x32xf32, #tpu.memory_space<vmem>>, vector<26x32xf32>
    %c104 = arith.constant 104 : index
    %c0_21 = arith.constant 0 : index
    %33 = vector.load %arg11[%c104, %c0_21] : memref<676x32xf32, #tpu.memory_space<vmem>>, vector<26x32xf32>
    %34 = arith.maximumf %31, %32 : vector<26x32xf32>
    %35 = arith.maximumf %34, %33 : vector<26x32xf32>
    %36 = vector.extract_strided_slice %35 {offsets = [0, 0], sizes = [24, 32], strides = [1, 1]} : vector<26x32xf32> to vector<24x32xf32>
    %37 = vector.extract_strided_slice %35 {offsets = [1, 0], sizes = [24, 32], strides = [1, 1]} : vector<26x32xf32> to vector<24x32xf32>
    %38 = arith.maximumf %36, %37 : vector<24x32xf32>
    %39 = vector.extract_strided_slice %35 {offsets = [2, 0], sizes = [24, 32], strides = [1, 1]} : vector<26x32xf32> to vector<24x32xf32>
    %40 = arith.maximumf %38, %39 : vector<24x32xf32>
    %cst_22 = arith.constant dense<0.000000e+00> : vector<12x32xf32>
    %41 = tpu.matmul %16, %40, %cst_22 {dimension_numbers = #tpu.dot_dimension_numbers<[1], [0], [0], [1], [0, 0, 1, 1], [], []>} : vector<12x24xf32>, vector<24x32xf32>, vector<12x32xf32> -> vector<12x32xf32>
    %c12 = arith.constant 12 : index
    %c0_23 = arith.constant 0 : index
    %42 = vector.load %arg12[%c12, %c0_23] : memref<152x32xf32, #tpu.memory_space<vmem>>, vector<12x32xf32>
    tpu.vector_store %arg12[%c12, %c0_23], %41 {strides = array<i32>} : memref<152x32xf32, #tpu.memory_space<vmem>>, vector<12x32xf32>,
    %c104_24 = arith.constant 104 : index
    %c0_25 = arith.constant 0 : index
    %43 = vector.load %arg11[%c104_24, %c0_25] : memref<676x32xf32, #tpu.memory_space<vmem>>, vector<26x32xf32>
    %c130 = arith.constant 130 : index
    %c0_26 = arith.constant 0 : index
    %44 = vector.load %arg11[%c130, %c0_26] : memref<676x32xf32, #tpu.memory_space<vmem>>, vector<26x32xf32>
    %c156 = arith.constant 156 : index
    %c0_27 = arith.constant 0 : index
    %45 = vector.load %arg11[%c156, %c0_27] : memref<676x32xf32, #tpu.memory_space<vmem>>, vector<26x32xf32>
    %46 = arith.maximumf %43, %44 : vector<26x32xf32>
    %47 = arith.maximumf %46, %45 : vector<26x32xf32>
    %48 = vector.extract_strided_slice %47 {offsets = [0, 0], sizes = [24, 32], strides = [1, 1]} : vector<26x32xf32> to vector<24x32xf32>
    %49 = vector.extract_strided_slice %47 {offsets = [1, 0], sizes = [24, 32], strides = [1, 1]} : vector<26x32xf32> to vector<24x32xf32>
    %50 = arith.maximumf %48, %49 : vector<24x32xf32>
    %51 = vector.extract_strided_slice %47 {offsets = [2, 0], sizes = [24, 32], strides = [1, 1]} : vector<26x32xf32> to vector<24x32xf32>
    %52 = arith.maximumf %50, %51 : vector<24x32xf32>
    %cst_28 = arith.constant dense<0.000000e+00> : vector<12x32xf32>
    %53 = tpu.matmul %16, %52, %cst_28 {dimension_numbers = #tpu.dot_dimension_numbers<[1], [0], [0], [1], [0, 0, 1, 1], [], []>} : vector<12x24xf32>, vector<24x32xf32>, vector<12x32xf32> -> vector<12x32xf32>
    %c24 = arith.constant 24 : index
    %c0_29 = arith.constant 0 : index
    %54 = vector.load %arg12[%c24, %c0_29] : memref<152x32xf32, #tpu.memory_space<vmem>>, vector<12x32xf32>
    tpu.vector_store %arg12[%c24, %c0_29], %53 {strides = array<i32>} : memref<152x32xf32, #tpu.memory_space<vmem>>, vector<12x32xf32>,
    %c156_30 = arith.constant 156 : index
    %c0_31 = arith.constant 0 : index
    %55 = vector.load %arg11[%c156_30, %c0_31] : memref<676x32xf32, #tpu.memory_space<vmem>>, vector<26x32xf32>
    %c182 = arith.constant 182 : index
    %c0_32 = arith.constant 0 : index
    %56 = vector.load %arg11[%c182, %c0_32] : memref<676x32xf32, #tpu.memory_space<vmem>>, vector<26x32xf32>
    %c208 = arith.constant 208 : index
    %c0_33 = arith.constant 0 : index
    %57 = vector.load %arg11[%c208, %c0_33] : memref<676x32xf32, #tpu.memory_space<vmem>>, vector<26x32xf32>
    %58 = arith.maximumf %55, %56 : vector<26x32xf32>
    %59 = arith.maximumf %58, %57 : vector<26x32xf32>
    %60 = vector.extract_strided_slice %59 {offsets = [0, 0], sizes = [24, 32], strides = [1, 1]} : vector<26x32xf32> to vector<24x32xf32>
    %61 = vector.extract_strided_slice %59 {offsets = [1, 0], sizes = [24, 32], strides = [1, 1]} : vector<26x32xf32> to vector<24x32xf32>
    %62 = arith.maximumf %60, %61 : vector<24x32xf32>
    %63 = vector.extract_strided_slice %59 {offsets = [2, 0], sizes = [24, 32], strides = [1, 1]} : vector<26x32xf32> to vector<24x32xf32>
    %64 = arith.maximumf %62, %63 : vector<24x32xf32>
    %cst_34 = arith.constant dense<0.000000e+00> : vector<12x32xf32>
    %65 = tpu.matmul %16, %64, %cst_34 {dimension_numbers = #tpu.dot_dimension_numbers<[1], [0], [0], [1], [0, 0, 1, 1], [], []>} : vector<12x24xf32>, vector<24x32xf32>, vector<12x32xf32> -> vector<12x32xf32>
    %c36 = arith.constant 36 : index
    %c0_35 = arith.constant 0 : index
    %66 = vector.load %arg12[%c36, %c0_35] : memref<152x32xf32, #tpu.memory_space<vmem>>, vector<12x32xf32>
    tpu.vector_store %arg12[%c36, %c0_35], %65 {strides = array<i32>} : memref<152x32xf32, #tpu.memory_space<vmem>>, vector<12x32xf32>,
    %c208_36 = arith.constant 208 : index
    %c0_37 = arith.constant 0 : index
    %67 = vector.load %arg11[%c208_36, %c0_37] : memref<676x32xf32, #tpu.memory_space<vmem>>, vector<26x32xf32>
    %c234 = arith.constant 234 : index
    %c0_38 = arith.constant 0 : index
    %68 = vector.load %arg11[%c234, %c0_38] : memref<676x32xf32, #tpu.memory_space<vmem>>, vector<26x32xf32>
    %c260 = arith.constant 260 : index
    %c0_39 = arith.constant 0 : index
    %69 = vector.load %arg11[%c260, %c0_39] : memref<676x32xf32, #tpu.memory_space<vmem>>, vector<26x32xf32>
    %70 = arith.maximumf %67, %68 : vector<26x32xf32>
    %71 = arith.maximumf %70, %69 : vector<26x32xf32>
    %72 = vector.extract_strided_slice %71 {offsets = [0, 0], sizes = [24, 32], strides = [1, 1]} : vector<26x32xf32> to vector<24x32xf32>
    %73 = vector.extract_strided_slice %71 {offsets = [1, 0], sizes = [24, 32], strides = [1, 1]} : vector<26x32xf32> to vector<24x32xf32>
    %74 = arith.maximumf %72, %73 : vector<24x32xf32>
    %75 = vector.extract_strided_slice %71 {offsets = [2, 0], sizes = [24, 32], strides = [1, 1]} : vector<26x32xf32> to vector<24x32xf32>
    %76 = arith.maximumf %74, %75 : vector<24x32xf32>
    %cst_40 = arith.constant dense<0.000000e+00> : vector<12x32xf32>
    %77 = tpu.matmul %16, %76, %cst_40 {dimension_numbers = #tpu.dot_dimension_numbers<[1], [0], [0], [1], [0, 0, 1, 1], [], []>} : vector<12x24xf32>, vector<24x32xf32>, vector<12x32xf32> -> vector<12x32xf32>
    %c48 = arith.constant 48 : index
    %c0_41 = arith.constant 0 : index
    %78 = vector.load %arg12[%c48, %c0_41] : memref<152x32xf32, #tpu.memory_space<vmem>>, vector<12x32xf32>
    tpu.vector_store %arg12[%c48, %c0_41], %77 {strides = array<i32>} : memref<152x32xf32, #tpu.memory_space<vmem>>, vector<12x32xf32>,
    %c260_42 = arith.constant 260 : index
    %c0_43 = arith.constant 0 : index
    %79 = vector.load %arg11[%c260_42, %c0_43] : memref<676x32xf32, #tpu.memory_space<vmem>>, vector<26x32xf32>
    %c286 = arith.constant 286 : index
    %c0_44 = arith.constant 0 : index
    %80 = vector.load %arg11[%c286, %c0_44] : memref<676x32xf32, #tpu.memory_space<vmem>>, vector<26x32xf32>
    %c312 = arith.constant 312 : index
    %c0_45 = arith.constant 0 : index
    %81 = vector.load %arg11[%c312, %c0_45] : memref<676x32xf32, #tpu.memory_space<vmem>>, vector<26x32xf32>
    %82 = arith.maximumf %79, %80 : vector<26x32xf32>
    %83 = arith.maximumf %82, %81 : vector<26x32xf32>
    %84 = vector.extract_strided_slice %83 {offsets = [0, 0], sizes = [24, 32], strides = [1, 1]} : vector<26x32xf32> to vector<24x32xf32>
    %85 = vector.extract_strided_slice %83 {offsets = [1, 0], sizes = [24, 32], strides = [1, 1]} : vector<26x32xf32> to vector<24x32xf32>
    %86 = arith.maximumf %84, %85 : vector<24x32xf32>
    %87 = vector.extract_strided_slice %83 {offsets = [2, 0], sizes = [24, 32], strides = [1, 1]} : vector<26x32xf32> to vector<24x32xf32>
    %88 = arith.maximumf %86, %87 : vector<24x32xf32>
    %cst_46 = arith.constant dense<0.000000e+00> : vector<12x32xf32>
    %89 = tpu.matmul %16, %88, %cst_46 {dimension_numbers = #tpu.dot_dimension_numbers<[1], [0], [0], [1], [0, 0, 1, 1], [], []>} : vector<12x24xf32>, vector<24x32xf32>, vector<12x32xf32> -> vector<12x32xf32>
    %c60 = arith.constant 60 : index
    %c0_47 = arith.constant 0 : index
    %90 = vector.load %arg12[%c60, %c0_47] : memref<152x32xf32, #tpu.memory_space<vmem>>, vector<12x32xf32>
    tpu.vector_store %arg12[%c60, %c0_47], %89 {strides = array<i32>} : memref<152x32xf32, #tpu.memory_space<vmem>>, vector<12x32xf32>,
    %c312_48 = arith.constant 312 : index
    %c0_49 = arith.constant 0 : index
    %91 = vector.load %arg11[%c312_48, %c0_49] : memref<676x32xf32, #tpu.memory_space<vmem>>, vector<26x32xf32>
    %c338 = arith.constant 338 : index
    %c0_50 = arith.constant 0 : index
    %92 = vector.load %arg11[%c338, %c0_50] : memref<676x32xf32, #tpu.memory_space<vmem>>, vector<26x32xf32>
    %c364 = arith.constant 364 : index
    %c0_51 = arith.constant 0 : index
    %93 = vector.load %arg11[%c364, %c0_51] : memref<676x32xf32, #tpu.memory_space<vmem>>, vector<26x32xf32>
    %94 = arith.maximumf %91, %92 : vector<26x32xf32>
    %95 = arith.maximumf %94, %93 : vector<26x32xf32>
    %96 = vector.extract_strided_slice %95 {offsets = [0, 0], sizes = [24, 32], strides = [1, 1]} : vector<26x32xf32> to vector<24x32xf32>
    %97 = vector.extract_strided_slice %95 {offsets = [1, 0], sizes = [24, 32], strides = [1, 1]} : vector<26x32xf32> to vector<24x32xf32>
    %98 = arith.maximumf %96, %97 : vector<24x32xf32>
    %99 = vector.extract_strided_slice %95 {offsets = [2, 0], sizes = [24, 32], strides = [1, 1]} : vector<26x32xf32> to vector<24x32xf32>
    %100 = arith.maximumf %98, %99 : vector<24x32xf32>
    %cst_52 = arith.constant dense<0.000000e+00> : vector<12x32xf32>
    %101 = tpu.matmul %16, %100, %cst_52 {dimension_numbers = #tpu.dot_dimension_numbers<[1], [0], [0], [1], [0, 0, 1, 1], [], []>} : vector<12x24xf32>, vector<24x32xf32>, vector<12x32xf32> -> vector<12x32xf32>
    %c72 = arith.constant 72 : index
    %c0_53 = arith.constant 0 : index
    %102 = vector.load %arg12[%c72, %c0_53] : memref<152x32xf32, #tpu.memory_space<vmem>>, vector<12x32xf32>
    tpu.vector_store %arg12[%c72, %c0_53], %101 {strides = array<i32>} : memref<152x32xf32, #tpu.memory_space<vmem>>, vector<12x32xf32>,
    %c364_54 = arith.constant 364 : index
    %c0_55 = arith.constant 0 : index
    %103 = vector.load %arg11[%c364_54, %c0_55] : memref<676x32xf32, #tpu.memory_space<vmem>>, vector<26x32xf32>
    %c390 = arith.constant 390 : index
    %c0_56 = arith.constant 0 : index
    %104 = vector.load %arg11[%c390, %c0_56] : memref<676x32xf32, #tpu.memory_space<vmem>>, vector<26x32xf32>
    %c416 = arith.constant 416 : index
    %c0_57 = arith.constant 0 : index
    %105 = vector.load %arg11[%c416, %c0_57] : memref<676x32xf32, #tpu.memory_space<vmem>>, vector<26x32xf32>
    %106 = arith.maximumf %103, %104 : vector<26x32xf32>
    %107 = arith.maximumf %106, %105 : vector<26x32xf32>
    %108 = vector.extract_strided_slice %107 {offsets = [0, 0], sizes = [24, 32], strides = [1, 1]} : vector<26x32xf32> to vector<24x32xf32>
    %109 = vector.extract_strided_slice %107 {offsets = [1, 0], sizes = [24, 32], strides = [1, 1]} : vector<26x32xf32> to vector<24x32xf32>
    %110 = arith.maximumf %108, %109 : vector<24x32xf32>
    %111 = vector.extract_strided_slice %107 {offsets = [2, 0], sizes = [24, 32], strides = [1, 1]} : vector<26x32xf32> to vector<24x32xf32>
    %112 = arith.maximumf %110, %111 : vector<24x32xf32>
    %cst_58 = arith.constant dense<0.000000e+00> : vector<12x32xf32>
    %113 = tpu.matmul %16, %112, %cst_58 {dimension_numbers = #tpu.dot_dimension_numbers<[1], [0], [0], [1], [0, 0, 1, 1], [], []>} : vector<12x24xf32>, vector<24x32xf32>, vector<12x32xf32> -> vector<12x32xf32>
    %c84 = arith.constant 84 : index
    %c0_59 = arith.constant 0 : index
    %114 = vector.load %arg12[%c84, %c0_59] : memref<152x32xf32, #tpu.memory_space<vmem>>, vector<12x32xf32>
    tpu.vector_store %arg12[%c84, %c0_59], %113 {strides = array<i32>} : memref<152x32xf32, #tpu.memory_space<vmem>>, vector<12x32xf32>,
    %c416_60 = arith.constant 416 : index
    %c0_61 = arith.constant 0 : index
    %115 = vector.load %arg11[%c416_60, %c0_61] : memref<676x32xf32, #tpu.memory_space<vmem>>, vector<26x32xf32>
    %c442 = arith.constant 442 : index
    %c0_62 = arith.constant 0 : index
    %116 = vector.load %arg11[%c442, %c0_62] : memref<676x32xf32, #tpu.memory_space<vmem>>, vector<26x32xf32>
    %c468 = arith.constant 468 : index
    %c0_63 = arith.constant 0 : index
    %117 = vector.load %arg11[%c468, %c0_63] : memref<676x32xf32, #tpu.memory_space<vmem>>, vector<26x32xf32>
    %118 = arith.maximumf %115, %116 : vector<26x32xf32>
    %119 = arith.maximumf %118, %117 : vector<26x32xf32>
    %120 = vector.extract_strided_slice %119 {offsets = [0, 0], sizes = [24, 32], strides = [1, 1]} : vector<26x32xf32> to vector<24x32xf32>
    %121 = vector.extract_strided_slice %119 {offsets = [1, 0], sizes = [24, 32], strides = [1, 1]} : vector<26x32xf32> to vector<24x32xf32>
    %122 = arith.maximumf %120, %121 : vector<24x32xf32>
    %123 = vector.extract_strided_slice %119 {offsets = [2, 0], sizes = [24, 32], strides = [1, 1]} : vector<26x32xf32> to vector<24x32xf32>
    %124 = arith.maximumf %122, %123 : vector<24x32xf32>
    %cst_64 = arith.constant dense<0.000000e+00> : vector<12x32xf32>
    %125 = tpu.matmul %16, %124, %cst_64 {dimension_numbers = #tpu.dot_dimension_numbers<[1], [0], [0], [1], [0, 0, 1, 1], [], []>} : vector<12x24xf32>, vector<24x32xf32>, vector<12x32xf32> -> vector<12x32xf32>
    %c96 = arith.constant 96 : index
    %c0_65 = arith.constant 0 : index
    %126 = vector.load %arg12[%c96, %c0_65] : memref<152x32xf32, #tpu.memory_space<vmem>>, vector<12x32xf32>
    tpu.vector_store %arg12[%c96, %c0_65], %125 {strides = array<i32>} : memref<152x32xf32, #tpu.memory_space<vmem>>, vector<12x32xf32>,
    %c468_66 = arith.constant 468 : index
    %c0_67 = arith.constant 0 : index
    %127 = vector.load %arg11[%c468_66, %c0_67] : memref<676x32xf32, #tpu.memory_space<vmem>>, vector<26x32xf32>
    %c494 = arith.constant 494 : index
    %c0_68 = arith.constant 0 : index
    %128 = vector.load %arg11[%c494, %c0_68] : memref<676x32xf32, #tpu.memory_space<vmem>>, vector<26x32xf32>
    %c520 = arith.constant 520 : index
    %c0_69 = arith.constant 0 : index
    %129 = vector.load %arg11[%c520, %c0_69] : memref<676x32xf32, #tpu.memory_space<vmem>>, vector<26x32xf32>
    %130 = arith.maximumf %127, %128 : vector<26x32xf32>
    %131 = arith.maximumf %130, %129 : vector<26x32xf32>
    %132 = vector.extract_strided_slice %131 {offsets = [0, 0], sizes = [24, 32], strides = [1, 1]} : vector<26x32xf32> to vector<24x32xf32>
    %133 = vector.extract_strided_slice %131 {offsets = [1, 0], sizes = [24, 32], strides = [1, 1]} : vector<26x32xf32> to vector<24x32xf32>
    %134 = arith.maximumf %132, %133 : vector<24x32xf32>
    %135 = vector.extract_strided_slice %131 {offsets = [2, 0], sizes = [24, 32], strides = [1, 1]} : vector<26x32xf32> to vector<24x32xf32>
    %136 = arith.maximumf %134, %135 : vector<24x32xf32>
    %cst_70 = arith.constant dense<0.000000e+00> : vector<12x32xf32>
    %137 = tpu.matmul %16, %136, %cst_70 {dimension_numbers = #tpu.dot_dimension_numbers<[1], [0], [0], [1], [0, 0, 1, 1], [], []>} : vector<12x24xf32>, vector<24x32xf32>, vector<12x32xf32> -> vector<12x32xf32>
    %c108 = arith.constant 108 : index
    %c0_71 = arith.constant 0 : index
    %138 = vector.load %arg12[%c108, %c0_71] : memref<152x32xf32, #tpu.memory_space<vmem>>, vector<12x32xf32>
    tpu.vector_store %arg12[%c108, %c0_71], %137 {strides = array<i32>} : memref<152x32xf32, #tpu.memory_space<vmem>>, vector<12x32xf32>,
    %c520_72 = arith.constant 520 : index
    %c0_73 = arith.constant 0 : index
    %139 = vector.load %arg11[%c520_72, %c0_73] : memref<676x32xf32, #tpu.memory_space<vmem>>, vector<26x32xf32>
    %c546 = arith.constant 546 : index
    %c0_74 = arith.constant 0 : index
    %140 = vector.load %arg11[%c546, %c0_74] : memref<676x32xf32, #tpu.memory_space<vmem>>, vector<26x32xf32>
    %c572 = arith.constant 572 : index
    %c0_75 = arith.constant 0 : index
    %141 = vector.load %arg11[%c572, %c0_75] : memref<676x32xf32, #tpu.memory_space<vmem>>, vector<26x32xf32>
    %142 = arith.maximumf %139, %140 : vector<26x32xf32>
    %143 = arith.maximumf %142, %141 : vector<26x32xf32>
    %144 = vector.extract_strided_slice %143 {offsets = [0, 0], sizes = [24, 32], strides = [1, 1]} : vector<26x32xf32> to vector<24x32xf32>
    %145 = vector.extract_strided_slice %143 {offsets = [1, 0], sizes = [24, 32], strides = [1, 1]} : vector<26x32xf32> to vector<24x32xf32>
    %146 = arith.maximumf %144, %145 : vector<24x32xf32>
    %147 = vector.extract_strided_slice %143 {offsets = [2, 0], sizes = [24, 32], strides = [1, 1]} : vector<26x32xf32> to vector<24x32xf32>
    %148 = arith.maximumf %146, %147 : vector<24x32xf32>
    %cst_76 = arith.constant dense<0.000000e+00> : vector<12x32xf32>
    %149 = tpu.matmul %16, %148, %cst_76 {dimension_numbers = #tpu.dot_dimension_numbers<[1], [0], [0], [1], [0, 0, 1, 1], [], []>} : vector<12x24xf32>, vector<24x32xf32>, vector<12x32xf32> -> vector<12x32xf32>
    %c120 = arith.constant 120 : index
    %c0_77 = arith.constant 0 : index
    %150 = vector.load %arg12[%c120, %c0_77] : memref<152x32xf32, #tpu.memory_space<vmem>>, vector<12x32xf32>
    tpu.vector_store %arg12[%c120, %c0_77], %149 {strides = array<i32>} : memref<152x32xf32, #tpu.memory_space<vmem>>, vector<12x32xf32>,
    %c572_78 = arith.constant 572 : index
    %c0_79 = arith.constant 0 : index
    %151 = vector.load %arg11[%c572_78, %c0_79] : memref<676x32xf32, #tpu.memory_space<vmem>>, vector<26x32xf32>
    %c598 = arith.constant 598 : index
    %c0_80 = arith.constant 0 : index
    %152 = vector.load %arg11[%c598, %c0_80] : memref<676x32xf32, #tpu.memory_space<vmem>>, vector<26x32xf32>
    %c624 = arith.constant 624 : index
    %c0_81 = arith.constant 0 : index
    %153 = vector.load %arg11[%c624, %c0_81] : memref<676x32xf32, #tpu.memory_space<vmem>>, vector<26x32xf32>
    %154 = arith.maximumf %151, %152 : vector<26x32xf32>
    %155 = arith.maximumf %154, %153 : vector<26x32xf32>
    %156 = vector.extract_strided_slice %155 {offsets = [0, 0], sizes = [24, 32], strides = [1, 1]} : vector<26x32xf32> to vector<24x32xf32>
    %157 = vector.extract_strided_slice %155 {offsets = [1, 0], sizes = [24, 32], strides = [1, 1]} : vector<26x32xf32> to vector<24x32xf32>
    %158 = arith.maximumf %156, %157 : vector<24x32xf32>
    %159 = vector.extract_strided_slice %155 {offsets = [2, 0], sizes = [24, 32], strides = [1, 1]} : vector<26x32xf32> to vector<24x32xf32>
    %160 = arith.maximumf %158, %159 : vector<24x32xf32>
    %cst_82 = arith.constant dense<0.000000e+00> : vector<12x32xf32>
    %161 = tpu.matmul %16, %160, %cst_82 {dimension_numbers = #tpu.dot_dimension_numbers<[1], [0], [0], [1], [0, 0, 1, 1], [], []>} : vector<12x24xf32>, vector<24x32xf32>, vector<12x32xf32> -> vector<12x32xf32>
    %c132 = arith.constant 132 : index
    %c0_83 = arith.constant 0 : index
    %162 = vector.load %arg12[%c132, %c0_83] : memref<152x32xf32, #tpu.memory_space<vmem>>, vector<12x32xf32>
    tpu.vector_store %arg12[%c132, %c0_83], %161 {strides = array<i32>} : memref<152x32xf32, #tpu.memory_space<vmem>>, vector<12x32xf32>,
    %cst_84 = arith.constant 0.000000e+00 : f32
    %163 = vector.broadcast %cst_84 : f32 to vector<120x64xf32>
    %c0_85 = arith.constant 0 : index
    %c0_86 = arith.constant 0 : index
    %164 = vector.load %arg12[%c0_85, %c0_86] : memref<152x32xf32, #tpu.memory_space<vmem>>, vector<120x32xf32>
    %c0_87 = arith.constant 0 : index
    %c0_88 = arith.constant 0 : index
    %165 = vector.load %arg4[%c0_87, %c0_88] : memref<288x64xf32, #tpu.memory_space<vmem>>, vector<32x64xf32>
    %cst_89 = arith.constant dense<0.000000e+00> : vector<120x64xf32>
    %166 = tpu.matmul %164, %165, %cst_89 {dimension_numbers = #tpu.dot_dimension_numbers<[1], [0], [0], [1], [0, 0, 1, 1], [], []>} : vector<120x32xf32>, vector<32x64xf32>, vector<120x64xf32> -> vector<120x64xf32>
    %167 = arith.addf %163, %166 : vector<120x64xf32>
    %c1 = arith.constant 1 : index
    %c0_90 = arith.constant 0 : index
    %168 = vector.load %arg12[%c1, %c0_90] : memref<152x32xf32, #tpu.memory_space<vmem>>, vector<120x32xf32>
    %c32 = arith.constant 32 : index
    %c0_91 = arith.constant 0 : index
    %169 = vector.load %arg4[%c32, %c0_91] : memref<288x64xf32, #tpu.memory_space<vmem>>, vector<32x64xf32>
    %cst_92 = arith.constant dense<0.000000e+00> : vector<120x64xf32>
    %170 = tpu.matmul %168, %169, %cst_92 {dimension_numbers = #tpu.dot_dimension_numbers<[1], [0], [0], [1], [0, 0, 1, 1], [], []>} : vector<120x32xf32>, vector<32x64xf32>, vector<120x64xf32> -> vector<120x64xf32>
    %171 = arith.addf %167, %170 : vector<120x64xf32>
    %c2 = arith.constant 2 : index
    %c0_93 = arith.constant 0 : index
    %172 = vector.load %arg12[%c2, %c0_93] : memref<152x32xf32, #tpu.memory_space<vmem>>, vector<120x32xf32>
    %c64 = arith.constant 64 : index
    %c0_94 = arith.constant 0 : index
    %173 = vector.load %arg4[%c64, %c0_94] : memref<288x64xf32, #tpu.memory_space<vmem>>, vector<32x64xf32>
    %cst_95 = arith.constant dense<0.000000e+00> : vector<120x64xf32>
    %174 = tpu.matmul %172, %173, %cst_95 {dimension_numbers = #tpu.dot_dimension_numbers<[1], [0], [0], [1], [0, 0, 1, 1], [], []>} : vector<120x32xf32>, vector<32x64xf32>, vector<120x64xf32> -> vector<120x64xf32>
    %175 = arith.addf %171, %174 : vector<120x64xf32>
    %c12_96 = arith.constant 12 : index
    %c0_97 = arith.constant 0 : index
    %176 = vector.load %arg12[%c12_96, %c0_97] : memref<152x32xf32, #tpu.memory_space<vmem>>, vector<120x32xf32>
    %c96_98 = arith.constant 96 : index
    %c0_99 = arith.constant 0 : index
    %177 = vector.load %arg4[%c96_98, %c0_99] : memref<288x64xf32, #tpu.memory_space<vmem>>, vector<32x64xf32>
    %cst_100 = arith.constant dense<0.000000e+00> : vector<120x64xf32>
    %178 = tpu.matmul %176, %177, %cst_100 {dimension_numbers = #tpu.dot_dimension_numbers<[1], [0], [0], [1], [0, 0, 1, 1], [], []>} : vector<120x32xf32>, vector<32x64xf32>, vector<120x64xf32> -> vector<120x64xf32>
    %179 = arith.addf %175, %178 : vector<120x64xf32>
    %c13 = arith.constant 13 : index
    %c0_101 = arith.constant 0 : index
    %180 = vector.load %arg12[%c13, %c0_101] : memref<152x32xf32, #tpu.memory_space<vmem>>, vector<120x32xf32>
    %c128 = arith.constant 128 : index
    %c0_102 = arith.constant 0 : index
    %181 = vector.load %arg4[%c128, %c0_102] : memref<288x64xf32, #tpu.memory_space<vmem>>, vector<32x64xf32>
    %cst_103 = arith.constant dense<0.000000e+00> : vector<120x64xf32>
    %182 = tpu.matmul %180, %181, %cst_103 {dimension_numbers = #tpu.dot_dimension_numbers<[1], [0], [0], [1], [0, 0, 1, 1], [], []>} : vector<120x32xf32>, vector<32x64xf32>, vector<120x64xf32> -> vector<120x64xf32>
    %183 = arith.addf %179, %182 : vector<120x64xf32>
    %c14 = arith.constant 14 : index
    %c0_104 = arith.constant 0 : index
    %184 = vector.load %arg12[%c14, %c0_104] : memref<152x32xf32, #tpu.memory_space<vmem>>, vector<120x32xf32>
    %c160 = arith.constant 160 : index
    %c0_105 = arith.constant 0 : index
    %185 = vector.load %arg4[%c160, %c0_105] : memref<288x64xf32, #tpu.memory_space<vmem>>, vector<32x64xf32>
    %cst_106 = arith.constant dense<0.000000e+00> : vector<120x64xf32>
    %186 = tpu.matmul %184, %185, %cst_106 {dimension_numbers = #tpu.dot_dimension_numbers<[1], [0], [0], [1], [0, 0, 1, 1], [], []>} : vector<120x32xf32>, vector<32x64xf32>, vector<120x64xf32> -> vector<120x64xf32>
    %187 = arith.addf %183, %186 : vector<120x64xf32>
    %c24_107 = arith.constant 24 : index
    %c0_108 = arith.constant 0 : index
    %188 = vector.load %arg12[%c24_107, %c0_108] : memref<152x32xf32, #tpu.memory_space<vmem>>, vector<120x32xf32>
    %c192 = arith.constant 192 : index
    %c0_109 = arith.constant 0 : index
    %189 = vector.load %arg4[%c192, %c0_109] : memref<288x64xf32, #tpu.memory_space<vmem>>, vector<32x64xf32>
    %cst_110 = arith.constant dense<0.000000e+00> : vector<120x64xf32>
    %190 = tpu.matmul %188, %189, %cst_110 {dimension_numbers = #tpu.dot_dimension_numbers<[1], [0], [0], [1], [0, 0, 1, 1], [], []>} : vector<120x32xf32>, vector<32x64xf32>, vector<120x64xf32> -> vector<120x64xf32>
    %191 = arith.addf %187, %190 : vector<120x64xf32>
    %c25 = arith.constant 25 : index
    %c0_111 = arith.constant 0 : index
    %192 = vector.load %arg12[%c25, %c0_111] : memref<152x32xf32, #tpu.memory_space<vmem>>, vector<120x32xf32>
    %c224 = arith.constant 224 : index
    %c0_112 = arith.constant 0 : index
    %193 = vector.load %arg4[%c224, %c0_112] : memref<288x64xf32, #tpu.memory_space<vmem>>, vector<32x64xf32>
    %cst_113 = arith.constant dense<0.000000e+00> : vector<120x64xf32>
    %194 = tpu.matmul %192, %193, %cst_113 {dimension_numbers = #tpu.dot_dimension_numbers<[1], [0], [0], [1], [0, 0, 1, 1], [], []>} : vector<120x32xf32>, vector<32x64xf32>, vector<120x64xf32> -> vector<120x64xf32>
    %195 = arith.addf %191, %194 : vector<120x64xf32>
    %c26_114 = arith.constant 26 : index
    %c0_115 = arith.constant 0 : index
    %196 = vector.load %arg12[%c26_114, %c0_115] : memref<152x32xf32, #tpu.memory_space<vmem>>, vector<120x32xf32>
    %c256 = arith.constant 256 : index
    %c0_116 = arith.constant 0 : index
    %197 = vector.load %arg4[%c256, %c0_116] : memref<288x64xf32, #tpu.memory_space<vmem>>, vector<32x64xf32>
    %cst_117 = arith.constant dense<0.000000e+00> : vector<120x64xf32>
    %198 = tpu.matmul %196, %197, %cst_117 {dimension_numbers = #tpu.dot_dimension_numbers<[1], [0], [0], [1], [0, 0, 1, 1], [], []>} : vector<120x32xf32>, vector<32x64xf32>, vector<120x64xf32> -> vector<120x64xf32>
    %199 = arith.addf %195, %198 : vector<120x64xf32>
    %c0_118 = arith.constant 0 : index
    %c0_119 = arith.constant 0 : index
    %200 = vector.load %arg5[%c0_118, %c0_119] : memref<1x64xf32, #tpu.memory_space<vmem>>, vector<1x64xf32>
    %201 = vector.broadcast %200 : vector<1x64xf32> to vector<120x64xf32>
    %202 = arith.addf %199, %201 : vector<120x64xf32>
    %cst_120 = arith.constant 0.000000e+00 : f32
    %203 = vector.broadcast %cst_120 : f32 to vector<120x64xf32>
    %204 = arith.maximumf %202, %203 : vector<120x64xf32>
    %c0_121 = arith.constant 0 : index
    %c0_122 = arith.constant 0 : index
    %205 = vector.load %arg13[%c0_121, %c0_122] : memref<120x64xf32, #tpu.memory_space<vmem>>, vector<120x64xf32>
    tpu.vector_store %arg13[%c0_121, %c0_122], %204 {strides = array<i32>} : memref<120x64xf32, #tpu.memory_space<vmem>>, vector<120x64xf32>,
    %206 = tpu.iota {dimensions = array<i32: 1>} : vector<4x8xi32>
    %207 = tpu.iota {dimensions = array<i32: 0>} : vector<4x8xi32>
    %c2_i32_123 = arith.constant 2 : i32
    %208 = vector.broadcast %c2_i32_123 : i32 to vector<4x8xi32>
    %209 = arith.muli %208, %207 : vector<4x8xi32>
    %210 = arith.cmpi eq, %206, %209 : vector<4x8xi32>
    %211 = arith.extui %210 : vector<4x8xi1> to vector<4x8xi32>
    %212 = arith.sitofp %211 : vector<4x8xi32> to vector<4x8xf32>
    %c0_124 = arith.constant 0 : index
    %c0_125 = arith.constant 0 : index
    %213 = vector.load %arg7[%c0_124, %c0_125] : memref<1x256xf32, #tpu.memory_space<vmem>>, vector<1x256xf32>
    %c0_126 = arith.constant 0 : index
    %c0_127 = arith.constant 0 : index
    %214 = vector.load %arg13[%c0_126, %c0_127] : memref<120x64xf32, #tpu.memory_space<vmem>>, vector<12x64xf32>
    %c12_128 = arith.constant 12 : index
    %c0_129 = arith.constant 0 : index
    %215 = vector.load %arg13[%c12_128, %c0_129] : memref<120x64xf32, #tpu.memory_space<vmem>>, vector<12x64xf32>
    %c24_130 = arith.constant 24 : index
    %c0_131 = arith.constant 0 : index
    %216 = vector.load %arg13[%c24_130, %c0_131] : memref<120x64xf32, #tpu.memory_space<vmem>>, vector<12x64xf32>
    %217 = arith.maximumf %214, %215 : vector<12x64xf32>
    %218 = arith.maximumf %217, %216 : vector<12x64xf32>
    %219 = vector.extract_strided_slice %218 {offsets = [0, 0], sizes = [8, 64], strides = [1, 1]} : vector<12x64xf32> to vector<8x64xf32>
    %220 = vector.extract_strided_slice %218 {offsets = [1, 0], sizes = [8, 64], strides = [1, 1]} : vector<12x64xf32> to vector<8x64xf32>
    %221 = arith.maximumf %219, %220 : vector<8x64xf32>
    %222 = vector.extract_strided_slice %218 {offsets = [2, 0], sizes = [8, 64], strides = [1, 1]} : vector<12x64xf32> to vector<8x64xf32>
    %223 = arith.maximumf %221, %222 : vector<8x64xf32>
    %cst_132 = arith.constant dense<0.000000e+00> : vector<4x64xf32>
    %224 = tpu.matmul %212, %223, %cst_132 {dimension_numbers = #tpu.dot_dimension_numbers<[1], [0], [0], [1], [0, 0, 1, 1], [], []>} : vector<4x8xf32>, vector<8x64xf32>, vector<4x64xf32> -> vector<4x64xf32>
    %225 = vector.extract_strided_slice %224 {offsets = [0, 0], sizes = [1, 64], strides = [1, 1]} : vector<4x64xf32> to vector<1x64xf32>
    %c0_133 = arith.constant 0 : index
    %c0_134 = arith.constant 0 : index
    %226 = vector.load %arg6[%c0_133, %c0_134] : memref<1024x256xf32, #tpu.memory_space<vmem>>, vector<64x256xf32>
    %cst_135 = arith.constant dense<0.000000e+00> : vector<1x256xf32>
    %227 = tpu.matmul %225, %226, %cst_135 {dimension_numbers = #tpu.dot_dimension_numbers<[1], [0], [0], [1], [0, 0, 1, 1], [], []>} : vector<1x64xf32>, vector<64x256xf32>, vector<1x256xf32> -> vector<1x256xf32>
    %228 = arith.addf %213, %227 : vector<1x256xf32>
    %229 = vector.extract_strided_slice %224 {offsets = [1, 0], sizes = [1, 64], strides = [1, 1]} : vector<4x64xf32> to vector<1x64xf32>
    %c64_136 = arith.constant 64 : index
    %c0_137 = arith.constant 0 : index
    %230 = vector.load %arg6[%c64_136, %c0_137] : memref<1024x256xf32, #tpu.memory_space<vmem>>, vector<64x256xf32>
    %cst_138 = arith.constant dense<0.000000e+00> : vector<1x256xf32>
    %231 = tpu.matmul %229, %230, %cst_138 {dimension_numbers = #tpu.dot_dimension_numbers<[1], [0], [0], [1], [0, 0, 1, 1], [], []>} : vector<1x64xf32>, vector<64x256xf32>, vector<1x256xf32> -> vector<1x256xf32>
    %232 = arith.addf %228, %231 : vector<1x256xf32>
    %233 = vector.extract_strided_slice %224 {offsets = [2, 0], sizes = [1, 64], strides = [1, 1]} : vector<4x64xf32> to vector<1x64xf32>
    %c128_139 = arith.constant 128 : index
    %c0_140 = arith.constant 0 : index
    %234 = vector.load %arg6[%c128_139, %c0_140] : memref<1024x256xf32, #tpu.memory_space<vmem>>, vector<64x256xf32>
    %cst_141 = arith.constant dense<0.000000e+00> : vector<1x256xf32>
    %235 = tpu.matmul %233, %234, %cst_141 {dimension_numbers = #tpu.dot_dimension_numbers<[1], [0], [0], [1], [0, 0, 1, 1], [], []>} : vector<1x64xf32>, vector<64x256xf32>, vector<1x256xf32> -> vector<1x256xf32>
    %236 = arith.addf %232, %235 : vector<1x256xf32>
    %237 = vector.extract_strided_slice %224 {offsets = [3, 0], sizes = [1, 64], strides = [1, 1]} : vector<4x64xf32> to vector<1x64xf32>
    %c192_142 = arith.constant 192 : index
    %c0_143 = arith.constant 0 : index
    %238 = vector.load %arg6[%c192_142, %c0_143] : memref<1024x256xf32, #tpu.memory_space<vmem>>, vector<64x256xf32>
    %cst_144 = arith.constant dense<0.000000e+00> : vector<1x256xf32>
    %239 = tpu.matmul %237, %238, %cst_144 {dimension_numbers = #tpu.dot_dimension_numbers<[1], [0], [0], [1], [0, 0, 1, 1], [], []>} : vector<1x64xf32>, vector<64x256xf32>, vector<1x256xf32> -> vector<1x256xf32>
    %240 = arith.addf %236, %239 : vector<1x256xf32>
    %c24_145 = arith.constant 24 : index
    %c0_146 = arith.constant 0 : index
    %241 = vector.load %arg13[%c24_145, %c0_146] : memref<120x64xf32, #tpu.memory_space<vmem>>, vector<12x64xf32>
    %c36_147 = arith.constant 36 : index
    %c0_148 = arith.constant 0 : index
    %242 = vector.load %arg13[%c36_147, %c0_148] : memref<120x64xf32, #tpu.memory_space<vmem>>, vector<12x64xf32>
    %c48_149 = arith.constant 48 : index
    %c0_150 = arith.constant 0 : index
    %243 = vector.load %arg13[%c48_149, %c0_150] : memref<120x64xf32, #tpu.memory_space<vmem>>, vector<12x64xf32>
    %244 = arith.maximumf %241, %242 : vector<12x64xf32>
    %245 = arith.maximumf %244, %243 : vector<12x64xf32>
    %246 = vector.extract_strided_slice %245 {offsets = [0, 0], sizes = [8, 64], strides = [1, 1]} : vector<12x64xf32> to vector<8x64xf32>
    %247 = vector.extract_strided_slice %245 {offsets = [1, 0], sizes = [8, 64], strides = [1, 1]} : vector<12x64xf32> to vector<8x64xf32>
    %248 = arith.maximumf %246, %247 : vector<8x64xf32>
    %249 = vector.extract_strided_slice %245 {offsets = [2, 0], sizes = [8, 64], strides = [1, 1]} : vector<12x64xf32> to vector<8x64xf32>
    %250 = arith.maximumf %248, %249 : vector<8x64xf32>
    %cst_151 = arith.constant dense<0.000000e+00> : vector<4x64xf32>
    %251 = tpu.matmul %212, %250, %cst_151 {dimension_numbers = #tpu.dot_dimension_numbers<[1], [0], [0], [1], [0, 0, 1, 1], [], []>} : vector<4x8xf32>, vector<8x64xf32>, vector<4x64xf32> -> vector<4x64xf32>
    %252 = vector.extract_strided_slice %251 {offsets = [0, 0], sizes = [1, 64], strides = [1, 1]} : vector<4x64xf32> to vector<1x64xf32>
    %c256_152 = arith.constant 256 : index
    %c0_153 = arith.constant 0 : index
    %253 = vector.load %arg6[%c256_152, %c0_153] : memref<1024x256xf32, #tpu.memory_space<vmem>>, vector<64x256xf32>
    %cst_154 = arith.constant dense<0.000000e+00> : vector<1x256xf32>
    %254 = tpu.matmul %252, %253, %cst_154 {dimension_numbers = #tpu.dot_dimension_numbers<[1], [0], [0], [1], [0, 0, 1, 1], [], []>} : vector<1x64xf32>, vector<64x256xf32>, vector<1x256xf32> -> vector<1x256xf32>
    %255 = arith.addf %240, %254 : vector<1x256xf32>
    %256 = vector.extract_strided_slice %251 {offsets = [1, 0], sizes = [1, 64], strides = [1, 1]} : vector<4x64xf32> to vector<1x64xf32>
    %c320 = arith.constant 320 : index
    %c0_155 = arith.constant 0 : index
    %257 = vector.load %arg6[%c320, %c0_155] : memref<1024x256xf32, #tpu.memory_space<vmem>>, vector<64x256xf32>
    %cst_156 = arith.constant dense<0.000000e+00> : vector<1x256xf32>
    %258 = tpu.matmul %256, %257, %cst_156 {dimension_numbers = #tpu.dot_dimension_numbers<[1], [0], [0], [1], [0, 0, 1, 1], [], []>} : vector<1x64xf32>, vector<64x256xf32>, vector<1x256xf32> -> vector<1x256xf32>
    %259 = arith.addf %255, %258 : vector<1x256xf32>
    %260 = vector.extract_strided_slice %251 {offsets = [2, 0], sizes = [1, 64], strides = [1, 1]} : vector<4x64xf32> to vector<1x64xf32>
    %c384 = arith.constant 384 : index
    %c0_157 = arith.constant 0 : index
    %261 = vector.load %arg6[%c384, %c0_157] : memref<1024x256xf32, #tpu.memory_space<vmem>>, vector<64x256xf32>
    %cst_158 = arith.constant dense<0.000000e+00> : vector<1x256xf32>
    %262 = tpu.matmul %260, %261, %cst_158 {dimension_numbers = #tpu.dot_dimension_numbers<[1], [0], [0], [1], [0, 0, 1, 1], [], []>} : vector<1x64xf32>, vector<64x256xf32>, vector<1x256xf32> -> vector<1x256xf32>
    %263 = arith.addf %259, %262 : vector<1x256xf32>
    %264 = vector.extract_strided_slice %251 {offsets = [3, 0], sizes = [1, 64], strides = [1, 1]} : vector<4x64xf32> to vector<1x64xf32>
    %c448 = arith.constant 448 : index
    %c0_159 = arith.constant 0 : index
    %265 = vector.load %arg6[%c448, %c0_159] : memref<1024x256xf32, #tpu.memory_space<vmem>>, vector<64x256xf32>
    %cst_160 = arith.constant dense<0.000000e+00> : vector<1x256xf32>
    %266 = tpu.matmul %264, %265, %cst_160 {dimension_numbers = #tpu.dot_dimension_numbers<[1], [0], [0], [1], [0, 0, 1, 1], [], []>} : vector<1x64xf32>, vector<64x256xf32>, vector<1x256xf32> -> vector<1x256xf32>
    %267 = arith.addf %263, %266 : vector<1x256xf32>
    %c48_161 = arith.constant 48 : index
    %c0_162 = arith.constant 0 : index
    %268 = vector.load %arg13[%c48_161, %c0_162] : memref<120x64xf32, #tpu.memory_space<vmem>>, vector<12x64xf32>
    %c60_163 = arith.constant 60 : index
    %c0_164 = arith.constant 0 : index
    %269 = vector.load %arg13[%c60_163, %c0_164] : memref<120x64xf32, #tpu.memory_space<vmem>>, vector<12x64xf32>
    %c72_165 = arith.constant 72 : index
    %c0_166 = arith.constant 0 : index
    %270 = vector.load %arg13[%c72_165, %c0_166] : memref<120x64xf32, #tpu.memory_space<vmem>>, vector<12x64xf32>
    %271 = arith.maximumf %268, %269 : vector<12x64xf32>
    %272 = arith.maximumf %271, %270 : vector<12x64xf32>
    %273 = vector.extract_strided_slice %272 {offsets = [0, 0], sizes = [8, 64], strides = [1, 1]} : vector<12x64xf32> to vector<8x64xf32>
    %274 = vector.extract_strided_slice %272 {offsets = [1, 0], sizes = [8, 64], strides = [1, 1]} : vector<12x64xf32> to vector<8x64xf32>
    %275 = arith.maximumf %273, %274 : vector<8x64xf32>
    %276 = vector.extract_strided_slice %272 {offsets = [2, 0], sizes = [8, 64], strides = [1, 1]} : vector<12x64xf32> to vector<8x64xf32>
    %277 = arith.maximumf %275, %276 : vector<8x64xf32>
    %cst_167 = arith.constant dense<0.000000e+00> : vector<4x64xf32>
    %278 = tpu.matmul %212, %277, %cst_167 {dimension_numbers = #tpu.dot_dimension_numbers<[1], [0], [0], [1], [0, 0, 1, 1], [], []>} : vector<4x8xf32>, vector<8x64xf32>, vector<4x64xf32> -> vector<4x64xf32>
    %279 = vector.extract_strided_slice %278 {offsets = [0, 0], sizes = [1, 64], strides = [1, 1]} : vector<4x64xf32> to vector<1x64xf32>
    %c512 = arith.constant 512 : index
    %c0_168 = arith.constant 0 : index
    %280 = vector.load %arg6[%c512, %c0_168] : memref<1024x256xf32, #tpu.memory_space<vmem>>, vector<64x256xf32>
    %cst_169 = arith.constant dense<0.000000e+00> : vector<1x256xf32>
    %281 = tpu.matmul %279, %280, %cst_169 {dimension_numbers = #tpu.dot_dimension_numbers<[1], [0], [0], [1], [0, 0, 1, 1], [], []>} : vector<1x64xf32>, vector<64x256xf32>, vector<1x256xf32> -> vector<1x256xf32>
    %282 = arith.addf %267, %281 : vector<1x256xf32>
    %283 = vector.extract_strided_slice %278 {offsets = [1, 0], sizes = [1, 64], strides = [1, 1]} : vector<4x64xf32> to vector<1x64xf32>
    %c576 = arith.constant 576 : index
    %c0_170 = arith.constant 0 : index
    %284 = vector.load %arg6[%c576, %c0_170] : memref<1024x256xf32, #tpu.memory_space<vmem>>, vector<64x256xf32>
    %cst_171 = arith.constant dense<0.000000e+00> : vector<1x256xf32>
    %285 = tpu.matmul %283, %284, %cst_171 {dimension_numbers = #tpu.dot_dimension_numbers<[1], [0], [0], [1], [0, 0, 1, 1], [], []>} : vector<1x64xf32>, vector<64x256xf32>, vector<1x256xf32> -> vector<1x256xf32>
    %286 = arith.addf %282, %285 : vector<1x256xf32>
    %287 = vector.extract_strided_slice %278 {offsets = [2, 0], sizes = [1, 64], strides = [1, 1]} : vector<4x64xf32> to vector<1x64xf32>
    %c640 = arith.constant 640 : index
    %c0_172 = arith.constant 0 : index
    %288 = vector.load %arg6[%c640, %c0_172] : memref<1024x256xf32, #tpu.memory_space<vmem>>, vector<64x256xf32>
    %cst_173 = arith.constant dense<0.000000e+00> : vector<1x256xf32>
    %289 = tpu.matmul %287, %288, %cst_173 {dimension_numbers = #tpu.dot_dimension_numbers<[1], [0], [0], [1], [0, 0, 1, 1], [], []>} : vector<1x64xf32>, vector<64x256xf32>, vector<1x256xf32> -> vector<1x256xf32>
    %290 = arith.addf %286, %289 : vector<1x256xf32>
    %291 = vector.extract_strided_slice %278 {offsets = [3, 0], sizes = [1, 64], strides = [1, 1]} : vector<4x64xf32> to vector<1x64xf32>
    %c704 = arith.constant 704 : index
    %c0_174 = arith.constant 0 : index
    %292 = vector.load %arg6[%c704, %c0_174] : memref<1024x256xf32, #tpu.memory_space<vmem>>, vector<64x256xf32>
    %cst_175 = arith.constant dense<0.000000e+00> : vector<1x256xf32>
    %293 = tpu.matmul %291, %292, %cst_175 {dimension_numbers = #tpu.dot_dimension_numbers<[1], [0], [0], [1], [0, 0, 1, 1], [], []>} : vector<1x64xf32>, vector<64x256xf32>, vector<1x256xf32> -> vector<1x256xf32>
    %294 = arith.addf %290, %293 : vector<1x256xf32>
    %c72_176 = arith.constant 72 : index
    %c0_177 = arith.constant 0 : index
    %295 = vector.load %arg13[%c72_176, %c0_177] : memref<120x64xf32, #tpu.memory_space<vmem>>, vector<12x64xf32>
    %c84_178 = arith.constant 84 : index
    %c0_179 = arith.constant 0 : index
    %296 = vector.load %arg13[%c84_178, %c0_179] : memref<120x64xf32, #tpu.memory_space<vmem>>, vector<12x64xf32>
    %c96_180 = arith.constant 96 : index
    %c0_181 = arith.constant 0 : index
    %297 = vector.load %arg13[%c96_180, %c0_181] : memref<120x64xf32, #tpu.memory_space<vmem>>, vector<12x64xf32>
    %298 = arith.maximumf %295, %296 : vector<12x64xf32>
    %299 = arith.maximumf %298, %297 : vector<12x64xf32>
    %300 = vector.extract_strided_slice %299 {offsets = [0, 0], sizes = [8, 64], strides = [1, 1]} : vector<12x64xf32> to vector<8x64xf32>
    %301 = vector.extract_strided_slice %299 {offsets = [1, 0], sizes = [8, 64], strides = [1, 1]} : vector<12x64xf32> to vector<8x64xf32>
    %302 = arith.maximumf %300, %301 : vector<8x64xf32>
    %303 = vector.extract_strided_slice %299 {offsets = [2, 0], sizes = [8, 64], strides = [1, 1]} : vector<12x64xf32> to vector<8x64xf32>
    %304 = arith.maximumf %302, %303 : vector<8x64xf32>
    %cst_182 = arith.constant dense<0.000000e+00> : vector<4x64xf32>
    %305 = tpu.matmul %212, %304, %cst_182 {dimension_numbers = #tpu.dot_dimension_numbers<[1], [0], [0], [1], [0, 0, 1, 1], [], []>} : vector<4x8xf32>, vector<8x64xf32>, vector<4x64xf32> -> vector<4x64xf32>
    %306 = vector.extract_strided_slice %305 {offsets = [0, 0], sizes = [1, 64], strides = [1, 1]} : vector<4x64xf32> to vector<1x64xf32>
    %c768 = arith.constant 768 : index
    %c0_183 = arith.constant 0 : index
    %307 = vector.load %arg6[%c768, %c0_183] : memref<1024x256xf32, #tpu.memory_space<vmem>>, vector<64x256xf32>
    %cst_184 = arith.constant dense<0.000000e+00> : vector<1x256xf32>
    %308 = tpu.matmul %306, %307, %cst_184 {dimension_numbers = #tpu.dot_dimension_numbers<[1], [0], [0], [1], [0, 0, 1, 1], [], []>} : vector<1x64xf32>, vector<64x256xf32>, vector<1x256xf32> -> vector<1x256xf32>
    %309 = arith.addf %294, %308 : vector<1x256xf32>
    %310 = vector.extract_strided_slice %305 {offsets = [1, 0], sizes = [1, 64], strides = [1, 1]} : vector<4x64xf32> to vector<1x64xf32>
    %c832 = arith.constant 832 : index
    %c0_185 = arith.constant 0 : index
    %311 = vector.load %arg6[%c832, %c0_185] : memref<1024x256xf32, #tpu.memory_space<vmem>>, vector<64x256xf32>
    %cst_186 = arith.constant dense<0.000000e+00> : vector<1x256xf32>
    %312 = tpu.matmul %310, %311, %cst_186 {dimension_numbers = #tpu.dot_dimension_numbers<[1], [0], [0], [1], [0, 0, 1, 1], [], []>} : vector<1x64xf32>, vector<64x256xf32>, vector<1x256xf32> -> vector<1x256xf32>
    %313 = arith.addf %309, %312 : vector<1x256xf32>
    %314 = vector.extract_strided_slice %305 {offsets = [2, 0], sizes = [1, 64], strides = [1, 1]} : vector<4x64xf32> to vector<1x64xf32>
    %c896 = arith.constant 896 : index
    %c0_187 = arith.constant 0 : index
    %315 = vector.load %arg6[%c896, %c0_187] : memref<1024x256xf32, #tpu.memory_space<vmem>>, vector<64x256xf32>
    %cst_188 = arith.constant dense<0.000000e+00> : vector<1x256xf32>
    %316 = tpu.matmul %314, %315, %cst_188 {dimension_numbers = #tpu.dot_dimension_numbers<[1], [0], [0], [1], [0, 0, 1, 1], [], []>} : vector<1x64xf32>, vector<64x256xf32>, vector<1x256xf32> -> vector<1x256xf32>
    %317 = arith.addf %313, %316 : vector<1x256xf32>
    %318 = vector.extract_strided_slice %305 {offsets = [3, 0], sizes = [1, 64], strides = [1, 1]} : vector<4x64xf32> to vector<1x64xf32>
    %c960 = arith.constant 960 : index
    %c0_189 = arith.constant 0 : index
    %319 = vector.load %arg6[%c960, %c0_189] : memref<1024x256xf32, #tpu.memory_space<vmem>>, vector<64x256xf32>
    %cst_190 = arith.constant dense<0.000000e+00> : vector<1x256xf32>
    %320 = tpu.matmul %318, %319, %cst_190 {dimension_numbers = #tpu.dot_dimension_numbers<[1], [0], [0], [1], [0, 0, 1, 1], [], []>} : vector<1x64xf32>, vector<64x256xf32>, vector<1x256xf32> -> vector<1x256xf32>
    %321 = arith.addf %317, %320 : vector<1x256xf32>
    %c0_191 = arith.constant 0 : index
    %c0_192 = arith.constant 0 : index
    %322 = vector.load %arg8[%c0_191, %c0_192] : memref<256x10xf32, #tpu.memory_space<vmem>>, vector<256x10xf32>
    %cst_193 = arith.constant dense<0.000000e+00> : vector<1x10xf32>
    %323 = tpu.matmul %321, %322, %cst_193 {dimension_numbers = #tpu.dot_dimension_numbers<[1], [0], [0], [1], [0, 0, 1, 1], [], []>} : vector<1x256xf32>, vector<256x10xf32>, vector<1x10xf32> -> vector<1x10xf32>
    %c0_194 = arith.constant 0 : index
    %c0_195 = arith.constant 0 : index
    %324 = vector.load %arg9[%c0_194, %c0_195] : memref<1x10xf32, #tpu.memory_space<vmem>>, vector<1x10xf32>
    %325 = arith.addf %323, %324 : vector<1x10xf32>
    %cst_196 = arith.constant dense<0xFF800000> : vector<1xf32>
    %326 = vector.multi_reduction <maximumf>, %325, %cst_196 [1] : vector<1x10xf32> to vector<1xf32>
    %327 = vector.shape_cast %326 : vector<1xf32> to vector<1x1xf32>
    %328 = vector.broadcast %327 : vector<1x1xf32> to vector<1x10xf32>
    %329 = arith.subf %325, %328 : vector<1x10xf32>
    %330 = math.exp %329 : vector<1x10xf32>
    %cst_197 = arith.constant dense<0.000000e+00> : vector<1xf32>
    %331 = vector.multi_reduction <add>, %330, %cst_197 [1] : vector<1x10xf32> to vector<1xf32>
    %332 = vector.shape_cast %331 : vector<1xf32> to vector<1x1xf32>
    %333 = math.log %332 : vector<1x1xf32>
    %334 = vector.broadcast %333 : vector<1x1xf32> to vector<1x10xf32>
    %335 = arith.subf %329, %334 : vector<1x10xf32>
    %c0_198 = arith.constant 0 : index
    %c0_199 = arith.constant 0 : index
    %c0_200 = arith.constant 0 : index
    %336 = vector.load %arg10[%c0_198, %c0_199, %c0_200] : memref<1x1x10xf32, #tpu.memory_space<vmem>>, vector<1x1x10xf32>
    %337 = vector.shape_cast %336 : vector<1x1x10xf32> to vector<1x10xf32>
    %338 = vector.shape_cast %335 : vector<1x10xf32> to vector<1x1x10xf32>
    tpu.vector_store %arg10[%c0_198, %c0_199, %c0_200], %338 {strides = array<i32>} : memref<1x1x10xf32, #tpu.memory_space<vmem>>, vector<1x1x10xf32>,
    return
  }
  func.func @transform_0(%arg0: i32) -> (i32, i32, i32) {
    %c0_i32 = arith.constant 0 : i32
    %c0_i32_0 = arith.constant 0 : i32
    %c0_i32_1 = arith.constant 0 : i32
    return %arg0, %c0_i32, %c0_i32_0 : i32, i32, i32
  }
  func.func @transform_1(%arg0: i32) -> (i32, i32) {
    %c0_i32 = arith.constant 0 : i32
    %c0_i32_0 = arith.constant 0 : i32
    %c0_i32_1 = arith.constant 0 : i32
    return %c0_i32, %c0_i32_0 : i32, i32
  }
  func.func @transform_2(%arg0: i32) -> (i32, i32) {
    %c0_i32 = arith.constant 0 : i32
    %c0_i32_0 = arith.constant 0 : i32
    %c0_i32_1 = arith.constant 0 : i32
    return %c0_i32, %c0_i32_0 : i32, i32
  }
  func.func @transform_3(%arg0: i32) -> (i32, i32) {
    %c0_i32 = arith.constant 0 : i32
    %c0_i32_0 = arith.constant 0 : i32
    %c0_i32_1 = arith.constant 0 : i32
    return %c0_i32, %c0_i32_0 : i32, i32
  }
  func.func @transform_4(%arg0: i32) -> (i32, i32) {
    %c0_i32 = arith.constant 0 : i32
    %c0_i32_0 = arith.constant 0 : i32
    %c0_i32_1 = arith.constant 0 : i32
    return %c0_i32, %c0_i32_0 : i32, i32
  }
  func.func @transform_5(%arg0: i32) -> (i32, i32) {
    %c0_i32 = arith.constant 0 : i32
    %c0_i32_0 = arith.constant 0 : i32
    %c0_i32_1 = arith.constant 0 : i32
    return %c0_i32, %c0_i32_0 : i32, i32
  }
  func.func @transform_6(%arg0: i32) -> (i32, i32) {
    %c0_i32 = arith.constant 0 : i32
    %c0_i32_0 = arith.constant 0 : i32
    %c0_i32_1 = arith.constant 0 : i32
    return %c0_i32, %c0_i32_0 : i32, i32
  }
  func.func @transform_7(%arg0: i32) -> (i32, i32) {
    %c0_i32 = arith.constant 0 : i32
    %c0_i32_0 = arith.constant 0 : i32
    %c0_i32_1 = arith.constant 0 : i32
    return %c0_i32, %c0_i32_0 : i32, i32
  }
  func.func @transform_8(%arg0: i32) -> (i32, i32) {
    %c0_i32 = arith.constant 0 : i32
    %c0_i32_0 = arith.constant 0 : i32
    %c0_i32_1 = arith.constant 0 : i32
    return %c0_i32, %c0_i32_0 : i32, i32
  }
  func.func @transform_9(%arg0: i32) -> (i32, i32, i32) {
    %c0_i32 = arith.constant 0 : i32
    %c0_i32_0 = arith.constant 0 : i32
    %c0_i32_1 = arith.constant 0 : i32
    return %arg0, %c0_i32, %c0_i32_0 : i32, i32, i32
  }
}

</mosaic_0001>

<bundles_post_ra>
// kernel: convnet_pallas.1
= control target key start
LH: loop header
LB: loop body
LE: loop exit
PB: predicated region body
PF: predicated region fallthrough
CT: control target
= control target key end

     0   :  { %14 = vsyncpa [#allocation6], 0  ;;  %s12232_s0 = inlined_call_operand.vmem [shape: f32[2,676,27], index: 0, kind: input, shape index: {}]   ;;  %s12233_s1 = inlined_call_operand.vmem [shape: f32[27,32], index: 1, kind: input, shape index: {}]   ;;  %s12234_s2 = inlined_call_operand.vmem [shape: f32[1,32], index: 2, kind: input, shape index: {}]   ;;  %s12235_s3 = inlined_call_operand.vmem [shape: f32[288,64], index: 3, kind: input, shape index: {}]   ;;  %s12236_s4 = inlined_call_operand.vmem [shape: f32[1,64], index: 4, kind: input, shape index: {}]   ;;  %s12237_s5 = inlined_call_operand.vmem [shape: f32[1024,256], index: 5, kind: input, shape index: {}]   ;;  %s12238_s6 = inlined_call_operand.vmem [shape: f32[1,256], index: 6, kind: input, shape index: {}]   ;;  %s12239_s7 = inlined_call_operand.vmem [shape: f32[256,10], index: 7, kind: input, shape index: {}]   ;;  %s12240_s8 = inlined_call_operand.vmem [shape: f32[1,10], index: 8, kind: input, shape index: {}]   ;;  %s12241_s9 = inlined_call_operand.hbm [shape: f32[2,1,10], index: 9, kind: output, shape index: {}]  }
   0x1   :  { %16 = vsyncpa [#allocation6 + $0x1], 0  ;;  %s9275_s30 = smov 0   ;;  %s9277_s10 = smov 0  }
   0x2   :  { %s9279_s11 = smov 0   ;;  %s9281_s12 = smov 0  }
   0x3 LB: > { %s9296_s13 = sadd.s32 4294967295, %s9217_s12   ;;  %s7195_s14 = sadd.s32 4294967294, %s9217_s12   ;;  %s9217_s12 = sphi %s9281_s12, %s12263_s12   ;;  %s9213_s11 = sphi %s9279_s11, %s12262_s11   ;;  %s9209_s10 = sphi %s9277_s10, %s12261_s10   ;;  %s9205_s30 = sphi %s9275_s30, %s12260_s30  }
   0x4   : > { %s9300_s15 = sadd.s32 1, %s9217_s12   ;;  %s223_s16 = sadd.s32 1, %s9213_s11 }
   0x5   : > { %s220_s17 = ssub.s32 %s9217_s12, %s9300_s15  ;;  %p233_p0 = scmp.ne.s32.totalorder %s9213_s11, %s9209_s10 }
   0x6   : > { %p221_p1 = scmp.eq.s32.totalorder %s220_s17, 0  ;;  %p234_p2 = scmp.eq.s32.totalorder %s9296_s13, 1 }
   0x7   : > { %p239_p3 = scmp.ne.s32.totalorder %s9209_s10, %s9205_s30  ;;  %p240_p4 = scmp.eq.s32.totalorder %s7195_s14, 1 }
   0x8   : > { %s9311_s18 = scalar_select %p221_p1, %s9213_s11, %s223_s16  }
   0x9   : > { %p9313_p5 = por %p234_p2, %p233_p0  ;;  %p9317_p6 = por %p240_p4, %p239_p3 }
   0xa   : > { %p7198_p7 = scmp.ge.s32.totalorder %s9217_s12, 1  ;;  %p290_p8 = scmp.lt.s32.totalorder %s9217_s12, 3 }
   0xc   : > { %p291_p9 = pnand %p7198_p7, %p290_p8 }
   0xe   : > { %294 = sbr.rel (%p291_p9) target bundleno = 3028 (0xbd4), region = 56 }
  0x15   : > { %v415_v0 = vld [vmem:[%s12233_s1] sm:$0xff]  ;;  %v416_v1 = vld [vmem:[%s12233_s1 + $0x8] sm:$0xff]  ;;  %v417_v2 = vld [vmem:[%s12233_s1 + $0x10] sm:$0xff]  ;;  %vm682_vm0 = vcmask 1042432   ;;  %v12242_v3 = vmov 0.0|0.0   ;;  %p325_p10 = scmp.lt.s32.totalorder %s9296_s13, 1  ;;  %v1348_v49 = vlaneseq }
  0x16   : > { %8703 = vmatprep.subr.bf16.mxu0 %v12242_v3  ;;  %v8704_v4 = vpack.c.bf16 %v416_v1, %v415_v0  ;;  %v418_v5 = vld [vmem:[%s12233_s1 + $0x18] sm:$0x7]  ;;  %vm9220_vm1 = vmmov 0   ;;  %v9221_v6 = vmov 0.0   ;;  %vm9222_vm2 = vmmov 1   ;;  %s7469_s23 = sshll.u32 %s9296_s13, 4 }
  0x17   : > { %7843 = vmatprep.mubr.msk.f32.mxu0 %vm9220_vm1, %v9221_v6  ;;  %v8707_v7 = vpack.c.bf16 %v418_v5, %v417_v2  ;;  %s326_s29 = scalar_select %p325_p10, %s9296_s13, 1  ;;  %vm8708_vm3 = vmpackc.low %vm682_vm0, %vm9222_vm2  ;;  %vm426_vm4 = vcmask 220160   ;;  %vm1261_vm5 = vcmask 261120   ;;  %v9514_v51 = vshrl.u32 %v1348_v49, 7  ;;  %v9573_v2 = vld [vmem:[%s12234_s2] ss:$0 sm:$0xff] }
  0x18   : > { %8705 = vmatpush3.bf16.msra.mxu0 %v8704_v4  ;;  %1361 = vst.msk [vmem:[#allocation3 + $0x90] sm:$0xff] %vm1261_vm5, %v9221_v6  ;;  %v9517_v52 = vand.u32 127, %v1348_v49  ;;  %vm1414_vm7 = vcmask 195584   ;;  %vm1386_vm8 = vcmask 1046528   ;;  %vm1400_vm9 = vcmask 1045504   ;;  %s12189_s28 = scalar_lea.hbm %s12241_s9, %s7469_s23  ;;  %s9224_s13 = smov [#allocation5]  }
  0x19   : > { %8706 = vmatprep.subr.bf16.mxu0 %v12242_v3  ;;  %s9104_s14 = smul.u32 680, %s326_s29  ;;  %12249 = vst [vmem:[#allocation8_spill] sm:$0xff] %v9514_v51  ;;  %v1353_v53 = vmul.u32 2, %v9514_v51  ;;  %vm1346_vm11 = vcmask 257024   ;;  %vm4873_vm12 = vcmask 523264   ;;  %vm4912_vm13 = vcmask 64512  }
  0x1a   : > { %vm7113_vm14 = vcmask 73728   ;;  %s9159_s16 = sshll.u32 %s9224_s13, 4  ;;  %s9160_s16 = int_to_ptr.vmem [resolvable:$false] %s9159_s16 }
  0x1b   : > { %s9344_s21 = scalar_lea.vmem %s12232_s0, %s9104_s14  ;;  %vm1355_vm6 = vcmp.eq.s32.totalorder %v9517_v52, %v1353_v53  ;;  %s9161_s17 = scalar_lea.vmem %s9160_s16, 32 }
  0x1c   : > { %8709 = vmatpush3.bf16.msk.msra.mxu0 %vm8708_vm3, %v8707_v7  ;;  %v330_v8 = vld [vmem:[%s9344_s21] sm:$0xff]  ;;  %v331_v9 = vld [vmem:[%s9344_s21 + $0x8] sm:$0xff]  ;;  %v332_v10 = vld [vmem:[%s9344_s21 + $0x10] sm:$0xff]  ;;  %v9525_v55 = vsel %vm1355_vm6, 1.0, %v9221_v6 }
  0x1d   : > { %8758 = vmatprep.subr.bf16.mxu0 %v12242_v3  ;;  %v333_v11 = vld [vmem:[%s9344_s21 + $0x18] sm:$0xff]  ;;  %v334_v12 = vld [vmem:[%s9344_s21 + $0x20] sm:$0xff]  ;;  %v335_v13 = vld [vmem:[%s9344_s21 + $0x28] sm:$0xff]  ;;  %12250 = vst [vmem:[#allocation9_spill] sm:$0xff] %v9525_v55  ;;  %8104 = vmatprep.mubr.msk.f32.mxu1 %vm1414_vm7, %v9525_v55 }
  0x1e   : > { %v336_v14 = vld [vmem:[%s9344_s21 + $0x30] sm:$0xff]  ;;  %v337_v15 = vld [vmem:[%s9344_s21 + $0x38] sm:$0xff]  ;;  %v338_v16 = vld [vmem:[%s9344_s21 + $0x40] sm:$0xff] }
  0x1f   : > { %7844 = vmatmul.mubr.msk.f32.vlgmr.msra.gmra.mrb[0].mxu0 %vm426_vm4, %v330_v8  ;;  %v339_v17 = vld [vmem:[%s9344_s21 + $0x48] sm:$0xff]  ;;  %v340_v18 = vld [vmem:[%s9344_s21 + $0x50] sm:$0xff]  ;;  %v341_v19 = vld [vmem:[%s9344_s21 + $0x58] sm:$0xff] }
  0x20   : > { %7846 = vmatprep.mubr.msk.f32.mxu0 %vm9220_vm1, %v9221_v6  ;;  %v342_v20 = vld [vmem:[%s9344_s21 + $0x60] sm:$0xff]  ;;  %v343_v21 = vld [vmem:[%s9344_s21 + $0x68] sm:$0xff]  ;;  %v344_v22 = vld [vmem:[%s9344_s21 + $0x70] sm:$0xff] }
  0x21   : > { %v345_v23 = vld [vmem:[%s9344_s21 + $0x78] sm:$0xff]  ;;  %v346_v24 = vld [vmem:[%s9344_s21 + $0x80] sm:$0xff]  ;;  %v347_v25 = vld [vmem:[%s9344_s21 + $0x88] sm:$0xff] }
  0x22   : > { %v348_v26 = vld [vmem:[%s9344_s21 + $0x90] sm:$0xff]  ;;  %v349_v27 = vld [vmem:[%s9344_s21 + $0x98] sm:$0xff]  ;;  %v350_v28 = vld [vmem:[%s9344_s21 + $0xa0] sm:$0xff] }
  0x23   : > { %7847 = vmatmul.mubr.msk.f32.gmra.mrb[2].mxu0 %vm426_vm4, %v331_v9  ;;  %v351_v29 = vld [vmem:[%s9344_s21 + $0xa8] sm:$0xff]  ;;  %v352_v30 = vld [vmem:[%s9344_s21 + $0xb0] sm:$0xff]  ;;  %v353_v31 = vld [vmem:[%s9344_s21 + $0xb8] sm:$0xff] }
  0x24   : > { %7849 = vmatprep.mubr.msk.f32.mxu0 %vm9220_vm1, %v9221_v6  ;;  %v354_v32 = vld [vmem:[%s9344_s21 + $0xc0] sm:$0xff]  ;;  %v355_v33 = vld [vmem:[%s9344_s21 + $0xc8] sm:$0xff]  ;;  %v356_v34 = vld [vmem:[%s9344_s21 + $0xd0] sm:$0xff] }
  0x25   : > { %v357_v35 = vld [vmem:[%s9344_s21 + $0xd8] sm:$0xff]  ;;  %v358_v36 = vld [vmem:[%s9344_s21 + $0xe0] sm:$0xff]  ;;  %v359_v37 = vld [vmem:[%s9344_s21 + $0xe8] sm:$0xff] }
  0x26   : > { %v360_v38 = vld [vmem:[%s9344_s21 + $0xf0] sm:$0xff]  ;;  %v361_v39 = vld [vmem:[%s9344_s21 + $0xf8] sm:$0xff]  ;;  %v362_v40 = vld [vmem:[%s9344_s21 + $0x100] sm:$0xff] }
  0x27   : > { %7850 = vmatmul.mubr.msk.f32.gmra.mrb[4].mxu0 %vm426_vm4, %v332_v10  ;;  %v363_v41 = vld [vmem:[%s9344_s21 + $0x108] sm:$0xff]  ;;  %v364_v42 = vld [vmem:[%s9344_s21 + $0x110] sm:$0xff]  ;;  %v365_v43 = vld [vmem:[%s9344_s21 + $0x118] sm:$0xff] }
  0x28   : > { %7852 = vmatprep.mubr.msk.f32.mxu0 %vm9220_vm1, %v9221_v6  ;;  %v366_v44 = vld [vmem:[%s9344_s21 + $0x120] sm:$0xff]  ;;  %v367_v45 = vld [vmem:[%s9344_s21 + $0x128] sm:$0xff]  ;;  %v368_v46 = vld [vmem:[%s9344_s21 + $0x130] sm:$0xff] }
  0x29   : > { %v369_v47 = vld [vmem:[%s9344_s21 + $0x138] sm:$0xff]  ;;  %v370_v48 = vld [vmem:[%s9344_s21 + $0x140] sm:$0xff]  ;;  %v371_v50 = vld [vmem:[%s9344_s21 + $0x148] sm:$0xff] }
  0x2a   : > { %v372_v54 = vld [vmem:[%s9344_s21 + $0x150] sm:$0xff]  ;;  %v373_v56 = vld [vmem:[%s9344_s21 + $0x158] sm:$0xff]  ;;  %v374_v57 = vld [vmem:[%s9344_s21 + $0x160] sm:$0xff] }
  0x2b   : > { %7853 = vmatmul.mubr.msk.f32.gmra.mrb[6].mxu0 %vm426_vm4, %v333_v11  ;;  %v375_v58 = vld [vmem:[%s9344_s21 + $0x168] sm:$0xff]  ;;  %v376_v59 = vld [vmem:[%s9344_s21 + $0x170] sm:$0xff]  ;;  %v377_v60 = vld [vmem:[%s9344_s21 + $0x178] sm:$0xff] }
  0x2c   : > { %7855 = vmatprep.mubr.msk.f32.mxu0 %vm9220_vm1, %v9221_v6  ;;  %v378_v61 = vld [vmem:[%s9344_s21 + $0x180] sm:$0xff]  ;;  %v379_v62 = vld [vmem:[%s9344_s21 + $0x188] sm:$0xff]  ;;  %v380_v63 = vld [vmem:[%s9344_s21 + $0x190] sm:$0xff] }
  0x2d   : > { %v381_v0 = vld [vmem:[%s9344_s21 + $0x198] sm:$0xff]  ;;  %v382_v1 = vld [vmem:[%s9344_s21 + $0x1a0] sm:$0xff]  ;;  %v383_v4 = vld [vmem:[%s9344_s21 + $0x1a8] sm:$0xff] }
  0x2e   : > { %v384_v9 = vld [vmem:[%s9344_s21 + $0x1b0] sm:$0xff] }
  0x2f   : > { %7856 = vmatmul.mubr.msk.f32.gmra.mrb[8].mxu0 %vm426_vm4, %v334_v12  ;;  %v392_v49 = vld [vmem:[%s9344_s21 + $0x1f0] sm:$0xff] }
  0x30   : > { %7858 = vmatprep.mubr.msk.f32.mxu0 %vm9220_vm1, %v9221_v6 }
  0x33   : > { %7859 = vmatmul.mubr.msk.f32.gmra.mrb[10].mxu0 %vm426_vm4, %v335_v13 }
  0x34   : > { %7861 = vmatprep.mubr.msk.f32.mxu0 %vm9220_vm1, %v9221_v6 }
  0x37   : > { %7862 = vmatmul.mubr.msk.f32.gmra.mrb[12].mxu0 %vm426_vm4, %v336_v14  ;;  %v385_v14 = vld [vmem:[%s9344_s21 + $0x1b8] sm:$0xff] }
  0x38   : > { %7864 = vmatprep.mubr.msk.f32.mxu0 %vm9220_vm1, %v9221_v6 }
  0x3b   : > { %7865 = vmatmul.mubr.msk.f32.gmra.mrb[14].mxu0 %vm426_vm4, %v337_v15 }
  0x3c   : > { %7867 = vmatprep.mubr.msk.f32.mxu0 %vm9220_vm1, %v9221_v6 }
  0x3f   : > { %7868 = vmatmul.mubr.msk.f32.gmra.mrb[16].mxu0 %vm426_vm4, %v338_v16 }
  0x40   : > { %7870 = vmatprep.mubr.msk.f32.mxu0 %vm9220_vm1, %v9221_v6 }
  0x43   : > { %7871 = vmatmul.mubr.msk.f32.gmra.mrb[18].mxu0 %vm426_vm4, %v339_v17 }
  0x44   : > { %7873 = vmatprep.mubr.msk.f32.mxu0 %vm9220_vm1, %v9221_v6 }
  0x47   : > { %7874 = vmatmul.mubr.msk.f32.gmra.mrb[20].mxu0 %vm426_vm4, %v340_v18 }
  0x48   : > { %7876 = vmatprep.mubr.msk.f32.mxu0 %vm9220_vm1, %v9221_v6 }
  0x4b   : > { %7877 = vmatmul.mubr.msk.f32.gmra.mrb[22].mxu0 %vm426_vm4, %v341_v19  ;;  %v386_v19 = vld [vmem:[%s9344_s21 + $0x1c0] sm:$0xff] }
  0x4c   : > { %7879 = vmatprep.mubr.msk.f32.mxu0 %vm9220_vm1, %v9221_v6 }
  0x4f   : > { %7880 = vmatmul.mubr.msk.f32.gmra.mrb[24].mxu0 %vm426_vm4, %v342_v20 }
  0x50   : > { %7882 = vmatprep.mubr.msk.f32.mxu0 %vm9220_vm1, %v9221_v6 }
  0x53   : > { %7883 = vmatmul.mubr.msk.f32.gmra.mrb[26].mxu0 %vm426_vm4, %v343_v21 }
  0x54   : > { %7885 = vmatprep.mubr.msk.f32.mxu0 %vm9220_vm1, %v9221_v6 }
  0x57   : > { %7886 = vmatmul.mubr.msk.f32.gmra.mrb[28].mxu0 %vm426_vm4, %v344_v22 }
  0x58   : > { %7888 = vmatprep.mubr.msk.f32.mxu0 %vm9220_vm1, %v9221_v6 }
  0x5b   : > { %7889 = vmatmul.mubr.msk.f32.gmra.mrb[30].mxu0 %vm426_vm4, %v345_v23 }
  0x5c   : > { %7891 = vmatprep.mubr.msk.f32.mxu0 %vm9220_vm1, %v9221_v6 }
  0x5f   : > { %7892 = vmatmul.mubr.msk.f32.gmra.mrb[32].mxu0 %vm426_vm4, %v346_v24  ;;  %v387_v24 = vld [vmem:[%s9344_s21 + $0x1c8] sm:$0xff] }
  0x60   : > { %7894 = vmatprep.mubr.msk.f32.mxu0 %vm9220_vm1, %v9221_v6 }
  0x63   : > { %7895 = vmatmul.mubr.msk.f32.gmra.mrb[34].mxu0 %vm426_vm4, %v347_v25 }
  0x64   : > { %7897 = vmatprep.mubr.msk.f32.mxu0 %vm9220_vm1, %v9221_v6 }
  0x67   : > { %7898 = vmatmul.mubr.msk.f32.gmra.mrb[36].mxu0 %vm426_vm4, %v348_v26 }
  0x68   : > { %7900 = vmatprep.mubr.msk.f32.mxu0 %vm9220_vm1, %v9221_v6 }
  0x6b   : > { %7901 = vmatmul.mubr.msk.f32.gmra.mrb[38].mxu0 %vm426_vm4, %v349_v27 }
  0x6c   : > { %7903 = vmatprep.mubr.msk.f32.mxu0 %vm9220_vm1, %v9221_v6 }
  0x6f   : > { %7904 = vmatmul.mubr.msk.f32.gmra.mrb[40].mxu0 %vm426_vm4, %v350_v28 }
  0x70   : > { %7906 = vmatprep.mubr.msk.f32.mxu0 %vm9220_vm1, %v9221_v6 }
  0x73   : > { %7907 = vmatmul.mubr.msk.f32.gmra.mrb[42].mxu0 %vm426_vm4, %v351_v29  ;;  %v388_v29 = vld [vmem:[%s9344_s21 + $0x1d0] sm:$0xff] }
  0x74   : > { %7909 = vmatprep.mubr.msk.f32.mxu0 %vm9220_vm1, %v9221_v6 }
  0x77   : > { %7910 = vmatmul.mubr.msk.f32.gmra.mrb[44].mxu0 %vm426_vm4, %v352_v30 }
  0x78   : > { %7912 = vmatprep.mubr.msk.f32.mxu0 %vm9220_vm1, %v9221_v6 }
  0x7b   : > { %7913 = vmatmul.mubr.msk.f32.gmra.mrb[46].mxu0 %vm426_vm4, %v353_v31 }
  0x7c   : > { %7915 = vmatprep.mubr.msk.f32.mxu0 %vm9220_vm1, %v9221_v6 }
  0x7f   : > { %7916 = vmatmul.mubr.msk.f32.gmra.mrb[48].mxu0 %vm426_vm4, %v354_v32 }
  0x80   : > { %7918 = vmatprep.mubr.msk.f32.mxu0 %vm9220_vm1, %v9221_v6 }
  0x83   : > { %7919 = vmatmul.mubr.msk.f32.gmra.mrb[50].mxu0 %vm426_vm4, %v355_v33 }
  0x84   : > { %7921 = vmatprep.mubr.msk.f32.mxu0 %vm9220_vm1, %v9221_v6 }
  0x87   : > { %7922 = vmatmul.mubr.msk.f32.gmra.mrb[52].mxu0 %vm426_vm4, %v356_v34  ;;  %v389_v34 = vld [vmem:[%s9344_s21 + $0x1d8] sm:$0xff] }
  0x88   : > { %7924 = vmatprep.mubr.msk.f32.mxu0 %vm9220_vm1, %v9221_v6 }
  0x8b   : > { %7925 = vmatmul.mubr.msk.f32.gmra.mrb[54].mxu0 %vm426_vm4, %v357_v35 }
  0x8c   : > { %7927 = vmatprep.mubr.msk.f32.mxu0 %vm9220_vm1, %v9221_v6 }
  0x8f   : > { %7928 = vmatmul.mubr.msk.f32.gmra.mrb[56].mxu0 %vm426_vm4, %v358_v36 }
  0x90   : > { %7930 = vmatprep.mubr.msk.f32.mxu0 %vm9220_vm1, %v9221_v6 }
  0x93   : > { %7931 = vmatmul.mubr.msk.f32.gmra.mrb[58].mxu0 %vm426_vm4, %v359_v37 }
  0x94   : > { %7933 = vmatprep.mubr.msk.f32.mxu0 %vm9220_vm1, %v9221_v6 }
  0x97   : > { %7934 = vmatmul.mubr.msk.f32.gmra.mrb[60].mxu0 %vm426_vm4, %v360_v38 }
  0x98   : > { %7936 = vmatprep.mubr.msk.f32.mxu0 %vm9220_vm1, %v9221_v6 }
  0x9b   : > { %7937 = vmatmul.mubr.msk.f32.gmra.mrb[62].mxu0 %vm426_vm4, %v361_v39  ;;  %v390_v39 = vld [vmem:[%s9344_s21 + $0x1e0] sm:$0xff] }
  0x9c   : > { %7939 = vmatprep.mubr.msk.f32.mxu0 %vm9220_vm1, %v9221_v6 }
  0x9f   : > { %7940 = vmatmul.mubr.msk.f32.gmra.mrb[64].mxu0 %vm426_vm4, %v362_v40 }
  0xa0   : > { %7942 = vmatprep.mubr.msk.f32.mxu0 %vm9220_vm1, %v9221_v6 }
  0xa3   : > { %7943 = vmatmul.mubr.msk.f32.gmra.mrb[66].mxu0 %vm426_vm4, %v363_v41 }
  0xa4   : > { %7945 = vmatprep.mubr.msk.f32.mxu0 %vm9220_vm1, %v9221_v6 }
  0xa7   : > { %7946 = vmatmul.mubr.msk.f32.gmra.mrb[68].mxu0 %vm426_vm4, %v364_v42 }
  0xa8   : > { %7948 = vmatprep.mubr.msk.f32.mxu0 %vm9220_vm1, %v9221_v6 }
  0xab   : > { %7949 = vmatmul.mubr.msk.f32.gmra.mrb[70].mxu0 %vm426_vm4, %v365_v43 }
  0xac   : > { %7951 = vmatprep.mubr.msk.f32.mxu0 %vm9220_vm1, %v9221_v6 }
  0xaf   : > { %7952 = vmatmul.mubr.msk.f32.gmra.mrb[72].mxu0 %vm426_vm4, %v366_v44  ;;  %v391_v44 = vld [vmem:[%s9344_s21 + $0x1e8] sm:$0xff] }
  0xb0   : > { %7954 = vmatprep.mubr.msk.f32.mxu0 %vm9220_vm1, %v9221_v6 }
  0xb3   : > { %7955 = vmatmul.mubr.msk.f32.gmra.mrb[74].mxu0 %vm426_vm4, %v367_v45 }
  0xb4   : > { %7957 = vmatprep.mubr.msk.f32.mxu0 %vm9220_vm1, %v9221_v6 }
  0xb7   : > { %7958 = vmatmul.mubr.msk.f32.gmra.mrb[76].mxu0 %vm426_vm4, %v368_v46 }
  0xb8   : > { %7960 = vmatprep.mubr.msk.f32.mxu0 %vm9220_vm1, %v9221_v6 }
  0xbb   : > { %7961 = vmatmul.mubr.msk.f32.gmra.mrb[78].mxu0 %vm426_vm4, %v369_v47 }
  0xbc   : > { %7963 = vmatprep.mubr.msk.f32.mxu0 %vm9220_vm1, %v9221_v6 }
  0xbf   : > { %7964 = vmatmul.mubr.msk.f32.gmra.mrb[80].mxu0 %vm426_vm4, %v370_v48 }
  0xc0   : > { %7966 = vmatprep.mubr.msk.f32.mxu0 %vm9220_vm1, %v9221_v6 }
  0xc3   : > { %7967 = vmatmul.mubr.msk.f32.gmra.mrb[82].mxu0 %vm426_vm4, %v371_v50 }
  0xc4   : > { %7969 = vmatprep.mubr.msk.f32.mxu0 %vm9220_vm1, %v9221_v6 }
  0xc7   : > { %7970 = vmatmul.mubr.msk.f32.gmra.mrb[84].mxu0 %vm426_vm4, %v372_v54 }
  0xc8   : > { %7972 = vmatprep.mubr.msk.f32.mxu0 %vm9220_vm1, %v9221_v6 }
  0xcb   : > { %7973 = vmatmul.mubr.msk.f32.gmra.mrb[86].mxu0 %vm426_vm4, %v373_v56 }
  0xcc   : > { %7975 = vmatprep.mubr.msk.f32.mxu0 %vm9220_vm1, %v9221_v6 }
  0xcf   : > { %7976 = vmatmul.mubr.msk.f32.gmra.mrb[88].mxu0 %vm426_vm4, %v374_v57  ;;  %v393_v57 = vld [vmem:[%s9344_s21 + $0x1f8] sm:$0xff] }
  0xd0   : > { %7978 = vmatprep.mubr.msk.f32.mxu0 %vm9220_vm1, %v9221_v6 }
  0xd3   : > { %7979 = vmatmul.mubr.msk.f32.gmra.mrb[90].mxu0 %vm426_vm4, %v375_v58 }
  0xd4   : > { %7981 = vmatprep.mubr.msk.f32.mxu0 %vm9220_vm1, %v9221_v6 }
  0xd7   : > { %7982 = vmatmul.mubr.msk.f32.gmra.mrb[92].mxu0 %vm426_vm4, %v376_v59 }
  0xd8   : > { %7984 = vmatprep.mubr.msk.f32.mxu0 %vm9220_vm1, %v9221_v6 }
  0xdb   : > { %7985 = vmatmul.mubr.msk.f32.gmra.mrb[94].mxu0 %vm426_vm4, %v377_v60 }
  0xdc   : > { %7987 = vmatprep.mubr.msk.f32.mxu0 %vm9220_vm1, %v9221_v6 }
  0xdf   : > { %7988 = vmatmul.mubr.msk.f32.gmra.mrb[96].mxu0 %vm426_vm4, %v378_v61 }
  0xe0   : > { %7990 = vmatprep.mubr.msk.f32.mxu0 %vm9220_vm1, %v9221_v6 }
  0xe3   : > { %7991 = vmatmul.mubr.msk.f32.gmra.mrb[98].mxu0 %vm426_vm4, %v379_v62 }
  0xe4   : > { %7993 = vmatprep.mubr.msk.f32.mxu0 %vm9220_vm1, %v9221_v6 }
  0xe7   : > { %7994 = vmatmul.mubr.msk.f32.gmra.mrb[100].mxu0 %vm426_vm4, %v380_v63 }
  0xe8   : > { %7996 = vmatprep.mubr.msk.f32.mxu0 %vm9220_vm1, %v9221_v6 }
  0xeb   : > { %7997 = vmatmul.mubr.msk.f32.gmra.mrb[102].mxu0 %vm426_vm4, %v381_v0 }
  0xec   : > { %7999 = vmatprep.mubr.msk.f32.mxu0 %vm9220_vm1, %v9221_v6 }
  0xef   : > { %8000 = vmatmul.mubr.msk.f32.gmra.mrb[104].mxu0 %vm426_vm4, %v382_v1 }
  0xf0   : > { %8002 = vmatprep.mubr.msk.f32.mxu0 %vm9220_vm1, %v9221_v6 }
  0xf2   : > { %v752_v5 = vpop.f32.mrb[0].mxu0 }
  0xf3   : > { %v753_v7 = vadd.f32 %v9573_v2, %v752_v5  ;;  %v7845_v8 = vpop.f32.mrb[1].mxu0  ;;  %8003 = vmatmul.mubr.msk.f32.gmra.mrb[106].mxu0 %vm426_vm4, %v383_v4  ;;  %v394_v5 = vld [vmem:[%s9344_s21 + $0x200] sm:$0xff] }
  0xf4   : > { %8005 = vmatprep.mubr.msk.f32.mxu0 %vm9220_vm1, %v9221_v6 }
  0xf5   : > { %v1176_v10 = vmax.f32 %v753_v7, 0.0 }
  0xf6   : > { %v757_v11 = vpop.f32.mrb[2].mxu0 }
  0xf7   : > { %1262 = vst.msk [vmem:[#allocation2] sm:$0xff] %vm1261_vm5, %v1176_v10  ;;  %v758_v12 = vadd.f32 %v9573_v2, %v757_v11  ;;  %v7848_v13 = vpop.f32.mrb[3].mxu0  ;;  %8006 = vmatmul.mubr.msk.f32.gmra.mrb[108].mxu0 %vm426_vm4, %v384_v9 }
  0xf8   : > { %8008 = vmatprep.mubr.msk.f32.mxu0 %vm9220_vm1, %v9221_v6 }
  0xf9   : > { %v1177_v15 = vmax.f32 %v758_v12, 0.0 }
  0xfa   : > { %v762_v16 = vpop.f32.mrb[4].mxu0 }
  0xfb   : > { %1263 = vst.msk [vmem:[#allocation2 + $0x8] sm:$0xff] %vm1261_vm5, %v1177_v15  ;;  %v763_v17 = vadd.f32 %v9573_v2, %v762_v16  ;;  %v7851_v18 = vpop.f32.mrb[5].mxu0  ;;  %8009 = vmatmul.mubr.msk.f32.gmra.mrb[110].mxu0 %vm426_vm4, %v385_v14 }
  0xfc   : > { %8011 = vmatprep.mubr.msk.f32.mxu0 %vm9220_vm1, %v9221_v6  ;;  %v395_v18 = vld [vmem:[%s9344_s21 + $0x208] sm:$0xff] }
  0xfd   : > { %v1178_v20 = vmax.f32 %v763_v17, 0.0 }
  0xfe   : > { %v767_v21 = vpop.f32.mrb[6].mxu0  ;;  %v1362_v61 = vld [vmem:[#allocation2] sm:$0xff] }
  0xff   : > { %1264 = vst.msk [vmem:[#allocation2 + $0x10] sm:$0xff] %vm1261_vm5, %v1178_v20  ;;  %v768_v22 = vadd.f32 %v9573_v2, %v767_v21  ;;  %v7854_v23 = vpop.f32.mrb[7].mxu0  ;;  %8012 = vmatmul.mubr.msk.f32.gmra.mrb[112].mxu0 %vm426_vm4, %v386_v19 }
 0x100   : > { %8014 = vmatprep.mubr.msk.f32.mxu0 %vm9220_vm1, %v9221_v6 }
 0x101   : > { %v1179_v25 = vmax.f32 %v768_v22, 0.0 }
 0x102   : > { %v772_v26 = vpop.f32.mrb[8].mxu0  ;;  %v1363_v7 = vld [vmem:[#allocation2 + $0x8] sm:$0xff] }
 0x103   : > { %1265 = vst.msk [vmem:[#allocation2 + $0x18] sm:$0xff] %vm1261_vm5, %v1179_v25  ;;  %v773_v27 = vadd.f32 %v9573_v2, %v772_v26  ;;  %v7857_v28 = vpop.f32.mrb[9].mxu0  ;;  %8015 = vmatmul.mubr.msk.f32.gmra.mrb[114].mxu0 %vm426_vm4, %v387_v24 }
 0x104   : > { %8017 = vmatprep.mubr.msk.f32.mxu0 %vm9220_vm1, %v9221_v6 }
 0x105   : > { %v1180_v30 = vmax.f32 %v773_v27, 0.0 }
 0x106   : > { %v777_v31 = vpop.f32.mrb[10].mxu0  ;;  %v1364_v19 = vld [vmem:[#allocation2 + $0x10] sm:$0xff] }
 0x107   : > { %1266 = vst.msk [vmem:[#allocation2 + $0x20] sm:$0xff] %vm1261_vm5, %v1180_v30  ;;  %v778_v32 = vadd.f32 %v9573_v2, %v777_v31  ;;  %v7860_v33 = vpop.f32.mrb[11].mxu0  ;;  %8018 = vmatmul.mubr.msk.f32.gmra.mrb[116].mxu0 %vm426_vm4, %v388_v29 }
 0x108   : > { %8020 = vmatprep.mubr.msk.f32.mxu0 %vm9220_vm1, %v9221_v6  ;;  %v396_v33 = vld [vmem:[%s9344_s21 + $0x210] sm:$0xff] }
 0x109   : > { %v1181_v35 = vmax.f32 %v778_v32, 0.0 }
 0x10a   : > { %v782_v36 = vpop.f32.mrb[12].mxu0  ;;  %v1365_v24 = vld [vmem:[#allocation2 + $0x18] sm:$0x3] }
 0x10b   : > { %1267 = vst.msk [vmem:[#allocation2 + $0x28] sm:$0xff] %vm1261_vm5, %v1181_v35  ;;  %v783_v37 = vadd.f32 %v9573_v2, %v782_v36  ;;  %v7863_v38 = vpop.f32.mrb[13].mxu0  ;;  %8021 = vmatmul.mubr.msk.f32.gmra.mrb[118].mxu0 %vm426_vm4, %v389_v34 }
 0x10c   : > { %8023 = vmatprep.mubr.msk.f32.mxu0 %vm9220_vm1, %v9221_v6 }
 0x10d   : > { %v1182_v40 = vmax.f32 %v783_v37, 0.0 }
 0x10e   : > { %v787_v41 = vpop.f32.mrb[14].mxu0  ;;  %v1366_v58 = vld [vmem:[#allocation2 + $0x1a] sm:$0xff] }
 0x10f   : > { %1268 = vst.msk [vmem:[#allocation2 + $0x30] sm:$0xff] %vm1261_vm5, %v1182_v40  ;;  %v788_v42 = vadd.f32 %v9573_v2, %v787_v41  ;;  %v7866_v43 = vpop.f32.mrb[15].mxu0  ;;  %8024 = vmatmul.mubr.msk.f32.gmra.mrb[120].mxu0 %vm426_vm4, %v390_v39  ;;  %v1374_v4 = vmax.f32 %v1362_v61, %v1366_v58 }
 0x110   : > { %8026 = vmatprep.mubr.msk.f32.mxu0 %vm9220_vm1, %v9221_v6 }
 0x111   : > { %v1183_v45 = vmax.f32 %v788_v42, 0.0  ;;  %v1352_v42 = vadd.s32 8, %v9514_v51 }
 0x112   : > { %v792_v46 = vpop.f32.mrb[16].mxu0  ;;  %v1367_v62 = vld [vmem:[#allocation2 + $0x22] sm:$0xff] }
 0x113   : > { %1269 = vst.msk [vmem:[#allocation2 + $0x38] sm:$0xff] %vm1261_vm5, %v1183_v45  ;;  %v793_v47 = vadd.f32 %v9573_v2, %v792_v46  ;;  %v7869_v48 = vpop.f32.mrb[17].mxu0  ;;  %8027 = vmatmul.mubr.msk.f32.gmra.mrb[122].mxu0 %vm426_vm4, %v391_v44  ;;  %v1375_v9 = vmax.f32 %v1363_v7, %v1367_v62  ;;  %v1354_v61 = vmul.u32 2, %v1352_v42 }
 0x114   : > { %8029 = vmatprep.mubr.msk.f32.mxu0 %vm9220_vm1, %v9221_v6 }
 0x115   : > { %v1184_v50 = vmax.f32 %v793_v47, 0.0  ;;  %v397_v47 = vld [vmem:[%s9344_s21 + $0x218] sm:$0xff]  ;;  %vm1356_vm10 = vcmp.eq.s32.totalorder %v9517_v52, %v1354_v61 }
 0x116   : > { %v797_v53 = vpop.f32.mrb[18].mxu0  ;;  %v1368_v12 = vld [vmem:[#allocation2 + $0x2a] sm:$0xff]  ;;  %v1369_v17 = vld [vmem:[#allocation2 + $0x32] sm:$0x3] }
 0x117   : > { %1270 = vst.msk [vmem:[#allocation2 + $0x40] sm:$0xff] %vm1261_vm5, %v1184_v50  ;;  %v798_v54 = vadd.f32 %v9573_v2, %v797_v53  ;;  %v7872_v56 = vpop.f32.mrb[19].mxu0  ;;  %8030 = vmatmul.mubr.msk.f32.gmra.mrb[124].mxu0 %vm426_vm4, %v392_v49  ;;  %v1376_v21 = vmax.f32 %v1364_v19, %v1368_v12  ;;  %v1377_v28 = vmax.f32 %v1365_v24, %v1369_v17  ;;  %v399_v12 = vld [vmem:[%s9344_s21 + $0x228] sm:$0xff] }
 0x118   : > { %8032 = vmatprep.mubr.msk.f32.mxu0 %vm9220_vm1, %v9221_v6 }
 0x119   : > { %v1185_v59 = vmax.f32 %v798_v54, 0.0 }
 0x11a   : > { %v802_v60 = vpop.f32.mrb[20].mxu0  ;;  %v9637_v63 = vld [vmem:[#allocation2 + $0x34] sm:$0xff] }
 0x11b   : > { %1271 = vst.msk [vmem:[#allocation2 + $0x48] sm:$0xff] %vm1261_vm5, %v1185_v59  ;;  %v803_v0 = vadd.f32 %v9573_v2, %v802_v60  ;;  %v7875_v1 = vpop.f32.mrb[21].mxu0  ;;  %8033 = vmatmul.mubr.msk.f32.gmra.mrb[126].mxu0 %vm426_vm4, %v393_v57  ;;  %v1378_v10 = vmax.f32 %v1374_v4, %v9637_v63  ;;  %v398_v4 = vld [vmem:[%s9344_s21 + $0x220] sm:$0xff] }
 0x11c   : > { %8035 = vmatprep.mubr.msk.f32.mxu0 %vm9220_vm1, %v9221_v6 }
 0x11d   : > { %v1186_v8 = vmax.f32 %v803_v0, 0.0  ;;  %v1387_v22 = vrot.slane %v1378_v10, 1  ;;  %v1401_v46 = vrot.slane %v1378_v10, 2 }
 0x11e   : > { %v807_v11 = vpop.f32.mrb[22].mxu0  ;;  %v9646_v13 = vld [vmem:[#allocation2 + $0x3c] sm:$0xff] }
 0x11f   : > { %1272 = vst.msk [vmem:[#allocation2 + $0x50] sm:$0xff] %vm1261_vm5, %v1186_v8  ;;  %v808_v14 = vadd.f32 %v9573_v2, %v807_v11  ;;  %v7878_v15 = vpop.f32.mrb[23].mxu0  ;;  %8036 = vmatmul.mubr.msk.f32.gmra.mrb[128].mxu0 %vm426_vm4, %v394_v5  ;;  %v1379_v16 = vmax.f32 %v1375_v9, %v9646_v13 }
 0x120   : > { %8038 = vmatprep.mubr.msk.f32.mxu0 %vm9220_vm1, %v9221_v6 }
 0x121   : > { %v1187_v20 = vmax.f32 %v808_v14, 0.0  ;;  %v1388_v23 = vrot.slane %v1379_v16, 1  ;;  %v1402_v37 = vrot.slane %v1379_v16, 2 }
 0x122   : > { %v812_v25 = vpop.f32.mrb[24].mxu0  ;;  %v9655_v26 = vld [vmem:[#allocation2 + $0x44] sm:$0xff]  ;;  %v1373_v27 = vld [vmem:[#allocation2 + $0x4c] sm:$0x3] }
 0x123   : > { %1273 = vst.msk [vmem:[#allocation2 + $0x58] sm:$0xff] %vm1261_vm5, %v1187_v20  ;;  %v813_v29 = vadd.f32 %v9573_v2, %v812_v25  ;;  %v7881_v30 = vpop.f32.mrb[25].mxu0  ;;  %8039 = vmatmul.mubr.msk.f32.gmra.mrb[130].mxu0 %vm426_vm4, %v395_v18  ;;  %v1380_v31 = vmax.f32 %v1376_v21, %v9655_v26  ;;  %v1389_v32 = vsel %vm1386_vm8, %v1387_v22, %v1388_v23  ;;  %v400_v22 = vld [vmem:[%s9344_s21 + $0x230] sm:$0xff] }
 0x124   : > { %8041 = vmatprep.mubr.msk.f32.mxu0 %vm9220_vm1, %v9221_v6  ;;  %v1381_v34 = vmax.f32 %v1377_v28, %v1373_v27  ;;  %v1397_v40 = vmax.f32 %v1378_v10, %v1389_v32  ;;  %v1403_v53 = vsel %vm1400_vm9, %v1401_v46, %v1402_v37 }
 0x125   : > { %v1188_v35 = vmax.f32 %v813_v29, 0.0  ;;  %v1390_v36 = vrot.slane %v1380_v31, 1  ;;  %v1404_v38 = vrot.slane %v1380_v31, 2 }
 0x126   : > { %v817_v39 = vpop.f32.mrb[26].mxu0  ;;  %v1392_v41 = vrot.slane %v1381_v34, 1  ;;  %v1406_v56 = vrot.slane %v1381_v34, 2  ;;  %v1411_v58 = vmax.f32 %v1397_v40, %v1403_v53  ;;  %v1502_v14 = vld [vmem:[#allocation2 + $0x4e] sm:$0xff] }
 0x127   : > { %1274 = vst.msk [vmem:[#allocation2 + $0x60] sm:$0xff] %vm1261_vm5, %v1188_v35  ;;  %v818_v43 = vadd.f32 %v9573_v2, %v817_v39  ;;  %v7884_v44 = vpop.f32.mrb[27].mxu0  ;;  %8042 = vmatmul.mubr.msk.f32.gmra.mrb[132].mxu0 %vm426_vm4, %v396_v33  ;;  %v1391_v45 = vsel %vm1386_vm8, %v1388_v23, %v1390_v36  ;;  %v1405_v54 = vsel %vm1400_vm9, %v1402_v37, %v1404_v38 }
 0x128   : > { %8044 = vmatprep.mubr.msk.f32.mxu0 %vm9220_vm1, %v9221_v6  ;;  %v1398_v48 = vmax.f32 %v1379_v16, %v1391_v45  ;;  %v1393_v49 = vsel %vm1386_vm8, %v1390_v36, %v1392_v41  ;;  %v1407_v7 = vsel %vm1400_vm9, %v1404_v38, %v1406_v56  ;;  %v9691_v16 = vsel %vm1356_vm10, 1.0, %v9221_v6  ;;  %v1501_v44 = vld [vmem:[#allocation2 + $0x4c] sm:$0x3] }
 0x129   : > { %v1189_v50 = vmax.f32 %v818_v43, 0.0  ;;  %v1399_v60 = vmax.f32 %v1380_v31, %v1393_v49  ;;  %v1510_v21 = vmax.f32 %v9637_v63, %v1502_v14 }
 0x12a   : > { %v822_v57 = vpop.f32.mrb[28].mxu0  ;;  %v1412_v59 = vmax.f32 %v1398_v48, %v1405_v54  ;;  %v1503_v17 = vld [vmem:[#allocation2 + $0x56] sm:$0xff] }
 0x12b   : > { %1275 = vst.msk [vmem:[#allocation2 + $0x68] sm:$0xff] %vm1261_vm5, %v1189_v50  ;;  %v823_v62 = vadd.f32 %v9573_v2, %v822_v57  ;;  %v7887_v0 = vpop.f32.mrb[29].mxu0  ;;  %8045 = vmatmul.mubr.msk.f32.gmra.mrb[134].mxu0 %vm426_vm4, %v397_v47  ;;  %v1413_v9 = vmax.f32 %v1399_v60, %v1407_v7  ;;  %v1511_v24 = vmax.f32 %v9646_v13, %v1503_v17  ;;  %v401_v13 = vld [vmem:[%s9344_s21 + $0x238] sm:$0xff]  ;;  %v403_v60 = vld [vmem:[%s9344_s21 + $0x248] sm:$0xff] }
 0x12c   : > { %8047 = vmatprep.mubr.msk.f32.mxu0 %vm9220_vm1, %v9221_v6  ;;  %v8710_v1 = vpack.c.bf16 %v1412_v59, %v1411_v58 }
 0x12d   : > { %v1190_v5 = vmax.f32 %v823_v62, 0.0 }
 0x12e   : > { %v827_v8 = vpop.f32.mrb[30].mxu0  ;;  %8711 = vmatprep.subr.bf16.mxu1 %v8710_v1  ;;  %v1504_v28 = vld [vmem:[#allocation2 + $0x5e] sm:$0xff]  ;;  %v1505_v38 = vld [vmem:[#allocation2 + $0x66] sm:$0x3] }
 0x12f   : > { %1276 = vst.msk [vmem:[#allocation2 + $0x70] sm:$0xff] %vm1261_vm5, %v1190_v5  ;;  %v828_v10 = vadd.f32 %v9573_v2, %v827_v8  ;;  %v7890_v11 = vpop.f32.mrb[31].mxu0  ;;  %8048 = vmatmul.mubr.msk.f32.gmra.mrb[136].mxu0 %vm426_vm4, %v398_v4  ;;  %8713 = vmatpush3.bf16.msra.mxu1 %v8710_v1  ;;  %v1512_v33 = vmax.f32 %v9655_v26, %v1504_v28  ;;  %v402_v26 = vld [vmem:[%s9344_s21 + $0x240] sm:$0xff] }
 0x130   : > { %8102 = vmatprep.subr.mxu1 %v1413_v9  ;;  %8050 = vmatprep.mubr.msk.f32.mxu0 %vm9220_vm1, %v9221_v6  ;;  %v1513_v48 = vmax.f32 %v1501_v44, %v1505_v38 }
 0x131   : > { %v1191_v15 = vmax.f32 %v828_v10, 0.0 }
 0x132   : > { %v832_v52 = vpop.f32.mrb[32].mxu0  ;;  %v9693_v18 = vld [vmem:[#allocation2 + $0x68] sm:$0xff] }
 0x133   : > { %1277 = vst.msk [vmem:[#allocation2 + $0x78] sm:$0xff] %vm1261_vm5, %v1191_v15  ;;  %v833_v19 = vadd.f32 %v9573_v2, %v832_v52  ;;  %v7893_v20 = vpop.f32.mrb[33].mxu0  ;;  %8051 = vmatmul.mubr.msk.f32.gmra.mrb[138].mxu0 %vm426_vm4, %v399_v12  ;;  %8103 = vmatpush3.msra.mxu1 %v1413_v9  ;;  %v1514_v25 = vmax.f32 %v1510_v21, %v9693_v18  ;;  %v404_v15 = vld [vmem:[%s9344_s21 + $0x250] sm:$0xff] }
 0x134   : > { %8053 = vmatprep.mubr.msk.f32.mxu0 %vm9220_vm1, %v9221_v6  ;;  %8105 = vmatmul.mubr.msk.f32.vlgmr.msra.gmra.mrb[0].mxu1 %vm1414_vm7, %v9691_v16 }
 0x135   : > { %v1192_v23 = vmax.f32 %v833_v19, 0.0  ;;  %8113 = vmatprep.mubr.msk.f32.mxu1 %vm1414_vm7, %v9525_v55  ;;  %v1522_v34 = vrot.slane %v1514_v25, 1  ;;  %v1535_v53 = vrot.slane %v1514_v25, 2 }
 0x136   : > { %v837_v27 = vpop.f32.mrb[34].mxu0  ;;  %v9708_v29 = vld [vmem:[#allocation2 + $0x70] sm:$0xff] }
 0x137   : > { %1278 = vst.msk [vmem:[#allocation2 + $0x80] sm:$0xff] %vm1261_vm5, %v1192_v23  ;;  %v838_v63 = vadd.f32 %v9573_v2, %v837_v27  ;;  %v7896_v30 = vpop.f32.mrb[35].mxu0  ;;  %8054 = vmatmul.mubr.msk.f32.gmra.mrb[140].mxu0 %vm426_vm4, %v400_v22  ;;  %v1515_v31 = vmax.f32 %v1511_v24, %v9708_v29  ;;  %v405_v24 = vld [vmem:[%s9344_s21 + $0x258] sm:$0xff] }
 0x138   : > { %8056 = vmatprep.mubr.msk.f32.mxu0 %vm9220_vm1, %v9221_v6  ;;  %v406_v30 = vld [vmem:[%s9344_s21 + $0x260] sm:$0xff] }
 0x139   : > { %v1193_v32 = vmax.f32 %v838_v63, 0.0  ;;  %v1523_v35 = vrot.slane %v1515_v31, 1  ;;  %v1536_v43 = vrot.slane %v1515_v31, 2 }
 0x13a   : > { %v842_v36 = vpop.f32.mrb[36].mxu0  ;;  %v9718_v37 = vld [vmem:[#allocation2 + $0x78] sm:$0xff] }
 0x13b   : > { %1279 = vst.msk [vmem:[#allocation2 + $0x88] sm:$0xff] %vm1261_vm5, %v1193_v32  ;;  %v843_v39 = vadd.f32 %v9573_v2, %v842_v36  ;;  %v7899_v40 = vpop.f32.mrb[37].mxu0  ;;  %8057 = vmatmul.mubr.msk.f32.gmra.mrb[142].mxu0 %vm426_vm4, %v401_v13  ;;  %v1516_v41 = vmax.f32 %v1512_v33, %v9718_v37  ;;  %v1524_v42 = vsel %vm1386_vm8, %v1522_v34, %v1523_v35 }
 0x13c   : > { %8059 = vmatprep.mubr.msk.f32.mxu0 %vm9220_vm1, %v9221_v6  ;;  %v1532_v50 = vmax.f32 %v1514_v25, %v1524_v42  ;;  %v1537_v62 = vsel %vm1400_vm9, %v1535_v53, %v1536_v43 }
 0x13d   : > { %v1194_v45 = vmax.f32 %v843_v39, 0.0  ;;  %v1525_v46 = vrot.slane %v1516_v41, 1  ;;  %v1538_v47 = vrot.slane %v1516_v41, 2  ;;  %v407_v39 = vld [vmem:[%s9344_s21 + $0x268] sm:$0xff] }
 0x13e   : > { %v847_v49 = vpop.f32.mrb[38].mxu0  ;;  %v1509_v54 = vld [vmem:[#allocation2 + $0x80] sm:$0x3]  ;;  %v1545_v8 = vmax.f32 %v1532_v50, %v1537_v62 }
 0x13f   : > { %1280 = vst.msk [vmem:[#allocation2 + $0x90] sm:$0xff] %vm1261_vm5, %v1194_v45  ;;  %v848_v56 = vadd.f32 %v9573_v2, %v847_v49  ;;  %v7902_v57 = vpop.f32.mrb[39].mxu0  ;;  %8060 = vmatmul.mubr.msk.f32.gmra.mrb[144].mxu0 %vm426_vm4, %v402_v26  ;;  %v1526_v58 = vsel %vm1386_vm8, %v1523_v35, %v1525_v46  ;;  %v1517_v59 = vmax.f32 %v1513_v48, %v1509_v54  ;;  %v1628_v54 = vld [vmem:[#allocation2 + $0x80] sm:$0x3] }
 0x140   : > { %8062 = vmatprep.mubr.msk.f32.mxu0 %vm9220_vm1, %v9221_v6  ;;  %v1533_v61 = vmax.f32 %v1515_v31, %v1526_v58  ;;  %v1539_v1 = vsel %vm1400_vm9, %v1536_v43, %v1538_v47 }
 0x141   : > { %v1195_v0 = vmax.f32 %v848_v56, 0.0  ;;  %v1527_v4 = vrot.slane %v1517_v59, 1  ;;  %v1540_v5 = vrot.slane %v1517_v59, 2 }
 0x142   : > { %v852_v7 = vpop.f32.mrb[40].mxu0  ;;  %v1546_v9 = vmax.f32 %v1533_v61, %v1539_v1  ;;  %v1629_v31 = vld [vmem:[#allocation2 + $0x82] sm:$0xff] }
 0x143   : > { %1281 = vst.msk [vmem:[#allocation2 + $0x98] sm:$0xff] %vm1261_vm5, %v1195_v0  ;;  %v853_v10 = vadd.f32 %v9573_v2, %v852_v7  ;;  %v7905_v11 = vpop.f32.mrb[41].mxu0  ;;  %8063 = vmatmul.mubr.msk.f32.gmra.mrb[146].mxu0 %vm426_vm4, %v403_v60  ;;  %v1528_v12 = vsel %vm1386_vm8, %v1525_v46, %v1527_v4  ;;  %v1541_v19 = vsel %vm1400_vm9, %v1538_v47, %v1540_v5 }
 0x144   : > { %8065 = vmatprep.mubr.msk.f32.mxu0 %vm9220_vm1, %v9221_v6  ;;  %v8714_v14 = vpack.c.bf16 %v1546_v9, %v1545_v8  ;;  %v1534_v52 = vmax.f32 %v1516_v41, %v1528_v12  ;;  %v1637_v38 = vmax.f32 %v9693_v18, %v1629_v31 }
 0x145   : > { %v1196_v17 = vmax.f32 %v853_v10, 0.0 }
 0x146   : > { %v857_v20 = vpop.f32.mrb[42].mxu0  ;;  %8715 = vmatprep.subr.bf16.mxu1 %v8714_v14  ;;  %v1547_v21 = vmax.f32 %v1534_v52, %v1541_v19  ;;  %v1630_v33 = vld [vmem:[#allocation2 + $0x8a] sm:$0xff] }
 0x147   : > { %1282 = vst.msk [vmem:[#allocation2 + $0xa0] sm:$0xff] %vm1261_vm5, %v1196_v17  ;;  %v858_v22 = vadd.f32 %v9573_v2, %v857_v20  ;;  %v7908_v23 = vpop.f32.mrb[43].mxu0  ;;  %8066 = vmatmul.mubr.msk.f32.gmra.mrb[148].mxu0 %vm426_vm4, %v404_v15  ;;  %8717 = vmatpush3.bf16.msra.mxu1 %v8714_v14  ;;  %v1638_v41 = vmax.f32 %v9708_v29, %v1630_v33  ;;  %v408_v29 = vld [vmem:[%s9344_s21 + $0x270] sm:$0xff]  ;;  %v410_v17 = vld [vmem:[%s9344_s21 + $0x280] sm:$0xff] }
 0x148   : > { %8111 = vmatprep.subr.mxu1 %v1547_v21  ;;  %8068 = vmatprep.mubr.msk.f32.mxu0 %vm9220_vm1, %v9221_v6 }
 0x149   : > { %v1197_v25 = vmax.f32 %v858_v22, 0.0 }
 0x14a   : > { %v862_v27 = vpop.f32.mrb[44].mxu0  ;;  %v1631_v43 = vld [vmem:[#allocation2 + $0x92] sm:$0xff]  ;;  %v1632_v47 = vld [vmem:[#allocation2 + $0x9a] sm:$0x3] }
 0x14b   : > { %1283 = vst.msk [vmem:[#allocation2 + $0xa8] sm:$0xff] %vm1261_vm5, %v1197_v25  ;;  %v863_v28 = vadd.f32 %v9573_v2, %v862_v27  ;;  %v7911_v63 = vpop.f32.mrb[45].mxu0  ;;  %8069 = vmatmul.mubr.msk.f32.gmra.mrb[150].mxu0 %vm426_vm4, %v405_v24  ;;  %8112 = vmatpush3.msra.mxu1 %v1547_v21  ;;  %v1639_v49 = vmax.f32 %v9718_v37, %v1631_v43  ;;  %v409_v37 = vld [vmem:[%s9344_s21 + $0x278] sm:$0xff] }
 0x14c   : > { %8071 = vmatprep.mubr.msk.f32.mxu0 %vm9220_vm1, %v9221_v6  ;;  %8114 = vmatmul.mubr.msk.f32.vlgmr.msra.gmra.mrb[2].mxu1 %vm1414_vm7, %v9691_v16  ;;  %v1640_v59 = vmax.f32 %v1628_v54, %v1632_v47 }
 0x14d   : > { %v1198_v13 = vmax.f32 %v863_v28, 0.0  ;;  %8122 = vmatprep.mubr.msk.f32.mxu1 %vm1414_vm7, %v9525_v55 }
 0x14e   : > { %v867_v32 = vpop.f32.mrb[46].mxu0  ;;  %v9761_v34 = vld [vmem:[#allocation2 + $0x9c] sm:$0xff] }
 0x14f   : > { %1284 = vst.msk [vmem:[#allocation2 + $0xb0] sm:$0xff] %vm1261_vm5, %v1198_v13  ;;  %v868_v35 = vadd.f32 %v9573_v2, %v867_v32  ;;  %v7914_v36 = vpop.f32.mrb[47].mxu0  ;;  %8072 = vmatmul.mubr.msk.f32.gmra.mrb[152].mxu0 %vm426_vm4, %v406_v30  ;;  %v1641_v42 = vmax.f32 %v1637_v38, %v9761_v34  ;;  %v411_v32 = vld [vmem:[%s9344_s21 + $0x288] sm:$0xff] }
 0x150   : > { %8074 = vmatprep.mubr.msk.f32.mxu0 %vm9220_vm1, %v9221_v6 }
 0x151   : > { %v1199_v40 = vmax.f32 %v868_v35, 0.0  ;;  %v1649_v50 = vrot.slane %v1641_v42, 1  ;;  %v1662_v52 = vrot.slane %v1641_v42, 2 }
 0x152   : > { %v872_v26 = vpop.f32.mrb[48].mxu0  ;;  %v9772_v44 = vld [vmem:[#allocation2 + $0xa4] sm:$0xff] }
 0x153   : > { %1285 = vst.msk [vmem:[#allocation2 + $0xb8] sm:$0xff] %vm1261_vm5, %v1199_v40  ;;  %v873_v45 = vadd.f32 %v9573_v2, %v872_v26  ;;  %v7917_v46 = vpop.f32.mrb[49].mxu0  ;;  %8075 = vmatmul.mubr.msk.f32.gmra.mrb[154].mxu0 %vm426_vm4, %v407_v39  ;;  %v1642_v18 = vmax.f32 %v1638_v41, %v9772_v44 }
 0x154   : > { %8077 = vmatprep.mubr.msk.f32.mxu0 %vm9220_vm1, %v9221_v6 }
 0x155   : > { %v1200_v48 = vmax.f32 %v873_v45, 0.0  ;;  %v1650_v53 = vrot.slane %v1642_v18, 1  ;;  %v1663_v7 = vrot.slane %v1642_v18, 2 }
 0x156   : > { %v877_v56 = vpop.f32.mrb[50].mxu0  ;;  %v9782_v57 = vld [vmem:[#allocation2 + $0xac] sm:$0xff]  ;;  %v1636_v58 = vld [vmem:[#allocation2 + $0xb4] sm:$0x3] }
 0x157   : > { %1286 = vst.msk [vmem:[#allocation2 + $0xc0] sm:$0xff] %vm1261_vm5, %v1200_v48  ;;  %v878_v60 = vadd.f32 %v9573_v2, %v877_v56  ;;  %v7920_v61 = vpop.f32.mrb[51].mxu0  ;;  %8078 = vmatmul.mubr.msk.f32.gmra.mrb[156].mxu0 %vm426_vm4, %v408_v29  ;;  %v1643_v62 = vmax.f32 %v1639_v49, %v9782_v57  ;;  %v1651_v0 = vsel %vm1386_vm8, %v1649_v50, %v1650_v53 }
 0x158   : > { %8080 = vmatprep.mubr.msk.f32.mxu0 %vm9220_vm1, %v9221_v6  ;;  %v1644_v1 = vmax.f32 %v1640_v59, %v1636_v58  ;;  %v1659_v10 = vmax.f32 %v1641_v42, %v1651_v0  ;;  %v1664_v22 = vsel %vm1400_vm9, %v1662_v52, %v1663_v7 }
 0x159   : > { %v1201_v4 = vmax.f32 %v878_v60, 0.0  ;;  %v1652_v5 = vrot.slane %v1643_v62, 1  ;;  %v1665_v8 = vrot.slane %v1643_v62, 2 }
 0x15a   : > { %v882_v9 = vpop.f32.mrb[52].mxu0  ;;  %v1654_v11 = vrot.slane %v1644_v1, 1  ;;  %v1667_v24 = vrot.slane %v1644_v1, 2  ;;  %v1672_v27 = vmax.f32 %v1659_v10, %v1664_v22  ;;  %v1756_v41 = vld [vmem:[#allocation2 + $0xb6] sm:$0xff] }
 0x15b   : > { %1287 = vst.msk [vmem:[#allocation2 + $0xc8] sm:$0xff] %vm1261_vm5, %v1201_v4  ;;  %v883_v12 = vadd.f32 %v9573_v2, %v882_v9  ;;  %v7923_v14 = vpop.f32.mrb[53].mxu0  ;;  %8081 = vmatmul.mubr.msk.f32.gmra.mrb[158].mxu0 %vm426_vm4, %v409_v37  ;;  %v1653_v15 = vsel %vm1386_vm8, %v1650_v53, %v1652_v5  ;;  %v1666_v23 = vsel %vm1400_vm9, %v1663_v7, %v1665_v8  ;;  %v1755_v9 = vld [vmem:[#allocation2 + $0xb4] sm:$0x3] }
 0x15c   : > { %8083 = vmatprep.mubr.msk.f32.mxu0 %vm9220_vm1, %v9221_v6  ;;  %v1660_v19 = vmax.f32 %v1642_v18, %v1653_v15  ;;  %v1655_v20 = vsel %vm1386_vm8, %v1652_v5, %v1654_v11  ;;  %v1668_v35 = vsel %vm1400_vm9, %v1665_v8, %v1667_v24  ;;  %v1764_v47 = vmax.f32 %v9761_v34, %v1756_v41 }
 0x15d   : > { %v1202_v21 = vmax.f32 %v883_v12, 0.0  ;;  %v1661_v63 = vmax.f32 %v1643_v62, %v1655_v20 }
 0x15e   : > { %v887_v25 = vpop.f32.mrb[54].mxu0  ;;  %v1673_v28 = vmax.f32 %v1660_v19, %v1666_v23  ;;  %v1757_v43 = vld [vmem:[#allocation2 + $0xbe] sm:$0xff] }
 0x15f   : > { %1288 = vst.msk [vmem:[#allocation2 + $0xd0] sm:$0xff] %vm1261_vm5, %v1202_v21  ;;  %v888_v30 = vadd.f32 %v9573_v2, %v887_v25  ;;  %v7926_v31 = vpop.f32.mrb[55].mxu0  ;;  %8084 = vmatmul.mubr.msk.f32.gmra.mrb[160].mxu0 %vm426_vm4, %v410_v17  ;;  %v1674_v38 = vmax.f32 %v1661_v63, %v1668_v35  ;;  %v1765_v48 = vmax.f32 %v9772_v44, %v1757_v43 }
 0x160   : > { %8086 = vmatprep.mubr.msk.f32.mxu0 %vm9220_vm1, %v9221_v6  ;;  %v8718_v13 = vpack.c.bf16 %v1673_v28, %v1672_v27 }
 0x161   : > { %v1203_v33 = vmax.f32 %v888_v30, 0.0 }
 0x162   : > { %v892_v36 = vpop.f32.mrb[56].mxu0  ;;  %8719 = vmatprep.subr.bf16.mxu1 %v8718_v13  ;;  %v1758_v53 = vld [vmem:[#allocation2 + $0xc6] sm:$0xff]  ;;  %v1759_v37 = vld [vmem:[#allocation2 + $0xce] sm:$0x3] }
 0x163   : > { %1289 = vst.msk [vmem:[#allocation2 + $0xd8] sm:$0xff] %vm1261_vm5, %v1203_v33  ;;  %v893_v39 = vadd.f32 %v9573_v2, %v892_v36  ;;  %v7929_v40 = vpop.f32.mrb[57].mxu0  ;;  %8087 = vmatmul.mubr.msk.f32.gmra.mrb[162].mxu0 %vm426_vm4, %v411_v32  ;;  %8721 = vmatpush3.bf16.msra.mxu1 %v8718_v13  ;;  %v1766_v60 = vmax.f32 %v9782_v57, %v1758_v53 }
 0x164   : > { %8120 = vmatprep.subr.mxu1 %v1674_v38  ;;  %8089 = vmatprep.mubr.msk.f32.mxu0 %vm9220_vm1, %v9221_v6  ;;  %v1767_v12 = vmax.f32 %v1755_v9, %v1759_v37 }
 0x165   : > { %v1204_v42 = vmax.f32 %v893_v39, 0.0 }
 0x166   : > { %v897_v26 = vpop.f32.mrb[58].mxu0  ;;  %v9814_v45 = vld [vmem:[#allocation2 + $0xd0] sm:$0xff] }
 0x167   : > { %1290 = vst.msk [vmem:[#allocation2 + $0xe0] sm:$0xff] %vm1261_vm5, %v1204_v42  ;;  %v898_v46 = vadd.f32 %v9573_v2, %v897_v26  ;;  %v7932_v18 = vpop.f32.mrb[59].mxu0  ;;  %8121 = vmatpush3.msra.mxu1 %v1674_v38  ;;  %v1768_v49 = vmax.f32 %v1764_v47, %v9814_v45 }
 0x168   : > { %8123 = vmatmul.mubr.msk.f32.vlgmr.msra.gmra.mrb[4].mxu1 %vm1414_vm7, %v9691_v16 }
 0x169   : > { %v1205_v29 = vmax.f32 %v898_v46, 0.0  ;;  %8131 = vmatprep.mubr.msk.f32.mxu1 %vm1414_vm7, %v9525_v55  ;;  %v1776_v44 = vrot.slane %v1768_v49, 1  ;;  %v1789_v52 = vrot.slane %v1768_v49, 2 }
 0x16a   : > { %v902_v50 = vpop.f32.mrb[60].mxu0  ;;  %v9825_v54 = vld [vmem:[#allocation2 + $0xd8] sm:$0xff] }
 0x16b   : > { %1291 = vst.msk [vmem:[#allocation2 + $0xe8] sm:$0xff] %vm1261_vm5, %v1205_v29  ;;  %v903_v56 = vadd.f32 %v9573_v2, %v902_v50  ;;  %v7935_v34 = vpop.f32.mrb[61].mxu0  ;;  %v1769_v58 = vmax.f32 %v1765_v48, %v9825_v54 }
 0x16d   : > { %v1206_v59 = vmax.f32 %v903_v56, 0.0  ;;  %v1777_v61 = vrot.slane %v1769_v58, 1  ;;  %v1790_v8 = vrot.slane %v1769_v58, 2 }
 0x16e   : > { %v907_v62 = vpop.f32.mrb[62].mxu0  ;;  %v9831_v0 = vld [vmem:[#allocation2 + $0xe0] sm:$0xff] }
 0x16f   : > { %1292 = vst.msk [vmem:[#allocation2 + $0xf0] sm:$0xff] %vm1261_vm5, %v1206_v59  ;;  %v908_v1 = vadd.f32 %v9573_v2, %v907_v62  ;;  %v7938_v4 = vpop.f32.mrb[63].mxu0  ;;  %v1770_v5 = vmax.f32 %v1766_v60, %v9831_v0  ;;  %v1778_v7 = vsel %vm1386_vm8, %v1776_v44, %v1777_v61  ;;  %v1791_v24 = vsel %vm1400_vm9, %v1789_v52, %v1790_v8 }
 0x170   : > { %v1786_v15 = vmax.f32 %v1768_v49, %v1778_v7 }
 0x171   : > { %v1207_v10 = vmax.f32 %v908_v1, 0.0  ;;  %v1779_v11 = vrot.slane %v1770_v5, 1  ;;  %v1792_v57 = vrot.slane %v1770_v5, 2 }
 0x172   : > { %v912_v14 = vpop.f32.mrb[64].mxu0  ;;  %v1763_v17 = vld [vmem:[#allocation2 + $0xe8] sm:$0x3]  ;;  %v1799_v31 = vmax.f32 %v1786_v15, %v1791_v24 }
 0x173   : > { %1293 = vst.msk [vmem:[#allocation2 + $0xf8] sm:$0xff] %vm1261_vm5, %v1207_v10  ;;  %v913_v19 = vadd.f32 %v9573_v2, %v912_v14  ;;  %v7941_v20 = vpop.f32.mrb[65].mxu0  ;;  %v1780_v21 = vsel %vm1386_vm8, %v1777_v61, %v1779_v11  ;;  %v1771_v22 = vmax.f32 %v1767_v12, %v1763_v17  ;;  %v1793_v27 = vsel %vm1400_vm9, %v1790_v8, %v1792_v57 }
 0x174   : > { %v1787_v23 = vmax.f32 %v1769_v58, %v1780_v21 }
 0x175   : > { %v1208_v25 = vmax.f32 %v913_v19, 0.0  ;;  %v1781_v28 = vrot.slane %v1771_v22, 1  ;;  %v1794_v63 = vrot.slane %v1771_v22, 2 }
 0x176   : > { %v917_v30 = vpop.f32.mrb[66].mxu0  ;;  %v1800_v13 = vmax.f32 %v1787_v23, %v1793_v27  ;;  %v1883_v48 = vld [vmem:[#allocation2 + $0xea] sm:$0xff] }
 0x177   : > { %1294 = vst.msk [vmem:[#allocation2 + $0x100] sm:$0xff] %vm1261_vm5, %v1208_v25  ;;  %v918_v32 = vadd.f32 %v9573_v2, %v917_v30  ;;  %v7944_v33 = vpop.f32.mrb[67].mxu0  ;;  %v1782_v35 = vsel %vm1386_vm8, %v1779_v11, %v1781_v28  ;;  %v1795_v40 = vsel %vm1400_vm9, %v1792_v57, %v1794_v63  ;;  %v1891_v59 = vmax.f32 %v9814_v45, %v1883_v48 }
 0x178   : > { %v8722_v36 = vpack.c.bf16 %v1800_v13, %v1799_v31  ;;  %v1788_v38 = vmax.f32 %v1770_v5, %v1782_v35 }
 0x179   : > { %v1209_v39 = vmax.f32 %v918_v32, 0.0 }
 0x17a   : > { %v922_v41 = vpop.f32.mrb[68].mxu0  ;;  %8723 = vmatprep.subr.bf16.mxu1 %v8722_v36  ;;  %v1801_v42 = vmax.f32 %v1788_v38, %v1795_v40  ;;  %v1884_v53 = vld [vmem:[#allocation2 + $0xf2] sm:$0xff] }
 0x17b   : > { %1295 = vst.msk [vmem:[#allocation2 + $0x108] sm:$0xff] %vm1261_vm5, %v1209_v39  ;;  %v923_v26 = vadd.f32 %v9573_v2, %v922_v41  ;;  %v7947_v43 = vpop.f32.mrb[69].mxu0  ;;  %8725 = vmatpush3.bf16.msra.mxu1 %v8722_v36  ;;  %v1892_v44 = vmax.f32 %v9825_v54, %v1884_v53  ;;  %v1882_v54 = vld [vmem:[#allocation2 + $0xe8] sm:$0x3] }
 0x17c   : > { %8129 = vmatprep.subr.mxu1 %v1801_v42 }
 0x17d   : > { %v1210_v46 = vmax.f32 %v923_v26, 0.0 }
 0x17e   : > { %v927_v18 = vpop.f32.mrb[70].mxu0  ;;  %v1885_v37 = vld [vmem:[#allocation2 + $0xfa] sm:$0xff]  ;;  %v1886_v8 = vld [vmem:[#allocation2 + $0x102] sm:$0x3] }
 0x17f   : > { %1296 = vst.msk [vmem:[#allocation2 + $0x110] sm:$0xff] %vm1261_vm5, %v1210_v46  ;;  %v928_v47 = vadd.f32 %v9573_v2, %v927_v18  ;;  %v7950_v29 = vpop.f32.mrb[71].mxu0  ;;  %8130 = vmatpush3.msra.mxu1 %v1801_v42  ;;  %v1893_v45 = vmax.f32 %v9831_v0, %v1885_v37  ;;  %v1894_v15 = vmax.f32 %v1882_v54, %v1886_v8 }
 0x180   : > { %8132 = vmatmul.mubr.msk.f32.vlgmr.msra.gmra.mrb[6].mxu1 %vm1414_vm7, %v9691_v16 }
 0x181   : > { %v1211_v49 = vmax.f32 %v928_v47, 0.0  ;;  %8140 = vmatprep.mubr.msk.f32.mxu1 %vm1414_vm7, %v9525_v55 }
 0x182   : > { %v932_v50 = vpop.f32.mrb[72].mxu0  ;;  %v9854_v56 = vld [vmem:[#allocation2 + $0x104] sm:$0xff] }
 0x183   : > { %1297 = vst.msk [vmem:[#allocation2 + $0x118] sm:$0xff] %vm1261_vm5, %v1211_v49  ;;  %v933_v34 = vadd.f32 %v9573_v2, %v932_v50  ;;  %v7953_v58 = vpop.f32.mrb[73].mxu0  ;;  %v1895_v61 = vmax.f32 %v1891_v59, %v9854_v56  ;;  %v9886_v50 = vld [vmem:[%s12234_s2] ss:$0 sm:$0xff] }
 0x185   : > { %v1212_v60 = vmax.f32 %v933_v34, 0.0  ;;  %v1903_v10 = vrot.slane %v1895_v61, 1  ;;  %v1916_v13 = vrot.slane %v1895_v61, 2 }
 0x186   : > { %v937_v62 = vpop.f32.mrb[74].mxu0  ;;  %v9861_v1 = vld [vmem:[#allocation2 + $0x10c] sm:$0xff] }
 0x187   : > { %1298 = vst.msk [vmem:[#allocation2 + $0x120] sm:$0xff] %vm1261_vm5, %v1212_v60  ;;  %v938_v4 = vadd.f32 %v9573_v2, %v937_v62  ;;  %v7956_v5 = vpop.f32.mrb[75].mxu0  ;;  %v1896_v7 = vmax.f32 %v1892_v44, %v9861_v1 }
 0x189   : > { %v1213_v9 = vmax.f32 %v938_v4, 0.0  ;;  %v1904_v11 = vrot.slane %v1896_v7, 1  ;;  %v1917_v23 = vrot.slane %v1896_v7, 2 }
 0x18a   : > { %v942_v57 = vpop.f32.mrb[76].mxu0  ;;  %v9867_v12 = vld [vmem:[#allocation2 + $0x114] sm:$0xff]  ;;  %v1890_v14 = vld [vmem:[#allocation2 + $0x11c] sm:$0x3] }
 0x18b   : > { %1299 = vst.msk [vmem:[#allocation2 + $0x128] sm:$0xff] %vm1261_vm5, %v1213_v9  ;;  %v943_v52 = vadd.f32 %v9573_v2, %v942_v57  ;;  %v7959_v17 = vpop.f32.mrb[77].mxu0  ;;  %v1897_v19 = vmax.f32 %v1893_v45, %v9867_v12  ;;  %v1905_v20 = vsel %vm1386_vm8, %v1903_v10, %v1904_v11  ;;  %v1898_v21 = vmax.f32 %v1894_v15, %v1890_v14 }
 0x18c   : > { %v1913_v27 = vmax.f32 %v1895_v61, %v1905_v20  ;;  %v1918_v36 = vsel %vm1400_vm9, %v1916_v13, %v1917_v23 }
 0x18d   : > { %v1214_v22 = vmax.f32 %v943_v52, 0.0  ;;  %v1906_v0 = vrot.slane %v1897_v19, 1  ;;  %v1919_v24 = vrot.slane %v1897_v19, 2  ;;  %v1908_v28 = vrot.slane %v1898_v21, 1 }
 0x18e   : > { %v947_v25 = vpop.f32.mrb[78].mxu0  ;;  %v1921_v39 = vrot.slane %v1898_v21, 2  ;;  %v1926_v41 = vmax.f32 %v1913_v27, %v1918_v36 }
 0x18f   : > { %1300 = vst.msk [vmem:[#allocation2 + $0x130] sm:$0xff] %vm1261_vm5, %v1214_v22  ;;  %v948_v63 = vadd.f32 %v9573_v2, %v947_v25  ;;  %v7962_v30 = vpop.f32.mrb[79].mxu0  ;;  %v1907_v31 = vsel %vm1386_vm8, %v1904_v11, %v1906_v0  ;;  %v1909_v33 = vsel %vm1386_vm8, %v1906_v0, %v1908_v28  ;;  %v1920_v38 = vsel %vm1400_vm9, %v1917_v23, %v1919_v24  ;;  %v2009_v23 = vld [vmem:[#allocation2 + $0x11c] sm:$0x3] }
 0x190   : > { %v1914_v32 = vmax.f32 %v1896_v7, %v1907_v31  ;;  %v1915_v26 = vmax.f32 %v1897_v19, %v1909_v33  ;;  %v1922_v29 = vsel %vm1400_vm9, %v1919_v24, %v1921_v39 }
 0x191   : > { %v1215_v35 = vmax.f32 %v948_v63, 0.0 }
 0x192   : > { %v952_v40 = vpop.f32.mrb[80].mxu0  ;;  %v1927_v42 = vmax.f32 %v1914_v32, %v1920_v38  ;;  %v1928_v49 = vmax.f32 %v1915_v26, %v1922_v29  ;;  %v2011_v60 = vld [vmem:[#allocation2 + $0x126] sm:$0xff] }
 0x193   : > { %1301 = vst.msk [vmem:[#allocation2 + $0x138] sm:$0xff] %vm1261_vm5, %v1215_v35  ;;  %v953_v43 = vadd.f32 %v9573_v2, %v952_v40  ;;  %v7965_v46 = vpop.f32.mrb[81].mxu0  ;;  %v2010_v2 = vld [vmem:[#allocation2 + $0x11e] sm:$0xff]  ;;  %v2019_v5 = vmax.f32 %v9861_v1, %v2011_v60 }
 0x194   : > { %v8726_v18 = vpack.c.bf16 %v1927_v42, %v1926_v41  ;;  %v2018_v37 = vmax.f32 %v9854_v56, %v2010_v2 }
 0x195   : > { %v1216_v47 = vmax.f32 %v953_v43, 0.0 }
 0x196   : > { %v957_v48 = vpop.f32.mrb[82].mxu0  ;;  %8727 = vmatprep.subr.bf16.mxu1 %v8726_v18  ;;  %v2012_v9 = vld [vmem:[#allocation2 + $0x12e] sm:$0xff]  ;;  %v2013_v17 = vld [vmem:[#allocation2 + $0x136] sm:$0x3] }
 0x197   : > { %1302 = vst.msk [vmem:[#allocation2 + $0x140] sm:$0xff] %vm1261_vm5, %v1216_v47  ;;  %v958_v53 = vadd.f32 %v9886_v50, %v957_v48  ;;  %v7968_v34 = vpop.f32.mrb[83].mxu0  ;;  %8729 = vmatpush3.bf16.msra.mxu1 %v8726_v18  ;;  %v2020_v57 = vmax.f32 %v9867_v12, %v2012_v9  ;;  %v2021_v27 = vmax.f32 %v2009_v23, %v2013_v17 }
 0x198   : > { %8138 = vmatprep.subr.mxu1 %v1928_v49 }
 0x199   : > { %v1217_v58 = vmax.f32 %v958_v53, 0.0 }
 0x19a   : > { %v962_v59 = vpop.f32.mrb[84].mxu0  ;;  %v9889_v44 = vld [vmem:[#allocation2 + $0x138] sm:$0xff] }
 0x19b   : > { %1303 = vst.msk [vmem:[#allocation2 + $0x148] sm:$0xff] %vm1261_vm5, %v1217_v58  ;;  %v963_v61 = vadd.f32 %v9886_v50, %v962_v59  ;;  %v7971_v62 = vpop.f32.mrb[85].mxu0  ;;  %8139 = vmatpush3.msra.mxu1 %v1928_v49  ;;  %v2022_v7 = vmax.f32 %v2018_v37, %v9889_v44 }
 0x19c   : > { %8141 = vmatmul.mubr.msk.f32.vlgmr.msra.gmra.mrb[8].mxu1 %vm1414_vm7, %v9691_v16 }
 0x19d   : > { %v1218_v4 = vmax.f32 %v963_v61, 0.0  ;;  %8149 = vmatprep.mubr.msk.f32.mxu1 %vm1414_vm7, %v9525_v55  ;;  %v2030_v1 = vrot.slane %v2022_v7, 1  ;;  %v2043_v30 = vrot.slane %v2022_v7, 2 }
 0x19e   : > { %v967_v8 = vpop.f32.mrb[86].mxu0  ;;  %v9900_v45 = vld [vmem:[#allocation2 + $0x140] sm:$0xff] }
 0x19f   : > { %1304 = vst.msk [vmem:[#allocation2 + $0x150] sm:$0xff] %vm1261_vm5, %v1218_v4  ;;  %v968_v10 = vadd.f32 %v9886_v50, %v967_v8  ;;  %v7974_v56 = vpop.f32.mrb[87].mxu0  ;;  %v2023_v11 = vmax.f32 %v2019_v5, %v9900_v45 }
 0x1a1   : > { %v1219_v54 = vmax.f32 %v968_v10, 0.0  ;;  %v2031_v14 = vrot.slane %v2023_v11, 1  ;;  %v2044_v0 = vrot.slane %v2023_v11, 2 }
 0x1a2   : > { %v972_v15 = vpop.f32.mrb[88].mxu0  ;;  %v9906_v52 = vld [vmem:[#allocation2 + $0x148] sm:$0xff] }
 0x1a3   : > { %1305 = vst.msk [vmem:[#allocation2 + $0x158] sm:$0xff] %vm1261_vm5, %v1219_v54  ;;  %v973_v19 = vadd.f32 %v9886_v50, %v972_v15  ;;  %v7977_v20 = vpop.f32.mrb[89].mxu0  ;;  %v2024_v21 = vmax.f32 %v2020_v57, %v9906_v52  ;;  %v2032_v22 = vsel %vm1386_vm8, %v2030_v1, %v2031_v14  ;;  %v2045_v38 = vsel %vm1400_vm9, %v2043_v30, %v2044_v0 }
 0x1a4   : > { %v2040_v63 = vmax.f32 %v2022_v7, %v2032_v22 }
 0x1a5   : > { %v1220_v24 = vmax.f32 %v973_v19, 0.0  ;;  %v2033_v25 = vrot.slane %v2024_v21, 1  ;;  %v2046_v12 = vrot.slane %v2024_v21, 2 }
 0x1a6   : > { %v977_v28 = vpop.f32.mrb[90].mxu0  ;;  %v2017_v31 = vld [vmem:[#allocation2 + $0x150] sm:$0x3]  ;;  %v2053_v43 = vmax.f32 %v2040_v63, %v2045_v38 }
 0x1a7   : > { %1306 = vst.msk [vmem:[#allocation2 + $0x160] sm:$0xff] %vm1261_vm5, %v1220_v24  ;;  %v978_v13 = vadd.f32 %v9886_v50, %v977_v28  ;;  %v7980_v32 = vpop.f32.mrb[91].mxu0  ;;  %v2034_v33 = vsel %vm1386_vm8, %v2031_v14, %v2033_v25  ;;  %v2025_v35 = vmax.f32 %v2021_v27, %v2017_v31  ;;  %v2047_v40 = vsel %vm1400_vm9, %v2044_v0, %v2046_v12 }
 0x1a8   : > { %v2041_v36 = vmax.f32 %v2023_v11, %v2034_v33 }
 0x1a9   : > { %v1221_v39 = vmax.f32 %v978_v13, 0.0  ;;  %v2035_v41 = vrot.slane %v2025_v35, 1  ;;  %v2048_v42 = vrot.slane %v2025_v35, 2 }
 0x1aa   : > { %v982_v26 = vpop.f32.mrb[92].mxu0  ;;  %v2054_v46 = vmax.f32 %v2041_v36, %v2047_v40  ;;  %v2137_v5 = vld [vmem:[#allocation2 + $0x152] sm:$0xff] }
 0x1ab   : > { %1307 = vst.msk [vmem:[#allocation2 + $0x168] sm:$0xff] %vm1261_vm5, %v1221_v39  ;;  %v983_v18 = vadd.f32 %v9886_v50, %v982_v26  ;;  %v7983_v47 = vpop.f32.mrb[93].mxu0  ;;  %v2036_v29 = vsel %vm1386_vm8, %v2033_v25, %v2035_v41  ;;  %v2049_v34 = vsel %vm1400_vm9, %v2046_v12, %v2048_v42  ;;  %v2145_v54 = vmax.f32 %v9889_v44, %v2137_v5 }
 0x1ac   : > { %v8730_v48 = vpack.c.bf16 %v2054_v46, %v2053_v43  ;;  %v2042_v49 = vmax.f32 %v2024_v21, %v2036_v29 }
 0x1ad   : > { %v1222_v53 = vmax.f32 %v983_v18, 0.0 }
 0x1ae   : > { %v987_v2 = vpop.f32.mrb[94].mxu0  ;;  %8731 = vmatprep.subr.bf16.mxu1 %v8730_v48  ;;  %v2055_v58 = vmax.f32 %v2042_v49, %v2049_v34  ;;  %v2138_v9 = vld [vmem:[#allocation2 + $0x15a] sm:$0xff] }
 0x1af   : > { %1308 = vst.msk [vmem:[#allocation2 + $0x170] sm:$0xff] %vm1261_vm5, %v1222_v53  ;;  %v988_v59 = vadd.f32 %v9886_v50, %v987_v2  ;;  %v7986_v60 = vpop.f32.mrb[95].mxu0  ;;  %8733 = vmatpush3.bf16.msra.mxu1 %v8730_v48  ;;  %v2146_v1 = vmax.f32 %v9900_v45, %v2138_v9  ;;  %v2136_v45 = vld [vmem:[#allocation2 + $0x150] sm:$0x3] }
 0x1b0   : > { %8147 = vmatprep.subr.mxu1 %v2055_v58 }
 0x1b1   : > { %v1223_v61 = vmax.f32 %v988_v59, 0.0 }
 0x1b2   : > { %v992_v62 = vpop.f32.mrb[96].mxu0  ;;  %v2139_v17 = vld [vmem:[#allocation2 + $0x162] sm:$0xff]  ;;  %v2140_v0 = vld [vmem:[#allocation2 + $0x16a] sm:$0x3] }
 0x1b3   : > { %1309 = vst.msk [vmem:[#allocation2 + $0x178] sm:$0xff] %vm1261_vm5, %v1223_v61  ;;  %v993_v37 = vadd.f32 %v9886_v50, %v992_v62  ;;  %v7989_v4 = vpop.f32.mrb[97].mxu0  ;;  %8148 = vmatpush3.msra.mxu1 %v2055_v58  ;;  %v2147_v44 = vmax.f32 %v9906_v52, %v2139_v17  ;;  %v2148_v63 = vmax.f32 %v2136_v45, %v2140_v0 }
 0x1b4   : > { %8150 = vmatmul.mubr.msk.f32.vlgmr.msra.gmra.mrb[10].mxu1 %vm1414_vm7, %v9691_v16 }
 0x1b5   : > { %v1224_v7 = vmax.f32 %v993_v37, 0.0  ;;  %8158 = vmatprep.mubr.msk.f32.mxu1 %vm1414_vm7, %v9525_v55 }
 0x1b6   : > { %v997_v8 = vpop.f32.mrb[98].mxu0  ;;  %v9929_v10 = vld [vmem:[#allocation2 + $0x16c] sm:$0xff] }
 0x1b7   : > { %1310 = vst.msk [vmem:[#allocation2 + $0x180] sm:$0xff] %vm1261_vm5, %v1224_v7  ;;  %v998_v56 = vadd.f32 %v9886_v50, %v997_v8  ;;  %v7992_v11 = vpop.f32.mrb[99].mxu0  ;;  %v2149_v14 = vmax.f32 %v2145_v54, %v9929_v10 }
 0x1b9   : > { %v1225_v57 = vmax.f32 %v998_v56, 0.0  ;;  %v2157_v24 = vrot.slane %v2149_v14, 1  ;;  %v2170_v46 = vrot.slane %v2149_v14, 2 }
 0x1ba   : > { %v1002_v15 = vpop.f32.mrb[100].mxu0  ;;  %v9936_v19 = vld [vmem:[#allocation2 + $0x174] sm:$0xff] }
 0x1bb   : > { %1311 = vst.msk [vmem:[#allocation2 + $0x188] sm:$0xff] %vm1261_vm5, %v1225_v57  ;;  %v1003_v20 = vadd.f32 %v9886_v50, %v1002_v15  ;;  %v7995_v21 = vpop.f32.mrb[101].mxu0  ;;  %v2150_v22 = vmax.f32 %v2146_v1, %v9936_v19 }
 0x1bc   : > { %v2929_v21 = vld [vmem:[%s12235_s3 + $0x20] sm:$0xff] }
 0x1bd   : > { %v1226_v23 = vmax.f32 %v1003_v20, 0.0  ;;  %v2158_v25 = vrot.slane %v2150_v22, 1  ;;  %v2171_v36 = vrot.slane %v2150_v22, 2  ;;  %v412_v20 = vld [vmem:[%s9344_s21 + $0x290] sm:$0xff] }
 0x1be   : > { %v1007_v12 = vpop.f32.mrb[102].mxu0  ;;  %v9942_v27 = vld [vmem:[#allocation2 + $0x17c] sm:$0xff]  ;;  %v2144_v28 = vld [vmem:[#allocation2 + $0x184] sm:$0x3]  ;;  %8090 = vmatmul.mubr.msk.f32.gmra.mrb[164].mxu0 %vm426_vm4, %v412_v20 }
 0x1bf   : > { %1312 = vst.msk [vmem:[#allocation2 + $0x190] sm:$0xff] %vm1261_vm5, %v1226_v23  ;;  %v1008_v30 = vadd.f32 %v9886_v50, %v1007_v12  ;;  %v7998_v31 = vpop.f32.mrb[103].mxu0  ;;  %v2151_v13 = vmax.f32 %v2147_v44, %v9942_v27  ;;  %v2159_v32 = vsel %vm1386_vm8, %v2157_v24, %v2158_v25  ;;  %v2152_v33 = vmax.f32 %v2148_v63, %v2144_v28  ;;  %v2930_v24 = vld [vmem:[%s12235_s3 + $0x28] sm:$0xff]  ;;  %v2932_v28 = vld [vmem:[%s12235_s3 + $0x38] sm:$0xff] }
 0x1c0   : > { %v2167_v40 = vmax.f32 %v2149_v14, %v2159_v32  ;;  %v2172_v48 = vsel %vm1400_vm9, %v2170_v46, %v2171_v36  ;;  %8092 = vmatprep.mubr.msk.f32.mxu0 %vm9220_vm1, %v9221_v6  ;;  %v9983_v12 = vpack.c.bf16 %v2930_v24, %v2929_v21  ;;  %v2263_v46 = vld [vmem:[#allocation2 + $0x184] sm:$0x3] }
 0x1c1   : > { %v1227_v35 = vmax.f32 %v1008_v30, 0.0  ;;  %v2160_v52 = vrot.slane %v2151_v13, 1  ;;  %v2173_v38 = vrot.slane %v2151_v13, 2  ;;  %v2162_v41 = vrot.slane %v2152_v33, 1 }
 0x1c2   : > { %v1012_v39 = vpop.f32.mrb[104].mxu0  ;;  %v2175_v53 = vrot.slane %v2152_v33, 2  ;;  %v2180_v2 = vmax.f32 %v2167_v40, %v2172_v48  ;;  %v2264_v56 = vld [vmem:[#allocation2 + $0x186] sm:$0xff]  ;;  %8760 = vmatpush3.bf16.msra.mxu0 %v9983_v12  ;;  %v414_v40 = vld [vmem:[%s9344_s21 + $0x2a0] sm:$0xf] }
 0x1c3   : > { %1313 = vst.msk [vmem:[#allocation2 + $0x198] sm:$0xff] %vm1261_vm5, %v1227_v35  ;;  %v1013_v42 = vadd.f32 %v9886_v50, %v1012_v39  ;;  %v8001_v26 = vpop.f32.mrb[105].mxu0  ;;  %v2161_v43 = vsel %vm1386_vm8, %v2158_v25, %v2160_v52  ;;  %v2163_v47 = vsel %vm1386_vm8, %v2160_v52, %v2162_v41  ;;  %v2174_v49 = vsel %vm1400_vm9, %v2171_v36, %v2173_v38 }
 0x1c4   : > { %v2168_v18 = vmax.f32 %v2150_v22, %v2161_v43  ;;  %v2169_v59 = vmax.f32 %v2151_v13, %v2163_v47  ;;  %v2176_v4 = vsel %vm1400_vm9, %v2173_v38, %v2175_v53  ;;  %v2272_v17 = vmax.f32 %v9929_v10, %v2264_v56  ;;  %v413_v10 = vld [vmem:[%s9344_s21 + $0x298] sm:$0xff]  ;;  %8761 = vmatprep.subr.bf16.mxu0 %v12242_v3  ;;  %s323_s21 = sand.u32 1, %s9209_s10  }
 0x1c5   : > { %v1228_v29 = vmax.f32 %v1013_v42, 0.0  ;;  %8093 = vmatmul.mubr.msk.f32.gmra.mrb[166].mxu0 %vm426_vm4, %v413_v10  ;;  %s324_s24 = scalar_lea.vmem [#allocation5], %s323_s21  ;;  %s7128_s29 = scalar_lea.sflag [#allocation6], %s323_s21 }
 0x1c6   : > { %v1017_v34 = vpop.f32.mrb[106].mxu0  ;;  %v2181_v58 = vmax.f32 %v2168_v18, %v2174_v49  ;;  %v2182_v7 = vmax.f32 %v2169_v59, %v2176_v4  ;;  %v2265_v57 = vld [vmem:[#allocation2 + $0x18e] sm:$0xff]  ;;  %8095 = vmatprep.mubr.msk.f32.mxu0 %vm9220_vm1, %v9221_v6  ;;  %s7140_s25 = sshll.u32 %s324_s24, 4  ;;  %s12191_s25 = int_to_ptr.vmem [resolvable:$true] %s7140_s25 }
 0x1c7   : > { %1314 = vst.msk [vmem:[#allocation2 + $0x1a0] sm:$0xff] %vm1261_vm5, %v1228_v29  ;;  %v1018_v60 = vadd.f32 %v9886_v50, %v1017_v34  ;;  %v8004_v61 = vpop.f32.mrb[107].mxu0  ;;  %v2273_v23 = vmax.f32 %v9936_v19, %v2265_v57  ;;  %v2931_v19 = vld [vmem:[%s12235_s3 + $0x30] sm:$0xff]  ;;  %s9155_s14 = scalar_lea.vmem %s12191_s25, 16  ;;  %p9162_p0 = scmp.lt.s32.totalorder %s12191_s25, %s9160_s16 }
 0x1c8   : > { %v8734_v62 = vpack.c.bf16 %v2181_v58, %v2180_v2  ;;  %v9995_v13 = vpack.c.bf16 %v2932_v28, %v2931_v19  ;;  %p9156_p11 = scmp.ne.s32.totalorder %s12191_s25, %s9155_s14  ;;  %p9163_p1 = scmp.lt.s32.totalorder %s9161_s17, %s9155_s14 }
 0x1c9   : > { %v1229_v37 = vmax.f32 %v1018_v60, 0.0  ;;  %8096 = vmatmul.mubr.msk.f32.gmra.mrb[168].mxu0 %vm426_vm4, %v414_v40 }
 0x1ca   : > { %v1022_v5 = vpop.f32.mrb[108].mxu0  ;;  %8735 = vmatprep.subr.bf16.mxu1 %v8734_v62  ;;  %v2266_v0 = vld [vmem:[#allocation2 + $0x196] sm:$0xff]  ;;  %v2267_v39 = vld [vmem:[#allocation2 + $0x19e] sm:$0x3]  ;;  %8763 = vmatpush3.bf16.msra.mxu0 %v9995_v13  ;;  %p9157_p12 = pnand %p9156_p11, %p9313_p5  ;;  %p9164_p2 = por %p9163_p1, %p9162_p0 }
 0x1cb   : > { %1315 = vst.msk [vmem:[#allocation2 + $0x1a8] sm:$0xff] %vm1261_vm5, %v1229_v37  ;;  %v1023_v8 = vadd.f32 %v9886_v50, %v1022_v5  ;;  %v8007_v9 = vpop.f32.mrb[109].mxu0  ;;  %8737 = vmatpush3.bf16.msra.mxu1 %v8734_v62  ;;  %v2274_v33 = vmax.f32 %v9942_v27, %v2266_v0  ;;  %v2275_v48 = vmax.f32 %v2263_v46, %v2267_v39 }
 0x1cc   : > { %8156 = vmatprep.subr.mxu1 %v2182_v7  ;;  %8788 = vmatprep.subr.bf16.mxu0 %v12242_v3  ;;  %p9158_p13 = pneg %p9157_p12 }
 0x1cd   : > { %v1230_v11 = vmax.f32 %v1023_v8, 0.0  ;;  %8214 = vmatprep.mubr.msk.f32.mxu0 %vm9220_vm1, %v9221_v6 }
 0x1ce   : > { %v1027_v54 = vpop.f32.mrb[110].mxu0  ;;  %v9959_v1 = vld [vmem:[#allocation2 + $0x1a0] sm:$0xff]  ;;  %p9165_p3 = pnand %p9164_p2, %p9158_p13 }
 0x1cf   : > { %1316 = vst.msk [vmem:[#allocation2 + $0x1b0] sm:$0xff] %vm1261_vm5, %v1230_v11  ;;  %v1028_v14 = vadd.f32 %v9886_v50, %v1027_v54  ;;  %v8010_v15 = vpop.f32.mrb[111].mxu0  ;;  %8157 = vmatpush3.msra.mxu1 %v2182_v7  ;;  %v2276_v44 = vmax.f32 %v2272_v17, %v9959_v1 }
 0x1d0   : > { %8159 = vmatmul.mubr.msk.f32.vlgmr.msra.gmra.mrb[12].mxu1 %vm1414_vm7, %v9691_v16 }
 0x1d1   : > { %v1231_v22 = vmax.f32 %v1028_v14, 0.0  ;;  %8167 = vmatprep.mubr.msk.f32.mxu1 %vm1414_vm7, %v9525_v55  ;;  %v2284_v35 = vrot.slane %v2276_v44, 1  ;;  %v2297_v34 = vrot.slane %v2276_v44, 2 }
 0x1d2   : > { %v1032_v25 = vpop.f32.mrb[112].mxu0  ;;  %v9979_v45 = vld [vmem:[#allocation2 + $0x1a8] sm:$0xff] }
 0x1d3   : > { %1317 = vst.msk [vmem:[#allocation2 + $0x1b8] sm:$0xff] %vm1261_vm5, %v1231_v22  ;;  %v1033_v63 = vadd.f32 %v9886_v50, %v1032_v25  ;;  %v8013_v30 = vpop.f32.mrb[113].mxu0  ;;  %v2277_v31 = vmax.f32 %v2273_v23, %v9979_v45 }
 0x1d5   : > { %v1232_v32 = vmax.f32 %v1033_v63, 0.0  ;;  %v2285_v52 = vrot.slane %v2277_v31, 1  ;;  %v2298_v43 = vrot.slane %v2277_v31, 2 }
 0x1d6   : > { %v1037_v36 = vpop.f32.mrb[114].mxu0  ;;  %v10000_v38 = vld [vmem:[#allocation2 + $0x1b0] sm:$0xff] }
 0x1d7   : > { %1318 = vst.msk [vmem:[#allocation2 + $0x1c0] sm:$0xff] %vm1261_vm5, %v1232_v32  ;;  %v1038_v41 = vadd.f32 %v9886_v50, %v1037_v36  ;;  %v8016_v42 = vpop.f32.mrb[115].mxu0  ;;  %v2278_v27 = vmax.f32 %v2274_v33, %v10000_v38  ;;  %v2286_v26 = vsel %vm1386_vm8, %v2284_v35, %v2285_v52  ;;  %v2299_v37 = vsel %vm1400_vm9, %v2297_v34, %v2298_v43 }
 0x1d8   : > { %v2294_v53 = vmax.f32 %v2276_v44, %v2286_v26 }
 0x1d9   : > { %v1233_v18 = vmax.f32 %v1038_v41, 0.0  ;;  %v2287_v47 = vrot.slane %v2278_v27, 1  ;;  %v2300_v29 = vrot.slane %v2278_v27, 2 }
 0x1da   : > { %v1042_v49 = vpop.f32.mrb[116].mxu0  ;;  %v2271_v2 = vld [vmem:[#allocation2 + $0x1b8] sm:$0x3]  ;;  %v2307_v56 = vmax.f32 %v2294_v53, %v2299_v37 }
 0x1db   : > { %1319 = vst.msk [vmem:[#allocation2 + $0x1c8] sm:$0xff] %vm1261_vm5, %v1233_v18  ;;  %v1043_v58 = vadd.f32 %v9886_v50, %v1042_v49  ;;  %v8019_v59 = vpop.f32.mrb[117].mxu0  ;;  %v2288_v60 = vsel %vm1386_vm8, %v2285_v52, %v2287_v47  ;;  %v2279_v61 = vmax.f32 %v2275_v48, %v2271_v2  ;;  %v2301_v5 = vsel %vm1400_vm9, %v2298_v43, %v2300_v29 }
 0x1dc   : > { %v2295_v62 = vmax.f32 %v2277_v31, %v2288_v60 }
 0x1dd   : > { %v1234_v4 = vmax.f32 %v1043_v58, 0.0  ;;  %v2289_v7 = vrot.slane %v2279_v61, 1  ;;  %v2302_v8 = vrot.slane %v2279_v61, 2 }
 0x1de   : > { %v1047_v9 = vpop.f32.mrb[118].mxu0  ;;  %v2308_v11 = vmax.f32 %v2295_v62, %v2301_v5  ;;  %v2391_v28 = vld [vmem:[#allocation2 + $0x1ba] sm:$0xff] }
 0x1df   : > { %1320 = vst.msk [vmem:[#allocation2 + $0x1d0] sm:$0xff] %vm1261_vm5, %v1234_v4  ;;  %v1048_v54 = vadd.f32 %v9886_v50, %v1047_v9  ;;  %v8022_v57 = vpop.f32.mrb[119].mxu0  ;;  %v2290_v14 = vsel %vm1386_vm8, %v2287_v47, %v2289_v7  ;;  %v2303_v21 = vsel %vm1400_vm9, %v2300_v29, %v2302_v8  ;;  %v2399_v52 = vmax.f32 %v9959_v1, %v2391_v28 }
 0x1e0   : > { %v8738_v15 = vpack.c.bf16 %v2308_v11, %v2307_v56  ;;  %v2296_v17 = vmax.f32 %v2278_v27, %v2290_v14 }
 0x1e1   : > { %v1235_v20 = vmax.f32 %v1048_v54, 0.0 }
 0x1e2   : > { %v1052_v22 = vpop.f32.mrb[120].mxu0  ;;  %8739 = vmatprep.subr.bf16.mxu1 %v8738_v15  ;;  %v2309_v0 = vmax.f32 %v2296_v17, %v2303_v21  ;;  %v2392_v31 = vld [vmem:[#allocation2 + $0x1c2] sm:$0xff] }
 0x1e3   : > { %1321 = vst.msk [vmem:[#allocation2 + $0x1d8] sm:$0xff] %vm1261_vm5, %v1235_v20  ;;  %v1053_v23 = vadd.f32 %v9886_v50, %v1052_v22  ;;  %v8025_v44 = vpop.f32.mrb[121].mxu0  ;;  %8741 = vmatpush3.bf16.msra.mxu1 %v8738_v15  ;;  %v2400_v39 = vmax.f32 %v9979_v45, %v2392_v31  ;;  %v2390_v45 = vld [vmem:[#allocation2 + $0x1b8] sm:$0x3] }
 0x1e4   : > { %8165 = vmatprep.subr.mxu1 %v2309_v0 }
 0x1e5   : > { %v1236_v10 = vmax.f32 %v1053_v23, 0.0 }
 0x1e6   : > { %v1057_v24 = vpop.f32.mrb[122].mxu0  ;;  %v2393_v42 = vld [vmem:[#allocation2 + $0x1ca] sm:$0xff]  ;;  %v2394_v18 = vld [vmem:[#allocation2 + $0x1d2] sm:$0x3] }
 0x1e7   : > { %1322 = vst.msk [vmem:[#allocation2 + $0x1e0] sm:$0xff] %vm1261_vm5, %v1236_v10  ;;  %v1058_v25 = vadd.f32 %v9886_v50, %v1057_v24  ;;  %v8028_v19 = vpop.f32.mrb[123].mxu0  ;;  %8166 = vmatpush3.msra.mxu1 %v2309_v0  ;;  %v2401_v1 = vmax.f32 %v10000_v38, %v2393_v42  ;;  %v2402_v2 = vmax.f32 %v2390_v45, %v2394_v18 }
 0x1e8   : > { %8168 = vmatmul.mubr.msk.f32.vlgmr.msra.gmra.mrb[14].mxu1 %vm1414_vm7, %v9691_v16 }
 0x1e9   : > { %v1237_v63 = vmax.f32 %v1058_v25, 0.0  ;;  %8176 = vmatprep.mubr.msk.f32.mxu1 %vm1414_vm7, %v9525_v55 }
 0x1ea   : > { %v1062_v30 = vpop.f32.mrb[124].mxu0  ;;  %v10031_v32 = vld [vmem:[#allocation2 + $0x1d4] sm:$0xff] }
 0x1eb   : > { %1323 = vst.msk [vmem:[#allocation2 + $0x1e8] sm:$0xff] %vm1261_vm5, %v1237_v63  ;;  %v1063_v33 = vadd.f32 %v9886_v50, %v1062_v30  ;;  %v8031_v35 = vpop.f32.mrb[125].mxu0  ;;  %v2403_v40 = vmax.f32 %v2399_v52, %v10031_v32 }
 0x1ed   : > { %v1238_v36 = vmax.f32 %v1063_v33, 0.0  ;;  %v2411_v29 = vrot.slane %v2403_v40, 1  ;;  %v2424_v57 = vrot.slane %v2403_v40, 2 }
 0x1ee   : > { %v1067_v41 = vpop.f32.mrb[126].mxu0  ;;  %v10038_v27 = vld [vmem:[#allocation2 + $0x1dc] sm:$0xff] }
 0x1ef   : > { %1324 = vst.msk [vmem:[#allocation2 + $0x1f0] sm:$0xff] %vm1261_vm5, %v1238_v36  ;;  %v1068_v26 = vadd.f32 %v9886_v50, %v1067_v41  ;;  %v8034_v43 = vpop.f32.mrb[127].mxu0  ;;  %v2404_v46 = vmax.f32 %v2400_v39, %v10038_v27 }
 0x1f1   : > { %v1239_v47 = vmax.f32 %v1068_v26, 0.0  ;;  %v2412_v48 = vrot.slane %v2404_v46, 1  ;;  %v2425_v4 = vrot.slane %v2404_v46, 2 }
 0x1f2   : > { %v1072_v49 = vpop.f32.mrb[128].mxu0  ;;  %v10044_v53 = vld [vmem:[#allocation2 + $0x1e4] sm:$0xff]  ;;  %v2398_v34 = vld [vmem:[#allocation2 + $0x1ec] sm:$0x3] }
 0x1f3   : > { %1325 = vst.msk [vmem:[#allocation2 + $0x1f8] sm:$0xff] %vm1261_vm5, %v1239_v47  ;;  %v1073_v58 = vadd.f32 %v9886_v50, %v1072_v49  ;;  %v8037_v59 = vpop.f32.mrb[129].mxu0  ;;  %v2405_v60 = vmax.f32 %v2401_v1, %v10044_v53  ;;  %v2413_v61 = vsel %vm1386_vm8, %v2411_v29, %v2412_v48  ;;  %v2406_v62 = vmax.f32 %v2402_v2, %v2398_v34 }
 0x1f4   : > { %v2421_v8 = vmax.f32 %v2403_v40, %v2413_v61  ;;  %v2426_v20 = vsel %vm1400_vm9, %v2424_v57, %v2425_v4 }
 0x1f5   : > { %v1240_v37 = vmax.f32 %v1073_v58, 0.0  ;;  %v2414_v38 = vrot.slane %v2405_v60, 1  ;;  %v2427_v5 = vrot.slane %v2405_v60, 2  ;;  %v2416_v9 = vrot.slane %v2406_v62, 1 }
 0x1f6   : > { %v1077_v7 = vpop.f32.mrb[130].mxu0  ;;  %v2429_v22 = vrot.slane %v2406_v62, 2  ;;  %v2434_v23 = vmax.f32 %v2421_v8, %v2426_v20  ;;  %v2518_v52 = vld [vmem:[#allocation2 + $0x1ee] sm:$0xff] }
 0x1f7   : > { %1326 = vst.msk [vmem:[#allocation2 + $0x200] sm:$0xff] %vm1261_vm5, %v1240_v37  ;;  %v1078_v56 = vadd.f32 %v9886_v50, %v1077_v7  ;;  %v8040_v11 = vpop.f32.mrb[131].mxu0  ;;  %v2415_v54 = vsel %vm1386_vm8, %v2412_v48, %v2414_v38  ;;  %v2417_v15 = vsel %vm1386_vm8, %v2414_v38, %v2416_v9  ;;  %v2428_v21 = vsel %vm1400_vm9, %v2425_v4, %v2427_v5  ;;  %v3976_v8 = vld [vmem:[%s12235_s3 + $0xa8] sm:$0xff] }
 0x1f8   : > { %v2422_v14 = vmax.f32 %v2404_v46, %v2415_v54  ;;  %v2423_v10 = vmax.f32 %v2405_v60, %v2417_v15  ;;  %v2430_v63 = vsel %vm1400_vm9, %v2427_v5, %v2429_v22  ;;  %v2526_v43 = vmax.f32 %v10031_v32, %v2518_v52 }
 0x1f9   : > { %v1241_v17 = vmax.f32 %v1078_v56, 0.0  ;;  %v2517_v56 = vld [vmem:[#allocation2 + $0x1ec] sm:$0x3] }
 0x1fa   : > { %v1082_v0 = vpop.f32.mrb[132].mxu0  ;;  %v2435_v44 = vmax.f32 %v2422_v14, %v2428_v21  ;;  %v2436_v31 = vmax.f32 %v2423_v10, %v2430_v63  ;;  %v2519_v40 = vld [vmem:[#allocation2 + $0x1f6] sm:$0xff] }
 0x1fb   : > { %1327 = vst.msk [vmem:[#allocation2 + $0x208] sm:$0xff] %vm1261_vm5, %v1241_v17  ;;  %v1083_v24 = vadd.f32 %v9886_v50, %v1082_v0  ;;  %v8043_v25 = vpop.f32.mrb[133].mxu0  ;;  %v2527_v18 = vmax.f32 %v10038_v27, %v2519_v40 }
 0x1fc   : > { %v8742_v19 = vpack.c.bf16 %v2435_v44, %v2434_v23  ;;  %v3978_v25 = vld [vmem:[%s12235_s3 + $0xb8] sm:$0xff] }
 0x1fd   : > { %v1242_v28 = vmax.f32 %v1083_v24, 0.0  ;;  %v3977_v24 = vld [vmem:[%s12235_s3 + $0xb0] sm:$0xff] }
 0x1fe   : > { %v1087_v30 = vpop.f32.mrb[134].mxu0  ;;  %8743 = vmatprep.subr.bf16.mxu1 %v8742_v19  ;;  %v2520_v29 = vld [vmem:[#allocation2 + $0x1fe] sm:$0xff]  ;;  %v2521_v37 = vld [vmem:[#allocation2 + $0x206] sm:$0x3]  ;;  %v8792_v40 = vpack.c.bf16 %v3978_v25, %v3977_v24 }
 0x1ff   : > { %1328 = vst.msk [vmem:[#allocation2 + $0x210] sm:$0xff] %vm1261_vm5, %v1242_v28  ;;  %v1088_v33 = vadd.f32 %v9886_v50, %v1087_v30  ;;  %v8046_v35 = vpop.f32.mrb[135].mxu0  ;;  %8745 = vmatpush3.bf16.msra.mxu1 %v8742_v19  ;;  %v2528_v58 = vmax.f32 %v10044_v53, %v2520_v29  ;;  %v3975_v53 = vld [vmem:[%s12235_s3 + $0xa0] sm:$0xff]  ;;  %v2529_v14 = vmax.f32 %v2517_v56, %v2521_v37 }
 0x200   : > { %8174 = vmatprep.subr.mxu1 %v2436_v31  ;;  %v8789_v22 = vpack.c.bf16 %v3976_v8, %v3975_v53 }
 0x201   : > { %v1243_v36 = vmax.f32 %v1088_v33, 0.0 }
 0x202   : > { %v1092_v39 = vpop.f32.mrb[136].mxu0  ;;  %v10061_v41 = vld [vmem:[#allocation2 + $0x208] sm:$0xff] }
 0x203   : > { %1329 = vst.msk [vmem:[#allocation2 + $0x218] sm:$0xff] %vm1261_vm5, %v1243_v36  ;;  %v1093_v42 = vadd.f32 %v9886_v50, %v1092_v39  ;;  %v8049_v26 = vpop.f32.mrb[137].mxu0  ;;  %8175 = vmatpush3.msra.mxu1 %v2436_v31  ;;  %v2530_v47 = vmax.f32 %v2526_v43, %v10061_v41 }
 0x204   : > { %8177 = vmatmul.mubr.msk.f32.vlgmr.msra.gmra.mrb[16].mxu1 %vm1414_vm7, %v9691_v16 }
 0x205   : > { %v1244_v46 = vmax.f32 %v1093_v42, 0.0  ;;  %8185 = vmatprep.mubr.msk.f32.mxu1 %vm1414_vm7, %v9525_v55  ;;  %v2538_v59 = vrot.slane %v2530_v47, 1  ;;  %v2551_v20 = vrot.slane %v2530_v47, 2 }
 0x206   : > { %v1097_v1 = vpop.f32.mrb[138].mxu0  ;;  %v10072_v48 = vld [vmem:[#allocation2 + $0x210] sm:$0xff] }
 0x207   : > { %1330 = vst.msk [vmem:[#allocation2 + $0x220] sm:$0xff] %vm1261_vm5, %v1244_v46  ;;  %v1098_v32 = vadd.f32 %v9886_v50, %v1097_v1  ;;  %v8052_v45 = vpop.f32.mrb[139].mxu0  ;;  %v2531_v49 = vmax.f32 %v2527_v18, %v10072_v48  ;;  %v8106_v34 = vpop.f32.mrb[0].mxu1 }
 0x208   : > { %1497 = vst.msk [vmem:[#allocation3 + $0x8] sm:$0xf] %vm1346_vm11, %v8106_v34  ;;  %v1487_v27 = vpop.f32.mrb[1].mxu1 }
 0x209   : > { %v1245_v2 = vmax.f32 %v1098_v32, 0.0  ;;  %v2539_v60 = vrot.slane %v2531_v49, 1  ;;  %1496 = vst.msk [vmem:[#allocation3] sm:$0xff] %vm1261_vm5, %v1487_v27  ;;  %v2552_v9 = vrot.slane %v2531_v49, 2 }
 0x20a   : > { %v1102_v61 = vpop.f32.mrb[140].mxu0  ;;  %v10080_v62 = vld [vmem:[#allocation2 + $0x218] sm:$0xff] }
 0x20b   : > { %1331 = vst.msk [vmem:[#allocation2 + $0x228] sm:$0xff] %vm1261_vm5, %v1245_v2  ;;  %v1103_v38 = vadd.f32 %v9886_v50, %v1102_v61  ;;  %v8055_v4 = vpop.f32.mrb[141].mxu0  ;;  %v2532_v5 = vmax.f32 %v2528_v58, %v10080_v62  ;;  %v2540_v7 = vsel %vm1386_vm8, %v2538_v59, %v2539_v60  ;;  %v2553_v28 = vsel %vm1400_vm9, %v2551_v20, %v2552_v9 }
 0x20c   : > { %v2548_v17 = vmax.f32 %v2530_v47, %v2540_v7 }
 0x20d   : > { %v1246_v11 = vmax.f32 %v1103_v38, 0.0  ;;  %v2541_v54 = vrot.slane %v2532_v5, 1  ;;  %v2554_v57 = vrot.slane %v2532_v5, 2 }
 0x20e   : > { %v1107_v15 = vpop.f32.mrb[142].mxu0  ;;  %v2525_v21 = vld [vmem:[#allocation2 + $0x220] sm:$0x3]  ;;  %v2561_v36 = vmax.f32 %v2548_v17, %v2553_v28 }
 0x20f   : > { %1332 = vst.msk [vmem:[#allocation2 + $0x230] sm:$0xff] %vm1261_vm5, %v1246_v11  ;;  %v1108_v0 = vadd.f32 %v9886_v50, %v1107_v15  ;;  %v8058_v23 = vpop.f32.mrb[143].mxu0  ;;  %v2542_v44 = vsel %vm1386_vm8, %v2539_v60, %v2541_v54  ;;  %v2533_v10 = vmax.f32 %v2529_v14, %v2525_v21  ;;  %v2555_v31 = vsel %vm1400_vm9, %v2552_v9, %v2554_v57 }
 0x210   : > { %v2549_v19 = vmax.f32 %v2531_v49, %v2542_v44  ;;  %v2914_v63 = vld [vmem:[#allocation3 + $0x1] sm:$0xff]  ;;  %v2644_v23 = vld [vmem:[#allocation2 + $0x220] sm:$0x3] }
 0x211   : > { %v1247_v30 = vmax.f32 %v1108_v0, 0.0  ;;  %v2543_v33 = vrot.slane %v2533_v10, 1  ;;  %v2556_v35 = vrot.slane %v2533_v10, 2  ;;  %8215 = vmatmul.mubr.msk.f32.vlgmr.msra.gmra.mrb[170].mxu0 %vm1261_vm5, %v2914_v63 }
 0x212   : > { %v1112_v52 = vpop.f32.mrb[144].mxu0  ;;  %v2562_v39 = vmax.f32 %v2549_v19, %v2555_v31  ;;  %8217 = vmatprep.mubr.msk.f32.mxu0 %vm9220_vm1, %v9221_v6  ;;  %8790 = vmatpush3.bf16.msra.mxu0 %v8789_v22  ;;  %v2645_v59 = vld [vmem:[#allocation2 + $0x222] sm:$0xff] }
 0x213   : > { %1333 = vst.msk [vmem:[#allocation2 + $0x238] sm:$0xff] %vm1261_vm5, %v1247_v30  ;;  %v1113_v42 = vadd.f32 %v9886_v50, %v1112_v52  ;;  %v8061_v26 = vpop.f32.mrb[145].mxu0  ;;  %v2544_v43 = vsel %vm1386_vm8, %v2541_v54, %v2543_v33  ;;  %8791 = vmatprep.subr.bf16.mxu0 %v12242_v3  ;;  %v2557_v1 = vsel %vm1400_vm9, %v2554_v57, %v2556_v35 }
 0x214   : > { %v8746_v46 = vpack.c.bf16 %v2562_v39, %v2561_v36  ;;  %v2550_v18 = vmax.f32 %v2532_v5, %v2544_v43  ;;  %v2653_v7 = vmax.f32 %v10061_v41, %v2645_v59 }
 0x215   : > { %v1248_v47 = vmax.f32 %v1113_v42, 0.0 }
 0x216   : > { %v1117_v29 = vpop.f32.mrb[146].mxu0  ;;  %8747 = vmatprep.subr.bf16.mxu1 %v8746_v46  ;;  %v2563_v32 = vmax.f32 %v2550_v18, %v2557_v1  ;;  %8793 = vmatpush3.bf16.msra.mxu0 %v8792_v40  ;;  %v2646_v37 = vld [vmem:[#allocation2 + $0x22a] sm:$0xff] }
 0x217   : > { %1334 = vst.msk [vmem:[#allocation2 + $0x240] sm:$0xff] %vm1261_vm5, %v1248_v47  ;;  %v1118_v45 = vadd.f32 %v9886_v50, %v1117_v29  ;;  %v8064_v49 = vpop.f32.mrb[147].mxu0  ;;  %8749 = vmatpush3.bf16.msra.mxu1 %v8746_v46  ;;  %8800 = vmatprep.subr.bf16.mxu0 %v12242_v3  ;;  %v2654_v56 = vmax.f32 %v10072_v48, %v2646_v37 }
 0x218   : > { %8183 = vmatprep.subr.mxu1 %v2563_v32 }
 0x219   : > { %v1249_v34 = vmax.f32 %v1118_v45, 0.0 }
 0x21a   : > { %v1122_v27 = vpop.f32.mrb[148].mxu0  ;;  %v2647_v57 = vld [vmem:[#allocation2 + $0x232] sm:$0xff]  ;;  %v2648_v20 = vld [vmem:[#allocation2 + $0x23a] sm:$0x3] }
 0x21b   : > { %1335 = vst.msk [vmem:[#allocation2 + $0x248] sm:$0xff] %vm1261_vm5, %v1249_v34  ;;  %v1123_v2 = vadd.f32 %v9886_v50, %v1122_v27  ;;  %v8067_v58 = vpop.f32.mrb[149].mxu0  ;;  %8184 = vmatpush3.msra.mxu1 %v2563_v32  ;;  %v2655_v22 = vmax.f32 %v10080_v62, %v2647_v57  ;;  %v2656_v25 = vmax.f32 %v2644_v23, %v2648_v20 }
 0x21c   : > { %8186 = vmatmul.mubr.msk.f32.vlgmr.msra.gmra.mrb[18].mxu1 %vm1414_vm7, %v9691_v16 }
 0x21d   : > { %v1250_v60 = vmax.f32 %v1123_v2, 0.0  ;;  %8194 = vmatprep.mubr.msk.f32.mxu1 %vm1414_vm7, %v9525_v55 }
 0x21e   : > { %v1127_v61 = vpop.f32.mrb[150].mxu0  ;;  %v10120_v38 = vld [vmem:[#allocation2 + $0x23c] sm:$0xff] }
 0x21f   : > { %1336 = vst.msk [vmem:[#allocation2 + $0x250] sm:$0xff] %vm1261_vm5, %v1250_v60  ;;  %v1128_v4 = vadd.f32 %v9886_v50, %v1127_v61  ;;  %v8070_v5 = vpop.f32.mrb[151].mxu0  ;;  %v8115_v53 = vpop.f32.mrb[2].mxu1  ;;  %v2657_v11 = vmax.f32 %v2653_v7, %v10120_v38 }
 0x220   : > { %1624 = vst.msk [vmem:[#allocation3 + $0x14] sm:$0xf] %vm1346_vm11, %v8115_v53  ;;  %v1614_v8 = vpop.f32.mrb[3].mxu1 }
 0x221   : > { %v1251_v9 = vmax.f32 %v1128_v4, 0.0  ;;  %1623 = vst.msk [vmem:[#allocation3 + $0xc] sm:$0xff] %vm1261_vm5, %v1614_v8  ;;  %v2665_v48 = vrot.slane %v2657_v11, 1  ;;  %v2678_v18 = vrot.slane %v2657_v11, 2 }
 0x222   : > { %v1132_v54 = vpop.f32.mrb[152].mxu0  ;;  %v10129_v14 = vld [vmem:[#allocation2 + $0x244] sm:$0xff] }
 0x223   : > { %1337 = vst.msk [vmem:[#allocation2 + $0x258] sm:$0xff] %vm1261_vm5, %v1251_v9  ;;  %v1133_v15 = vadd.f32 %v9886_v50, %v1132_v54  ;;  %v8073_v41 = vpop.f32.mrb[153].mxu0  ;;  %v2658_v17 = vmax.f32 %v2654_v56, %v10129_v14 }
 0x225   : > { %v1252_v21 = vmax.f32 %v1133_v15, 0.0  ;;  %v2666_v0 = vrot.slane %v2658_v17, 1  ;;  %v2679_v52 = vrot.slane %v2658_v17, 2  ;;  %v9154_v15 = vld [vmem:[%s12234_s2] ss:$0 sm:$0xff] }
 0x226   : > { %v1137_v44 = vpop.f32.mrb[154].mxu0  ;;  %v10135_v10 = vld [vmem:[#allocation2 + $0x24c] sm:$0xff]  ;;  %v2652_v24 = vld [vmem:[#allocation2 + $0x254] sm:$0x3] }
 0x227   : > { %1338 = vst.msk [vmem:[#allocation2 + $0x260] sm:$0xff] %vm1261_vm5, %v1252_v21  ;;  %v1138_v19 = vadd.f32 %v9886_v50, %v1137_v44  ;;  %v8076_v28 = vpop.f32.mrb[155].mxu0  ;;  %v2659_v63 = vmax.f32 %v2655_v22, %v10135_v10  ;;  %v2667_v30 = vsel %vm1386_vm8, %v2665_v48, %v2666_v0  ;;  %v2660_v31 = vmax.f32 %v2656_v25, %v2652_v24 }
 0x228   : > { %v2915_v33 = vld [vmem:[#allocation3 + $0x9] sm:$0xff]  ;;  %v2675_v40 = vmax.f32 %v2657_v11, %v2667_v30  ;;  %v2680_v32 = vsel %vm1400_vm9, %v2678_v18, %v2679_v52 }
 0x229   : > { %v1253_v62 = vmax.f32 %v1138_v19, 0.0  ;;  %v2668_v35 = vrot.slane %v2659_v63, 1  ;;  %v2681_v36 = vrot.slane %v2659_v63, 2  ;;  %8218 = vmatmul.mubr.msk.f32.gmra.mrb[172].mxu0 %vm1261_vm5, %v2915_v33  ;;  %v2670_v42 = vrot.slane %v2660_v31, 1 }
 0x22a   : > { %v1142_v39 = vpop.f32.mrb[156].mxu0  ;;  %8220 = vmatprep.mubr.msk.f32.mxu0 %vm9220_vm1, %v9221_v6  ;;  %v2683_v49 = vrot.slane %v2660_v31, 2  ;;  %v2688_v27 = vmax.f32 %v2675_v40, %v2680_v32  ;;  %v2772_v9 = vld [vmem:[#allocation2 + $0x256] sm:$0xff]  ;;  %v2771_v31 = vld [vmem:[#allocation2 + $0x254] sm:$0x3] }
 0x22b   : > { %1339 = vst.msk [vmem:[#allocation2 + $0x268] sm:$0xff] %vm1261_vm5, %v1253_v62  ;;  %v1143_v26 = vadd.f32 %v9886_v50, %v1142_v39  ;;  %v8079_v43 = vpop.f32.mrb[157].mxu0  ;;  %v2669_v46 = vsel %vm1386_vm8, %v2666_v0, %v2668_v35  ;;  %v2671_v1 = vsel %vm1386_vm8, %v2668_v35, %v2670_v42  ;;  %v2682_v45 = vsel %vm1400_vm9, %v2679_v52, %v2681_v36 }
 0x22c   : > { %v2676_v47 = vmax.f32 %v2658_v17, %v2669_v46  ;;  %v2677_v58 = vmax.f32 %v2659_v63, %v2671_v1  ;;  %v2684_v4 = vsel %vm1400_vm9, %v2681_v36, %v2683_v49  ;;  %v2780_v17 = vmax.f32 %v10120_v38, %v2772_v9 }
 0x22d   : > { %v1254_v29 = vmax.f32 %v1143_v26, 0.0 }
 0x22e   : > { %v1147_v34 = vpop.f32.mrb[158].mxu0  ;;  %v2689_v2 = vmax.f32 %v2676_v47, %v2682_v45  ;;  %v2690_v7 = vmax.f32 %v2677_v58, %v2684_v4  ;;  %v2773_v54 = vld [vmem:[#allocation2 + $0x25e] sm:$0xff]  ;;  %v3960_v45 = vld [vmem:[#allocation3 + $0xe] sm:$0xff] }
 0x22f   : > { %1340 = vst.msk [vmem:[#allocation2 + $0x270] sm:$0xff] %vm1261_vm5, %v1254_v29  ;;  %v1148_v59 = vadd.f32 %v9886_v50, %v1147_v34  ;;  %v8082_v60 = vpop.f32.mrb[159].mxu0  ;;  %v2781_v21 = vmax.f32 %v10129_v14, %v2773_v54  ;;  %v2911_v54 = vld [vmem:[%s12235_s3 + $0x8] sm:$0xff] }
 0x230   : > { %v8750_v61 = vpack.c.bf16 %v2689_v2, %v2688_v27 }
 0x231   : > { %v1255_v37 = vmax.f32 %v1148_v59, 0.0 }
 0x232   : > { %v1152_v5 = vpop.f32.mrb[160].mxu0  ;;  %8751 = vmatprep.subr.bf16.mxu1 %v8750_v61  ;;  %v2774_v48 = vld [vmem:[#allocation2 + $0x266] sm:$0xff]  ;;  %v2775_v28 = vld [vmem:[#allocation2 + $0x26e] sm:$0x3] }
 0x233   : > { %1341 = vst.msk [vmem:[#allocation2 + $0x278] sm:$0xff] %vm1261_vm5, %v1255_v37  ;;  %v1153_v53 = vadd.f32 %v9886_v50, %v1152_v5  ;;  %8753 = vmatpush3.bf16.msra.mxu1 %v8750_v61  ;;  %v8085_v8 = vpop.f32.mrb[161].mxu0  ;;  %v2782_v24 = vmax.f32 %v10135_v10, %v2774_v48  ;;  %v2783_v52 = vmax.f32 %v2771_v31, %v2775_v28 }
 0x234   : > { %8192 = vmatprep.subr.mxu1 %v2690_v7 }
 0x235   : > { %v1256_v56 = vmax.f32 %v1153_v53, 0.0 }
 0x236   : > { %v1157_v11 = vpop.f32.mrb[162].mxu0  ;;  %v2776_v57 = vld [vmem:[#allocation2 + $0x270] sm:$0xff] }
 0x237   : > { %1342 = vst.msk [vmem:[#allocation2 + $0x280] sm:$0xff] %vm1261_vm5, %v1256_v56  ;;  %v1158_v41 = vadd.f32 %v9154_v15, %v1157_v11  ;;  %8193 = vmatpush3.msra.mxu1 %v2690_v7  ;;  %v8088_v20 = vpop.f32.mrb[163].mxu0  ;;  %v2784_v22 = vmax.f32 %v2780_v17, %v2776_v57  ;;  %v2910_v11 = vld [vmem:[%s12235_s3] sm:$0xff] }
 0x238   : > { %8195 = vmatmul.mubr.msk.f32.vlgmr.msra.gmra.mrb[20].mxu1 %vm1414_vm7, %v9691_v16  ;;  %v8765_v57 = vpack.c.bf16 %v2911_v54, %v2910_v11  ;;  %v2912_v20 = vld [vmem:[%s12235_s3 + $0x10] sm:$0xff] }
 0x239   : > { %v1257_v50 = vmax.f32 %v1158_v41, 0.0  ;;  %8203 = vmatprep.mubr.msk.f32.mxu1 %vm1414_vm7, %v9525_v55  ;;  %v2792_v25 = vrot.slane %v2784_v22, 1  ;;  %v2805_v42 = vrot.slane %v2784_v22, 2  ;;  %v4635_v55 = vld [vmem:[%s12235_s3 + $0x118] sm:$0xff] }
 0x23a   : > { %v2777_v0 = vld [vmem:[#allocation2 + $0x278] sm:$0xff] }
 0x23b   : > { %1343 = vst.msk [vmem:[#allocation2 + $0x288] sm:$0xff] %vm1261_vm5, %v1257_v50  ;;  %v2785_v23 = vmax.f32 %v2781_v21, %v2777_v0  ;;  %v8124_v44 = vpop.f32.mrb[4].mxu1  ;;  %v2913_v50 = vld [vmem:[%s12235_s3 + $0x18] sm:$0xff]  ;;  %v4413_v0 = vld [vmem:[%s12235_s3 + $0xe0] sm:$0xff] }
 0x23c   : > { %1751 = vst.msk [vmem:[#allocation3 + $0x20] sm:$0xf] %vm1346_vm11, %v8124_v44  ;;  %v1741_v38 = vpop.f32.mrb[5].mxu1  ;;  %v8768_v21 = vpack.c.bf16 %v2913_v50, %v2912_v20 }
 0x23d   : > { %v2793_v19 = vrot.slane %v2785_v23, 1  ;;  %1750 = vst.msk [vmem:[#allocation3 + $0x18] sm:$0xff] %vm1261_vm5, %v1741_v38  ;;  %v2806_v62 = vrot.slane %v2785_v23, 2 }
 0x23e   : > { %v2778_v14 = vld [vmem:[#allocation2 + $0x280] sm:$0xff] }
 0x23f   : > { %v2786_v63 = vmax.f32 %v2782_v24, %v2778_v14  ;;  %v2794_v30 = vsel %vm1386_vm8, %v2792_v25, %v2793_v19  ;;  %v2807_v46 = vsel %vm1400_vm9, %v2805_v42, %v2806_v62  ;;  %v4415_v25 = vld [vmem:[%s12235_s3 + $0xf0] sm:$0xff] }
 0x240   : > { %v2802_v36 = vmax.f32 %v2784_v22, %v2794_v30 }
 0x241   : > { %v2795_v33 = vrot.slane %v2786_v63, 1  ;;  %v2808_v35 = vrot.slane %v2786_v63, 2 }
 0x242   : > { %v2779_v39 = vld [vmem:[#allocation2 + $0x288] sm:$0x3]  ;;  %v2815_v29 = vmax.f32 %v2802_v36, %v2807_v46 }
 0x243   : > { %v2796_v40 = vsel %vm1386_vm8, %v2793_v19, %v2795_v33  ;;  %v2787_v10 = vmax.f32 %v2783_v52, %v2779_v39  ;;  %v2809_v18 = vsel %vm1400_vm9, %v2806_v62, %v2808_v35  ;;  %v4416_v19 = vld [vmem:[%s12235_s3 + $0xf8] sm:$0xff] }
 0x244   : > { %v2803_v26 = vmax.f32 %v2785_v23, %v2796_v40  ;;  %v2916_v43 = vld [vmem:[#allocation3 + $0x11] sm:$0xff]  ;;  %v10194_v37 = vld [vmem:[#allocation3 + $0x19] sm:$0xff]  ;;  %v8804_v28 = vpack.c.bf16 %v4416_v19, %v4415_v25 }
 0x245   : > { %v2797_v47 = vrot.slane %v2787_v10, 1  ;;  %v2810_v1 = vrot.slane %v2787_v10, 2  ;;  %8221 = vmatmul.mubr.msk.f32.gmra.mrb[174].mxu0 %vm1261_vm5, %v2916_v43  ;;  %v3961_v59 = vld [vmem:[#allocation3 + $0x16] sm:$0xff]  ;;  %v4414_v23 = vld [vmem:[%s12235_s3 + $0xe8] sm:$0xff] }
 0x246   : > { %v2816_v32 = vmax.f32 %v2803_v26, %v2809_v18  ;;  %8479 = vmatprep.mubr.msk.f32.mxu0 %vm9220_vm1, %v9221_v6  ;;  %v8801_v44 = vpack.c.bf16 %v4414_v23, %v4413_v0 }
 0x247   : > { %v2798_v49 = vsel %vm1386_vm8, %v2795_v33, %v2797_v47  ;;  %v2811_v2 = vsel %vm1400_vm9, %v2808_v35, %v2810_v1  ;;  %v3318_v1 = vld [vmem:[%s12235_s3 + $0x40] sm:$0xff] }
 0x248   : > { %v8754_v34 = vpack.c.bf16 %v2816_v32, %v2815_v29  ;;  %v2804_v27 = vmax.f32 %v2786_v63, %v2798_v49  ;;  %v3319_v29 = vld [vmem:[%s12235_s3 + $0x48] sm:$0xff] }
 0x249   : > { %8480 = vmatmul.mubr.msk.f32.vlgmr.msra.gmra.mrb[176].mxu0 %vm1261_vm5, %v3960_v45  ;;  %v8771_v49 = vpack.c.bf16 %v3319_v29, %v3318_v1 }
 0x24a   : > { %8755 = vmatprep.subr.bf16.mxu1 %v8754_v34  ;;  %v2817_v58 = vmax.f32 %v2804_v27, %v2811_v2  ;;  %8482 = vmatprep.mubr.msk.f32.mxu0 %vm9220_vm1, %v9221_v6  ;;  %v3321_v27 = vld [vmem:[%s12235_s3 + $0x58] sm:$0xff]  ;;  %v2895_v2 = vld [vmem:[#allocation3] sm:$0xff] }
 0x24b   : > { %8757 = vmatpush3.bf16.msra.mxu1 %v8754_v34  ;;  %8802 = vmatpush3.bf16.msra.mxu0 %v8801_v44  ;;  %v3320_v34 = vld [vmem:[%s12235_s3 + $0x50] sm:$0xff] }
 0x24c   : > { %8201 = vmatprep.subr.mxu1 %v2817_v58  ;;  %8803 = vmatprep.subr.bf16.mxu0 %v12242_v3 }
 0x24d   : > { %8483 = vmatmul.mubr.msk.f32.gmra.mrb[178].mxu0 %vm1261_vm5, %v3961_v59  ;;  %v2896_v59 = vld [vmem:[#allocation3 + $0x8] sm:$0xff] }
 0x24e   : > { %8485 = vmatprep.mubr.msk.f32.mxu0 %vm9220_vm1, %v9221_v6 }
 0x24f   : > { %8202 = vmatpush3.msra.mxu1 %v2817_v58  ;;  %8805 = vmatpush3.bf16.msra.mxu0 %v8804_v28  ;;  %v8774_v58 = vpack.c.bf16 %v3321_v27, %v3320_v34  ;;  %v3540_v34 = vld [vmem:[%s12235_s3 + $0x78] sm:$0xff] }
 0x250   : > { %8204 = vmatmul.mubr.msk.f32.vlgmr.msra.gmra.mrb[22].mxu1 %vm1414_vm7, %v9691_v16  ;;  %9100 = vmatprep.subr.bf16.mxu1 %v12242_v3  ;;  %v3304_v27 = vld [vmem:[#allocation3 + $0xa] sm:$0xff] }
 0x251   : > { %9102 = vmatpush3.bf16.msra.mxu1 %v9983_v12  ;;  %8223 = vmatprep.mubr.msk.f32.mxu1 %vm9220_vm1, %v9221_v6 }
 0x252   : > { %9101 = vmatprep.subr.bf16.mxu1 %v12242_v3  ;;  %8683 = vmatprep.subr.mxu0 %v9221_v6 }
 0x253   : > { %v8133_v60 = vpop.f32.mrb[6].mxu1 }
 0x254   : > { %1878 = vst.msk [vmem:[#allocation3 + $0x2c] sm:$0xf] %vm1346_vm11, %v8133_v60  ;;  %v1868_v61 = vpop.f32.mrb[7].mxu1  ;;  %v2897_v60 = vld [vmem:[#allocation3 + $0x10] sm:$0xff] }
 0x255   : > { %1877 = vst.msk [vmem:[#allocation3 + $0x24] sm:$0xff] %vm1261_vm5, %v1868_v61  ;;  %9103 = vmatpush3.bf16.msra.mxu1 %v9995_v13 }
 0x256   : > { %8764 = vmatprep.subr.bf16.mxu1 %v12242_v3 }
 0x258   : > { %8224 = vmatmul.mubr.msk.f32.vlgmr.msra.gmra.mrb[24].mxu1 %vm1261_vm5, %v10194_v37 }
 0x259   : > { %8226 = vmatprep.mubr.msk.f32.mxu1 %vm9220_vm1, %v9221_v6  ;;  %8766 = vmatpush3.bf16.msra.mxu1 %v8765_v57 }
 0x25a   : > { %8767 = vmatprep.subr.bf16.mxu1 %v12242_v3 }
 0x25c   : > { %v3962_v16 = vld [vmem:[#allocation3 + $0x1e] sm:$0xff]  ;;  %v3963_v13 = vld [vmem:[#allocation3 + $0x26] sm:$0xff] }
 0x25d   : > { %v10201_v12 = vld [vmem:[#allocation3 + $0x21] sm:$0xff]  ;;  %8486 = vmatmul.mubr.msk.f32.gmra.mrb[180].mxu0 %vm1261_vm5, %v3962_v16  ;;  %8769 = vmatpush3.bf16.msra.mxu1 %v8768_v21 }
 0x25e   : > { %8227 = vmatmul.mubr.msk.f32.gmra.mrb[26].mxu1 %vm1261_vm5, %v10201_v12  ;;  %8488 = vmatprep.mubr.msk.f32.mxu0 %vm9220_vm1, %v9221_v6  ;;  %v10378_v57 = vld [vmem:[#allocation3 + $0x20] sm:$0xff]  ;;  %v10388_v21 = vld [vmem:[#allocation3 + $0x28] sm:$0xff] }
 0x25f   : > { %8229 = vmatprep.mubr.msk.f32.mxu1 %vm9220_vm1, %v9221_v6  ;;  %8770 = vmatprep.subr.bf16.mxu1 %v12242_v3 }
 0x261   : > { %8489 = vmatmul.mubr.msk.f32.gmra.mrb[182].mxu0 %vm1261_vm5, %v3963_v13 }
 0x262   : > { %8491 = vmatprep.mubr.msk.f32.mxu0 %vm9220_vm1, %v9221_v6 }
 0x26f   : > { %v8142_v4 = vpop.f32.mrb[8].mxu1 }
 0x270   : > { %2005 = vst.msk [vmem:[#allocation3 + $0x38] sm:$0xf] %vm1346_vm11, %v8142_v4  ;;  %v1995_v5 = vpop.f32.mrb[9].mxu1 }
 0x271   : > { %2004 = vst.msk [vmem:[#allocation3 + $0x30] sm:$0xff] %vm1261_vm5, %v1995_v5 }
 0x278   : > { %v10215_v7 = vld [vmem:[#allocation3 + $0x29] sm:$0xff]  ;;  %v10222_v8 = vld [vmem:[#allocation3 + $0x31] sm:$0xff] }
 0x279   : > { %v3964_v53 = vld [vmem:[#allocation3 + $0x2e] sm:$0xff]  ;;  %8230 = vmatmul.mubr.msk.f32.gmra.mrb[28].mxu1 %vm1261_vm5, %v10215_v7 }
 0x27a   : > { %8492 = vmatmul.mubr.msk.f32.gmra.mrb[184].mxu0 %vm1261_vm5, %v3964_v53  ;;  %8232 = vmatprep.mubr.msk.f32.mxu1 %vm9220_vm1, %v9221_v6  ;;  %v10369_v53 = vld [vmem:[#allocation3 + $0x18] sm:$0xff]  ;;  %v10399_v44 = vld [vmem:[#allocation3 + $0x30] sm:$0xff] }
 0x27b   : > { %8494 = vmatprep.mubr.msk.f32.mxu0 %vm9220_vm1, %v9221_v6 }
 0x27d   : > { %8233 = vmatmul.mubr.msk.f32.gmra.mrb[30].mxu1 %vm1261_vm5, %v10222_v8 }
 0x27e   : > { %8235 = vmatprep.mubr.msk.f32.mxu1 %vm9220_vm1, %v9221_v6 }
 0x287   : > { %v8151_v9 = vpop.f32.mrb[10].mxu1 }
 0x288   : > { %2132 = vst.msk [vmem:[#allocation3 + $0x44] sm:$0xf] %vm1346_vm11, %v8151_v9  ;;  %v2122_v56 = vpop.f32.mrb[11].mxu1 }
 0x289   : > { %2131 = vst.msk [vmem:[#allocation3 + $0x3c] sm:$0xff] %vm1261_vm5, %v2122_v56 }
 0x290   : > { %v3965_v15 = vld [vmem:[#allocation3 + $0x36] sm:$0xff]  ;;  %v3966_v17 = vld [vmem:[#allocation3 + $0x3e] sm:$0xff] }
 0x291   : > { %v10238_v41 = vld [vmem:[#allocation3 + $0x39] sm:$0xff]  ;;  %8495 = vmatmul.mubr.msk.f32.gmra.mrb[186].mxu0 %vm1261_vm5, %v3965_v15  ;;  %v1162_v61 = vpop.f32.mrb[164].mxu0 }
 0x292   : > { %8236 = vmatmul.mubr.msk.f32.gmra.mrb[32].mxu1 %vm1261_vm5, %v10238_v41  ;;  %8497 = vmatprep.mubr.msk.f32.mxu0 %vm9220_vm1, %v9221_v6  ;;  %v8091_v16 = vpop.f32.mrb[165].mxu0 }
 0x293   : > { %8238 = vmatprep.mubr.msk.f32.mxu1 %vm9220_vm1, %v9221_v6 }
 0x295   : > { %8498 = vmatmul.mubr.msk.f32.gmra.mrb[188].mxu0 %vm1261_vm5, %v3966_v17 }
 0x296   : > { %8500 = vmatprep.mubr.msk.f32.mxu0 %vm9220_vm1, %v9221_v6 }
 0x298   : > { %v1167_v4 = vpop.f32.mrb[166].mxu0 }
 0x299   : > { %v8094_v9 = vpop.f32.mrb[167].mxu0  ;;  %v10562_v4 = vld [vmem:[#allocation3 + $0x2a] sm:$0xff] }
 0x29c   : > { %v1172_v56 = vpop.f32.mrb[168].mxu0 }
 0x29d   : > { %v8097_v11 = vpop.f32.mrb[169].mxu0  ;;  %v10573_v56 = vld [vmem:[#allocation3 + $0x32] sm:$0xff] }
 0x29e   : > { %v10579_v11 = vld [vmem:[#allocation3 + $0x3a] sm:$0xff] }
 0x2a3   : > { %v8160_v22 = vpop.f32.mrb[12].mxu1 }
 0x2a4   : > { %2259 = vst.msk [vmem:[#allocation3 + $0x50] sm:$0xf] %vm1346_vm11, %v8160_v22  ;;  %v2249_v48 = vpop.f32.mrb[13].mxu1 }
 0x2a5   : > { %2258 = vst.msk [vmem:[#allocation3 + $0x48] sm:$0xff] %vm1261_vm5, %v2249_v48 }
 0x2ac   : > { %v10266_v38 = vld [vmem:[#allocation3 + $0x41] sm:$0xff]  ;;  %v10280_v14 = vld [vmem:[#allocation3 + $0x49] sm:$0xff] }
 0x2ad   : > { %v3967_v24 = vld [vmem:[#allocation3 + $0x46] sm:$0xff]  ;;  %8239 = vmatmul.mubr.msk.f32.gmra.mrb[34].mxu1 %vm1261_vm5, %v10266_v38 }
 0x2ae   : > { %8501 = vmatmul.mubr.msk.f32.gmra.mrb[190].mxu0 %vm1261_vm5, %v3967_v24  ;;  %8241 = vmatprep.mubr.msk.f32.mxu1 %vm9220_vm1, %v9221_v6 }
 0x2af   : > { %8503 = vmatprep.mubr.msk.f32.mxu0 %vm9220_vm1, %v9221_v6 }
 0x2b1   : > { %8242 = vmatmul.mubr.msk.f32.gmra.mrb[36].mxu1 %vm1261_vm5, %v10280_v14 }
 0x2b2   : > { %8244 = vmatprep.mubr.msk.f32.mxu1 %vm9220_vm1, %v9221_v6 }
 0x2bb   : > { %v8169_v63 = vpop.f32.mrb[14].mxu1 }
 0x2bc   : > { %2386 = vst.msk [vmem:[#allocation3 + $0x5c] sm:$0xf] %vm1346_vm11, %v8169_v63  ;;  %v2376_v30 = vpop.f32.mrb[15].mxu1  ;;  %v10413_v63 = vld [vmem:[#allocation3 + $0x38] sm:$0xff] }
 0x2bd   : > { %2385 = vst.msk [vmem:[#allocation3 + $0x54] sm:$0xff] %vm1261_vm5, %v2376_v30 }
 0x2c4   : > { %v3968_v31 = vld [vmem:[#allocation3 + $0x4e] sm:$0xff]  ;;  %v3969_v62 = vld [vmem:[#allocation3 + $0x56] sm:$0xff] }
 0x2c5   : > { %v10291_v33 = vld [vmem:[#allocation3 + $0x51] sm:$0xff]  ;;  %8504 = vmatmul.mubr.msk.f32.gmra.mrb[192].mxu0 %vm1261_vm5, %v3968_v31 }
 0x2c6   : > { %8245 = vmatmul.mubr.msk.f32.gmra.mrb[38].mxu1 %vm1261_vm5, %v10291_v33  ;;  %8506 = vmatprep.mubr.msk.f32.mxu0 %vm9220_vm1, %v9221_v6 }
 0x2c7   : > { %8247 = vmatprep.mubr.msk.f32.mxu1 %vm9220_vm1, %v9221_v6 }
 0x2c9   : > { %8507 = vmatmul.mubr.msk.f32.gmra.mrb[194].mxu0 %vm1261_vm5, %v3969_v62 }
 0x2ca   : > { %8509 = vmatprep.mubr.msk.f32.mxu0 %vm9220_vm1, %v9221_v6 }
 0x2d7   : > { %v8178_v35 = vpop.f32.mrb[16].mxu1 }
 0x2d8   : > { %2513 = vst.msk [vmem:[#allocation3 + $0x68] sm:$0xf] %vm1346_vm11, %v8178_v35  ;;  %v2503_v52 = vpop.f32.mrb[17].mxu1  ;;  %v10427_v35 = vld [vmem:[#allocation3 + $0x40] sm:$0xff] }
 0x2d9   : > { %2512 = vst.msk [vmem:[#allocation3 + $0x60] sm:$0xff] %vm1261_vm5, %v2503_v52 }
 0x2e0   : > { %v10305_v36 = vld [vmem:[#allocation3 + $0x59] sm:$0xff]  ;;  %v10312_v40 = vld [vmem:[#allocation3 + $0x61] sm:$0xff] }
 0x2e1   : > { %v3970_v39 = vld [vmem:[#allocation3 + $0x5e] sm:$0xff]  ;;  %8248 = vmatmul.mubr.msk.f32.gmra.mrb[40].mxu1 %vm1261_vm5, %v10305_v36 }
 0x2e2   : > { %8510 = vmatmul.mubr.msk.f32.gmra.mrb[196].mxu0 %vm1261_vm5, %v3970_v39  ;;  %8250 = vmatprep.mubr.msk.f32.mxu1 %vm9220_vm1, %v9221_v6  ;;  %v10439_v39 = vld [vmem:[#allocation3 + $0x48] sm:$0xff] }
 0x2e3   : > { %8512 = vmatprep.mubr.msk.f32.mxu0 %vm9220_vm1, %v9221_v6 }
 0x2e4   : > { %v10376_v54 = vpop.f32.mrb[170].mxu0 }
 0x2e5   : > { %8251 = vmatmul.mubr.msk.f32.gmra.mrb[42].mxu1 %vm1261_vm5, %v10312_v40  ;;  %v8216_v15 = vpop.f32.mrb[171].mxu0 }
 0x2e6   : > { %8253 = vmatprep.mubr.msk.f32.mxu1 %vm9220_vm1, %v9221_v6  ;;  %v10585_v15 = vld [vmem:[#allocation3 + $0x42] sm:$0xff] }
 0x2ef   : > { %v8187_v42 = vpop.f32.mrb[18].mxu1 }
 0x2f0   : > { %2640 = vst.msk [vmem:[#allocation3 + $0x74] sm:$0xf] %vm1346_vm11, %v8187_v42  ;;  %v2630_v10 = vpop.f32.mrb[19].mxu1 }
 0x2f1   : > { %2639 = vst.msk [vmem:[#allocation3 + $0x6c] sm:$0xff] %vm1261_vm5, %v2630_v10 }
 0x2f8   : > { %v10322_v26 = vld [vmem:[#allocation3 + $0x69] sm:$0xff] }
 0x2f9   : > { %v3971_v43 = vld [vmem:[#allocation3 + $0x66] sm:$0xff]  ;;  %8254 = vmatmul.mubr.msk.f32.gmra.mrb[44].mxu1 %vm1261_vm5, %v10322_v26  ;;  %v3972_v46 = vld [vmem:[#allocation3 + $0x6e] sm:$0xff] }
 0x2fa   : > { %8513 = vmatmul.mubr.msk.f32.gmra.mrb[198].mxu0 %vm1261_vm5, %v3971_v43  ;;  %8256 = vmatprep.mubr.msk.f32.mxu1 %vm9220_vm1, %v9221_v6 }
 0x2fb   : > { %8515 = vmatprep.mubr.msk.f32.mxu0 %vm9220_vm1, %v9221_v6 }
 0x2fc   : > { %v10382_v17 = vpop.f32.mrb[172].mxu0 }
 0x2fd   : > { %v8219_v20 = vpop.f32.mrb[173].mxu0 }
 0x2fe   : > { %8516 = vmatmul.mubr.msk.f32.gmra.mrb[200].mxu0 %vm1261_vm5, %v3972_v46  ;;  %v10493_v46 = vld [vmem:[#allocation3 + $0x70] sm:$0xff] }
 0x2ff   : > { %8518 = vmatprep.mubr.msk.f32.mxu0 %vm9220_vm1, %v9221_v6  ;;  %v10591_v20 = vld [vmem:[#allocation3 + $0x4a] sm:$0xff] }
 0x30b   : > { %v8196_v18 = vpop.f32.mrb[20].mxu1 }
 0x30c   : > { %2767 = vst.msk [vmem:[#allocation3 + $0x80] sm:$0xf] %vm1346_vm11, %v8196_v18  ;;  %v2757_v47 = vpop.f32.mrb[21].mxu1  ;;  %v3537_v18 = vld [vmem:[%s12235_s3 + $0x60] sm:$0xff] }
 0x30d   : > { %2766 = vst.msk [vmem:[#allocation3 + $0x78] sm:$0xff] %vm1261_vm5, %v2757_v47  ;;  %v3538_v47 = vld [vmem:[%s12235_s3 + $0x68] sm:$0xff] }
 0x30e   : > { %v8777_v29 = vpack.c.bf16 %v3538_v47, %v3537_v18  ;;  %v3756_v18 = vld [vmem:[%s12235_s3 + $0x80] sm:$0xff]  ;;  %v3757_v47 = vld [vmem:[%s12235_s3 + $0x88] sm:$0xff] }
 0x314   : > { %v10342_v32 = vld [vmem:[#allocation3 + $0x71] sm:$0xff] }
 0x315   : > { %v3973_v45 = vld [vmem:[#allocation3 + $0x76] sm:$0xff]  ;;  %8257 = vmatmul.mubr.msk.f32.gmra.mrb[46].mxu1 %vm1261_vm5, %v10342_v32 }
 0x316   : > { %8519 = vmatmul.mubr.msk.f32.gmra.mrb[202].mxu0 %vm1261_vm5, %v3973_v45  ;;  %8267 = vmatprep.mubr.msk.f32.mxu1 %vm9220_vm1, %v9221_v6  ;;  %v3303_v45 = vld [vmem:[#allocation3 + $0x2] sm:$0xff] }
 0x317   : > { %8521 = vmatprep.mubr.msk.f32.mxu0 %vm9220_vm1, %v9221_v6 }
 0x318   : > { %v10386_v50 = vpop.f32.mrb[174].mxu0 }
 0x319   : > { %8268 = vmatmul.mubr.msk.f32.vlgmr.msra.gmra.mrb[48].mxu1 %vm1261_vm5, %v2895_v2  ;;  %v8222_v48 = vpop.f32.mrb[175].mxu0  ;;  %v4410_v2 = vld [vmem:[#allocation3 + $0x79] sm:$0xff] }
 0x31a   : > { %8270 = vmatprep.mubr.msk.f32.mxu1 %vm9220_vm1, %v9221_v6  ;;  %8772 = vmatpush3.bf16.msra.mxu1 %v8771_v49  ;;  %v3539_v49 = vld [vmem:[%s12235_s3 + $0x70] sm:$0xff]  ;;  %v10603_v48 = vld [vmem:[#allocation3 + $0x5a] sm:$0xff] }
 0x31b   : > { %8773 = vmatprep.subr.bf16.mxu1 %v12242_v3 }
 0x31c   : > { %v10393_v0 = vpop.f32.mrb[176].mxu0 }
 0x31d   : > { %8271 = vmatmul.mubr.msk.f32.gmra.mrb[50].mxu1 %vm1261_vm5, %v2896_v59  ;;  %v8481_v23 = vpop.f32.mrb[177].mxu0 }
 0x31e   : > { %8273 = vmatprep.mubr.msk.f32.mxu1 %vm9220_vm1, %v9221_v6  ;;  %8775 = vmatpush3.bf16.msra.mxu1 %v8774_v58 }
 0x31f   : > { %8776 = vmatprep.subr.bf16.mxu1 %v12242_v3 }
 0x320   : > { %v10405_v24 = vpop.f32.mrb[178].mxu0 }
 0x321   : > { %8274 = vmatmul.mubr.msk.f32.gmra.mrb[52].mxu1 %vm1261_vm5, %v2897_v60  ;;  %v8484_v25 = vpop.f32.mrb[179].mxu0 }
 0x322   : > { %8276 = vmatprep.mubr.msk.f32.mxu1 %vm9220_vm1, %v9221_v6 }
 0x323   : > { %v8205_v13 = vpop.f32.mrb[22].mxu1 }
 0x324   : > { %2894 = vst.msk [vmem:[#allocation3 + $0x8c] sm:$0xf] %vm1346_vm11, %v8205_v13  ;;  %v2884_v5 = vpop.f32.mrb[23].mxu1 }
 0x325   : > { %2893 = vst.msk [vmem:[#allocation3 + $0x84] sm:$0xff] %vm1261_vm5, %v2884_v5  ;;  %8277 = vmatmul.mubr.msk.f32.gmra.mrb[54].mxu1 %vm1261_vm5, %v10369_v53 }
 0x326   : > { %8279 = vmatprep.mubr.msk.f32.mxu1 %vm9220_vm1, %v9221_v6 }
 0x329   : > { %8280 = vmatmul.mubr.msk.f32.gmra.mrb[56].mxu1 %vm1261_vm5, %v10378_v57 }
 0x32a   : > { %8282 = vmatprep.mubr.msk.f32.mxu1 %vm9220_vm1, %v9221_v6 }
 0x32b   : > { %v10411_v19 = vpop.f32.mrb[24].mxu1 }
 0x32c   : > { %v3974_v22 = vld [vmem:[#allocation3 + $0x7e] sm:$0xff]  ;;  %v8225_v28 = vpop.f32.mrb[25].mxu1  ;;  %v4412_v13 = vld [vmem:[#allocation3 + $0x89] sm:$0xff] }
 0x32d   : > { %8283 = vmatmul.mubr.msk.f32.gmra.mrb[58].mxu1 %vm1261_vm5, %v10388_v21  ;;  %8522 = vmatmul.mubr.msk.f32.gmra.mrb[204].mxu0 %vm1261_vm5, %v3974_v22  ;;  %v4411_v58 = vld [vmem:[#allocation3 + $0x81] sm:$0xff]  ;;  %v10597_v22 = vld [vmem:[#allocation3 + $0x52] sm:$0xff] }
 0x32e   : > { %8285 = vmatprep.mubr.msk.f32.mxu1 %vm9220_vm1, %v9221_v6  ;;  %8585 = vmatprep.mubr.msk.f32.mxu0 %vm9220_vm1, %v9221_v6 }
 0x330   : > { %v10421_v30 = vpop.f32.mrb[180].mxu0 }
 0x331   : > { %8286 = vmatmul.mubr.msk.f32.gmra.mrb[60].mxu1 %vm1261_vm5, %v10399_v44  ;;  %8586 = vmatmul.mubr.msk.f32.vlgmr.msra.gmra.mrb[206].mxu0 %vm1261_vm5, %v10194_v37  ;;  %v10419_v37 = vpop.f32.mrb[26].mxu1  ;;  %v8487_v62 = vpop.f32.mrb[181].mxu0 }
 0x332   : > { %8288 = vmatprep.mubr.msk.f32.mxu1 %vm9220_vm1, %v9221_v6  ;;  %8588 = vmatprep.mubr.msk.f32.mxu0 %vm9220_vm1, %v9221_v6  ;;  %v8228_v31 = vpop.f32.mrb[27].mxu1  ;;  %v10613_v62 = vld [vmem:[#allocation3 + $0x62] sm:$0xff] }
 0x335   : > { %8289 = vmatmul.mubr.msk.f32.gmra.mrb[62].mxu1 %vm1261_vm5, %v10413_v63  ;;  %8589 = vmatmul.mubr.msk.f32.gmra.mrb[208].mxu0 %vm1261_vm5, %v10201_v12  ;;  %v10433_v12 = vpop.f32.mrb[182].mxu0 }
 0x336   : > { %8291 = vmatprep.mubr.msk.f32.mxu1 %vm9220_vm1, %v9221_v6  ;;  %8591 = vmatprep.mubr.msk.f32.mxu0 %vm9220_vm1, %v9221_v6  ;;  %v8490_v52 = vpop.f32.mrb[183].mxu0 }
 0x339   : > { %8292 = vmatmul.mubr.msk.f32.gmra.mrb[64].mxu1 %vm1261_vm5, %v10427_v35  ;;  %8592 = vmatmul.mubr.msk.f32.gmra.mrb[210].mxu0 %vm1261_vm5, %v10215_v7  ;;  %v10449_v7 = vld [vmem:[#allocation3 + $0x50] sm:$0xff] }
 0x33a   : > { %8294 = vmatprep.mubr.msk.f32.mxu1 %vm9220_vm1, %v9221_v6  ;;  %8594 = vmatprep.mubr.msk.f32.mxu0 %vm9220_vm1, %v9221_v6 }
 0x33d   : > { %8295 = vmatmul.mubr.msk.f32.gmra.mrb[66].mxu1 %vm1261_vm5, %v10439_v39  ;;  %8595 = vmatmul.mubr.msk.f32.gmra.mrb[212].mxu0 %vm1261_vm5, %v10222_v8  ;;  %v10459_v8 = vld [vmem:[#allocation3 + $0x58] sm:$0xff] }
 0x33e   : > { %8297 = vmatprep.mubr.msk.f32.mxu1 %vm9220_vm1, %v9221_v6  ;;  %8597 = vmatprep.mubr.msk.f32.mxu0 %vm9220_vm1, %v9221_v6 }
 0x341   : > { %8298 = vmatmul.mubr.msk.f32.gmra.mrb[68].mxu1 %vm1261_vm5, %v10449_v7  ;;  %8598 = vmatmul.mubr.msk.f32.gmra.mrb[214].mxu0 %vm1261_vm5, %v10238_v41  ;;  %v10469_v41 = vld [vmem:[#allocation3 + $0x60] sm:$0xff] }
 0x342   : > { %8300 = vmatprep.mubr.msk.f32.mxu1 %vm9220_vm1, %v9221_v6  ;;  %8600 = vmatprep.mubr.msk.f32.mxu0 %vm9220_vm1, %v9221_v6 }
 0x345   : > { %8301 = vmatmul.mubr.msk.f32.gmra.mrb[70].mxu1 %vm1261_vm5, %v10459_v8  ;;  %8601 = vmatmul.mubr.msk.f32.gmra.mrb[216].mxu0 %vm1261_vm5, %v10266_v38  ;;  %v10479_v38 = vld [vmem:[#allocation3 + $0x68] sm:$0xff] }
 0x346   : > { %8303 = vmatprep.mubr.msk.f32.mxu1 %vm9220_vm1, %v9221_v6  ;;  %8603 = vmatprep.mubr.msk.f32.mxu0 %vm9220_vm1, %v9221_v6 }
 0x349   : > { %8304 = vmatmul.mubr.msk.f32.gmra.mrb[72].mxu1 %vm1261_vm5, %v10469_v41  ;;  %8604 = vmatmul.mubr.msk.f32.gmra.mrb[218].mxu0 %vm1261_vm5, %v10280_v14 }
 0x34a   : > { %8306 = vmatprep.mubr.msk.f32.mxu1 %vm9220_vm1, %v9221_v6  ;;  %8606 = vmatprep.mubr.msk.f32.mxu0 %vm9220_vm1, %v9221_v6 }
 0x34c   : > { %v10481_v42 = vpop.f32.mrb[28].mxu1 }
 0x34d   : > { %v10483_v10 = vpop.f32.mrb[184].mxu0  ;;  %8307 = vmatmul.mubr.msk.f32.gmra.mrb[74].mxu1 %vm1261_vm5, %v10479_v38  ;;  %8607 = vmatmul.mubr.msk.f32.gmra.mrb[220].mxu0 %vm1261_vm5, %v10291_v33  ;;  %v8231_v43 = vpop.f32.mrb[29].mxu1 }
 0x34e   : > { %v8493_v14 = vpop.f32.mrb[185].mxu0  ;;  %8309 = vmatprep.mubr.msk.f32.mxu1 %vm9220_vm1, %v9221_v6  ;;  %8609 = vmatprep.mubr.msk.f32.mxu0 %vm9220_vm1, %v9221_v6 }
 0x34f   : > { %v10621_v14 = vld [vmem:[#allocation3 + $0x6a] sm:$0xff] }
 0x350   : > { %v10501_v1 = vpop.f32.mrb[30].mxu1 }
 0x351   : > { %8310 = vmatmul.mubr.msk.f32.gmra.mrb[76].mxu1 %vm1261_vm5, %v10493_v46  ;;  %8610 = vmatmul.mubr.msk.f32.gmra.mrb[222].mxu0 %vm1261_vm5, %v10305_v36  ;;  %v8234_v33 = vpop.f32.mrb[31].mxu1  ;;  %v8780_v36 = vpack.c.bf16 %v3540_v34, %v3539_v49  ;;  %v3759_v49 = vld [vmem:[%s12235_s3 + $0x98] sm:$0xff] }
 0x352   : > { %8320 = vmatprep.mubr.msk.f32.mxu1 %vm9220_vm1, %v9221_v6  ;;  %8612 = vmatprep.mubr.msk.f32.mxu0 %vm9220_vm1, %v9221_v6  ;;  %v10633_v33 = vld [vmem:[#allocation3 + $0x72] sm:$0xff] }
 0x353   : > { %v3522_v34 = vld [vmem:[#allocation3 + $0xc] sm:$0xff] }
 0x355   : > { %8321 = vmatmul.mubr.msk.f32.vlgmr.msra.gmra.mrb[78].mxu1 %vm1261_vm5, %v3303_v45  ;;  %8613 = vmatmul.mubr.msk.f32.gmra.mrb[224].mxu0 %vm1261_vm5, %v10312_v40  ;;  %v3305_v40 = vld [vmem:[#allocation3 + $0x12] sm:$0xff]  ;;  %v3758_v45 = vld [vmem:[%s12235_s3 + $0x90] sm:$0xff] }
 0x356   : > { %8323 = vmatprep.mubr.msk.f32.mxu1 %vm9220_vm1, %v9221_v6  ;;  %8615 = vmatprep.mubr.msk.f32.mxu0 %vm9220_vm1, %v9221_v6 }
 0x357   : > { %8778 = vmatpush3.bf16.msra.mxu1 %v8777_v29  ;;  %v8783_v29 = vpack.c.bf16 %v3757_v47, %v3756_v18  ;;  %v3528_v18 = vld [vmem:[#allocation3 + $0x3c] sm:$0xff]  ;;  %v3529_v47 = vld [vmem:[#allocation3 + $0x44] sm:$0xff] }
 0x358   : > { %8779 = vmatprep.subr.bf16.mxu1 %v12242_v3 }
 0x359   : > { %8324 = vmatmul.mubr.msk.f32.gmra.mrb[80].mxu1 %vm1261_vm5, %v3304_v27  ;;  %8616 = vmatmul.mubr.msk.f32.gmra.mrb[226].mxu0 %vm1261_vm5, %v10322_v26  ;;  %v10540_v26 = vld [vmem:[#allocation3 + $0x1a] sm:$0xff] }
 0x35a   : > { %8326 = vmatprep.mubr.msk.f32.mxu1 %vm9220_vm1, %v9221_v6  ;;  %8618 = vmatprep.mubr.msk.f32.mxu0 %vm9220_vm1, %v9221_v6  ;;  %v3523_v27 = vld [vmem:[#allocation3 + $0x14] sm:$0xff] }
 0x35b   : > { %8781 = vmatpush3.bf16.msra.mxu1 %v8780_v36  ;;  %v8786_v36 = vpack.c.bf16 %v3759_v49, %v3758_v45  ;;  %v3531_v45 = vld [vmem:[#allocation3 + $0x54] sm:$0xff] }
 0x35c   : > { %8782 = vmatprep.subr.bf16.mxu1 %v12242_v3 }
 0x35d   : > { %8327 = vmatmul.mubr.msk.f32.gmra.mrb[82].mxu1 %vm1261_vm5, %v3305_v40  ;;  %8619 = vmatmul.mubr.msk.f32.gmra.mrb[228].mxu0 %vm1261_vm5, %v10342_v32  ;;  %v10549_v32 = vld [vmem:[#allocation3 + $0x22] sm:$0xff] }
 0x35e   : > { %8329 = vmatprep.mubr.msk.f32.mxu1 %vm9220_vm1, %v9221_v6  ;;  %8621 = vmatprep.mubr.msk.f32.mxu0 %vm9220_vm1, %v9221_v6  ;;  %v3524_v40 = vld [vmem:[#allocation3 + $0x1c] sm:$0xff] }
 0x361   : > { %8330 = vmatmul.mubr.msk.f32.gmra.mrb[84].mxu1 %vm1261_vm5, %v10540_v26  ;;  %8622 = vmatmul.mubr.msk.f32.gmra.mrb[230].mxu0 %vm1261_vm5, %v4410_v2 }
 0x362   : > { %8332 = vmatprep.mubr.msk.f32.mxu1 %vm9220_vm1, %v9221_v6  ;;  %8624 = vmatprep.mubr.msk.f32.mxu0 %vm9220_vm1, %v9221_v6 }
 0x364   : > { %v10553_v60 = vpop.f32.mrb[186].mxu0 }
 0x365   : > { %v10551_v59 = vpop.f32.mrb[32].mxu1  ;;  %8333 = vmatmul.mubr.msk.f32.gmra.mrb[86].mxu1 %vm1261_vm5, %v10549_v32  ;;  %8625 = vmatmul.mubr.msk.f32.gmra.mrb[232].mxu0 %vm1261_vm5, %v4411_v58  ;;  %v8496_v16 = vpop.f32.mrb[187].mxu0 }
 0x366   : > { %v8237_v61 = vpop.f32.mrb[33].mxu1  ;;  %8335 = vmatprep.mubr.msk.f32.mxu1 %vm9220_vm1, %v9221_v6  ;;  %8627 = vmatprep.mubr.msk.f32.mxu0 %vm9220_vm1, %v9221_v6 }
 0x368   : > { %v10564_v5 = vpop.f32.mrb[188].mxu0 }
 0x369   : > { %8336 = vmatmul.mubr.msk.f32.gmra.mrb[88].mxu1 %vm1261_vm5, %v10562_v4  ;;  %8628 = vmatmul.mubr.msk.f32.gmra.mrb[234].mxu0 %vm1261_vm5, %v4412_v13  ;;  %v8499_v9 = vpop.f32.mrb[189].mxu0  ;;  %v3525_v13 = vld [vmem:[#allocation3 + $0x24] sm:$0xff] }
 0x36a   : > { %8338 = vmatprep.mubr.msk.f32.mxu1 %vm9220_vm1, %v9221_v6  ;;  %8685 = vmatprep.mubr.msk.f32.mxu0 %vm9220_vm1, %v9221_v6 }
 0x36d   : > { %8339 = vmatmul.mubr.msk.f32.gmra.mrb[90].mxu1 %vm1261_vm5, %v10573_v56 }
 0x36e   : > { %8341 = vmatprep.mubr.msk.f32.mxu1 %vm9220_vm1, %v9221_v6 }
 0x371   : > { %8342 = vmatmul.mubr.msk.f32.gmra.mrb[92].mxu1 %vm1261_vm5, %v10579_v11 }
 0x372   : > { %8344 = vmatprep.mubr.msk.f32.mxu1 %vm9220_vm1, %v9221_v6 }
 0x375   : > { %8345 = vmatmul.mubr.msk.f32.gmra.mrb[94].mxu1 %vm1261_vm5, %v10585_v15 }
 0x376   : > { %8347 = vmatprep.mubr.msk.f32.mxu1 %vm9220_vm1, %v9221_v6 }
 0x379   : > { %8348 = vmatmul.mubr.msk.f32.gmra.mrb[96].mxu1 %vm1261_vm5, %v10591_v20 }
 0x37a   : > { %8350 = vmatprep.mubr.msk.f32.mxu1 %vm9220_vm1, %v9221_v6 }
 0x37d   : > { %8351 = vmatmul.mubr.msk.f32.gmra.mrb[98].mxu1 %vm1261_vm5, %v10597_v22 }
 0x37e   : > { %8353 = vmatprep.mubr.msk.f32.mxu1 %vm9220_vm1, %v9221_v6 }
 0x380   : > { %v10605_v23 = vpop.f32.mrb[34].mxu1 }
 0x381   : > { %v10607_v25 = vpop.f32.mrb[190].mxu0  ;;  %8354 = vmatmul.mubr.msk.f32.gmra.mrb[100].mxu1 %vm1261_vm5, %v10603_v48  ;;  %v8240_v28 = vpop.f32.mrb[35].mxu1 }
 0x382   : > { %v8502_v31 = vpop.f32.mrb[191].mxu0  ;;  %8356 = vmatprep.mubr.msk.f32.mxu1 %vm9220_vm1, %v9221_v6 }
 0x383   : > { %v3526_v31 = vld [vmem:[#allocation3 + $0x2c] sm:$0xff] }
 0x384   : > { %v10615_v52 = vpop.f32.mrb[36].mxu1 }
 0x385   : > { %8357 = vmatmul.mubr.msk.f32.gmra.mrb[102].mxu1 %vm1261_vm5, %v10613_v62  ;;  %v8243_v43 = vpop.f32.mrb[37].mxu1 }
 0x386   : > { %8359 = vmatprep.mubr.msk.f32.mxu1 %vm9220_vm1, %v9221_v6  ;;  %v3527_v43 = vld [vmem:[#allocation3 + $0x34] sm:$0xff] }
 0x389   : > { %8360 = vmatmul.mubr.msk.f32.gmra.mrb[104].mxu1 %vm1261_vm5, %v10621_v14 }
 0x38a   : > { %8362 = vmatprep.mubr.msk.f32.mxu1 %vm9220_vm1, %v9221_v6 }
 0x38d   : > { %8363 = vmatmul.mubr.msk.f32.gmra.mrb[106].mxu1 %vm1261_vm5, %v10633_v33 }
 0x38e   : > { %8373 = vmatprep.mubr.msk.f32.mxu1 %vm9220_vm1, %v9221_v6 }
 0x391   : > { %8374 = vmatmul.mubr.msk.f32.vlgmr.msra.gmra.mrb[108].mxu1 %vm1261_vm5, %v3522_v34 }
 0x392   : > { %8376 = vmatprep.mubr.msk.f32.mxu1 %vm9220_vm1, %v9221_v6  ;;  %8784 = vmatpush3.bf16.msra.mxu1 %v8783_v29  ;;  %v3530_v29 = vld [vmem:[#allocation3 + $0x4c] sm:$0xff] }
 0x393   : > { %8785 = vmatprep.subr.bf16.mxu1 %v12242_v3 }
 0x395   : > { %8377 = vmatmul.mubr.msk.f32.gmra.mrb[110].mxu1 %vm1261_vm5, %v3523_v27 }
 0x396   : > { %8379 = vmatprep.mubr.msk.f32.mxu1 %vm9220_vm1, %v9221_v6  ;;  %8787 = vmatpush3.bf16.msra.mxu1 %v8786_v36 }
 0x397   : > { %8794 = vmatprep.subr.bf16.mxu1 %v12242_v3 }
 0x398   : > { %v10655_v58 = vpop.f32.mrb[192].mxu0 }
 0x399   : > { %v10653_v2 = vpop.f32.mrb[38].mxu1  ;;  %8380 = vmatmul.mubr.msk.f32.gmra.mrb[112].mxu1 %vm1261_vm5, %v3524_v40  ;;  %v8505_v16 = vpop.f32.mrb[193].mxu0  ;;  %v3532_v40 = vld [vmem:[#allocation3 + $0x5c] sm:$0xff] }
 0x39a   : > { %v8246_v61 = vpop.f32.mrb[39].mxu1  ;;  %8382 = vmatprep.mubr.msk.f32.mxu1 %vm9220_vm1, %v9221_v6 }
 0x39c   : > { %v10660_v9 = vpop.f32.mrb[194].mxu0 }
 0x39d   : > { %8383 = vmatmul.mubr.msk.f32.gmra.mrb[114].mxu1 %vm1261_vm5, %v3525_v13  ;;  %v8508_v28 = vpop.f32.mrb[195].mxu0  ;;  %v3533_v13 = vld [vmem:[#allocation3 + $0x64] sm:$0xff] }
 0x39e   : > { %8385 = vmatprep.mubr.msk.f32.mxu1 %vm9220_vm1, %v9221_v6  ;;  %v3534_v28 = vld [vmem:[#allocation3 + $0x6c] sm:$0xff] }
 0x3a1   : > { %8386 = vmatmul.mubr.msk.f32.gmra.mrb[116].mxu1 %vm1261_vm5, %v3526_v31  ;;  %v3535_v31 = vld [vmem:[#allocation3 + $0x74] sm:$0xff] }
 0x3a2   : > { %8388 = vmatprep.mubr.msk.f32.mxu1 %vm9220_vm1, %v9221_v6 }
 0x3a5   : > { %8389 = vmatmul.mubr.msk.f32.gmra.mrb[118].mxu1 %vm1261_vm5, %v3527_v43  ;;  %v4194_v43 = vld [vmem:[%s12235_s3 + $0xc0] sm:$0xff] }
 0x3a6   : > { %8391 = vmatprep.mubr.msk.f32.mxu1 %vm9220_vm1, %v9221_v6 }
 0x3a9   : > { %8392 = vmatmul.mubr.msk.f32.gmra.mrb[120].mxu1 %vm1261_vm5, %v3528_v18  ;;  %v4195_v18 = vld [vmem:[%s12235_s3 + $0xc8] sm:$0xff] }
 0x3aa   : > { %8394 = vmatprep.mubr.msk.f32.mxu1 %vm9220_vm1, %v9221_v6 }
 0x3ad   : > { %8395 = vmatmul.mubr.msk.f32.gmra.mrb[122].mxu1 %vm1261_vm5, %v3529_v47  ;;  %v3536_v47 = vld [vmem:[#allocation3 + $0x7c] sm:$0xff] }
 0x3ae   : > { %8397 = vmatprep.mubr.msk.f32.mxu1 %vm9220_vm1, %v9221_v6 }
 0x3b1   : > { %8398 = vmatmul.mubr.msk.f32.gmra.mrb[124].mxu1 %vm1261_vm5, %v3530_v29  ;;  %v8795_v29 = vpack.c.bf16 %v4195_v18, %v4194_v43  ;;  %v3742_v43 = vld [vmem:[#allocation3 + $0x15] sm:$0xff] }
 0x3b2   : > { %8400 = vmatprep.mubr.msk.f32.mxu1 %vm9220_vm1, %v9221_v6 }
 0x3b4   : > { %v10680_v49 = vpop.f32.mrb[40].mxu1 }
 0x3b5   : > { %v10682_v34 = vpop.f32.mrb[196].mxu0  ;;  %8401 = vmatmul.mubr.msk.f32.gmra.mrb[126].mxu1 %vm1261_vm5, %v3531_v45  ;;  %v8249_v36 = vpop.f32.mrb[41].mxu1  ;;  %v4196_v45 = vld [vmem:[%s12235_s3 + $0xd0] sm:$0xff] }
 0x3b6   : > { %v8511_v27 = vpop.f32.mrb[197].mxu0  ;;  %8403 = vmatprep.mubr.msk.f32.mxu1 %vm9220_vm1, %v9221_v6  ;;  %v4197_v36 = vld [vmem:[%s12235_s3 + $0xd8] sm:$0xff] }
 0x3b7   : > { %v3741_v27 = vld [vmem:[#allocation3 + $0xd] sm:$0xff] }
 0x3b8   : > { %v10687_v61 = vpop.f32.mrb[42].mxu1 }
 0x3b9   : > { %8404 = vmatmul.mubr.msk.f32.gmra.mrb[128].mxu1 %vm1261_vm5, %v3532_v40  ;;  %v8252_v16 = vpop.f32.mrb[43].mxu1 }
 0x3ba   : > { %8406 = vmatprep.mubr.msk.f32.mxu1 %vm9220_vm1, %v9221_v6 }
 0x3bd   : > { %8407 = vmatmul.mubr.msk.f32.gmra.mrb[130].mxu1 %vm1261_vm5, %v3533_v13 }
 0x3be   : > { %8409 = vmatprep.mubr.msk.f32.mxu1 %vm9220_vm1, %v9221_v6 }
 0x3c1   : > { %8410 = vmatmul.mubr.msk.f32.gmra.mrb[132].mxu1 %vm1261_vm5, %v3534_v28 }
 0x3c2   : > { %8412 = vmatprep.mubr.msk.f32.mxu1 %vm9220_vm1, %v9221_v6 }
 0x3c5   : > { %8413 = vmatmul.mubr.msk.f32.gmra.mrb[134].mxu1 %vm1261_vm5, %v3535_v31  ;;  %v8798_v31 = vpack.c.bf16 %v4197_v36, %v4196_v45  ;;  %v3745_v45 = vld [vmem:[#allocation3 + $0x2d] sm:$0xff]  ;;  %v3746_v36 = vld [vmem:[#allocation3 + $0x35] sm:$0xff] }
 0x3c6   : > { %8415 = vmatprep.mubr.msk.f32.mxu1 %vm9220_vm1, %v9221_v6 }
 0x3c9   : > { %8416 = vmatmul.mubr.msk.f32.gmra.mrb[136].mxu1 %vm1261_vm5, %v3536_v47 }
 0x3ca   : > { %8426 = vmatprep.mubr.msk.f32.mxu1 %vm9220_vm1, %v9221_v6 }
 0x3cc   : > { %v10716_v40 = vpop.f32.mrb[44].mxu1 }
 0x3cd   : > { %v10718_v16 = vpop.f32.mrb[198].mxu0  ;;  %8427 = vmatmul.mubr.msk.f32.vlgmr.msra.gmra.mrb[138].mxu1 %vm1261_vm5, %v3741_v27  ;;  %v8255_v13 = vpop.f32.mrb[45].mxu1  ;;  %v3743_v27 = vld [vmem:[#allocation3 + $0x1d] sm:$0xff] }
 0x3ce   : > { %v8514_v28 = vpop.f32.mrb[199].mxu0  ;;  %8429 = vmatprep.mubr.msk.f32.mxu1 %vm9220_vm1, %v9221_v6  ;;  %8796 = vmatpush3.bf16.msra.mxu1 %v8795_v29  ;;  %v3744_v29 = vld [vmem:[#allocation3 + $0x25] sm:$0xff]  ;;  %v3747_v13 = vld [vmem:[#allocation3 + $0x3d] sm:$0xff] }
 0x3cf   : > { %8797 = vmatprep.subr.bf16.mxu1 %v12242_v3 }
 0x3d1   : > { %v10724_v18 = vpop.f32.mrb[200].mxu0  ;;  %8430 = vmatmul.mubr.msk.f32.gmra.mrb[140].mxu1 %vm1261_vm5, %v3742_v43  ;;  %v3748_v43 = vld [vmem:[#allocation3 + $0x45] sm:$0xff] }
 0x3d2   : > { %v8517_v47 = vpop.f32.mrb[201].mxu0  ;;  %8432 = vmatprep.mubr.msk.f32.mxu1 %vm9220_vm1, %v9221_v6  ;;  %8799 = vmatpush3.bf16.msra.mxu1 %v8798_v31 }
 0x3d3   : > { %8806 = vmatprep.subr.bf16.mxu1 %v12242_v3  ;;  %v3750_v3 = vld [vmem:[#allocation3 + $0x55] sm:$0xff] }
 0x3d5   : > { %8433 = vmatmul.mubr.msk.f32.gmra.mrb[142].mxu1 %vm1261_vm5, %v3743_v27 }
 0x3d6   : > { %8435 = vmatprep.mubr.msk.f32.mxu1 %vm9220_vm1, %v9221_v6 }
 0x3d9   : > { %8436 = vmatmul.mubr.msk.f32.gmra.mrb[144].mxu1 %vm1261_vm5, %v3744_v29 }
 0x3da   : > { %8438 = vmatprep.mubr.msk.f32.mxu1 %vm9220_vm1, %v9221_v6 }
 0x3dd   : > { %8439 = vmatmul.mubr.msk.f32.gmra.mrb[146].mxu1 %vm1261_vm5, %v3745_v45  ;;  %v3749_v45 = vld [vmem:[#allocation3 + $0x4d] sm:$0xff] }
 0x3de   : > { %8441 = vmatprep.mubr.msk.f32.mxu1 %vm9220_vm1, %v9221_v6 }
 0x3e1   : > { %8442 = vmatmul.mubr.msk.f32.gmra.mrb[148].mxu1 %vm1261_vm5, %v3746_v36 }
 0x3e2   : > { %8444 = vmatprep.mubr.msk.f32.mxu1 %vm9220_vm1, %v9221_v6 }
 0x3e5   : > { %8445 = vmatmul.mubr.msk.f32.gmra.mrb[150].mxu1 %vm1261_vm5, %v3747_v13 }
 0x3e6   : > { %8447 = vmatprep.mubr.msk.f32.mxu1 %vm9220_vm1, %v9221_v6 }
 0x3e8   : > { %v3114_v28 = vpop.f32.mrb[46].mxu1 }
 0x3e9   : > { %v10745_v31 = vpop.f32.mrb[202].mxu0  ;;  %v8258_v47 = vpop.f32.mrb[47].mxu1  ;;  %8448 = vmatmul.mubr.msk.f32.gmra.mrb[152].mxu1 %vm1261_vm5, %v3748_v43 }
 0x3ea   : > { %12251 = vst [vmem:[#allocation10_spill] sm:$0xff] %v10745_v31  ;;  %v8520_v27 = vpop.f32.mrb[203].mxu0  ;;  %8450 = vmatprep.mubr.msk.f32.mxu1 %vm9220_vm1, %v9221_v6 }
 0x3ec   : > { %v3229_v29 = vpop.f32.mrb[48].mxu1 }
 0x3ed   : > { %v10751_v36 = vadd.f32 %v3229_v29, %v10376_v54  ;;  %v8269_v13 = vpop.f32.mrb[49].mxu1  ;;  %8451 = vmatmul.mubr.msk.f32.gmra.mrb[154].mxu1 %vm1261_vm5, %v3749_v45  ;;  %v3751_v54 = vld [vmem:[#allocation3 + $0x5d] sm:$0xff] }
 0x3ee   : > { %8453 = vmatprep.mubr.msk.f32.mxu1 %vm9220_vm1, %v9221_v6 }
 0x3f0   : > { %v3234_v28 = vpop.f32.mrb[50].mxu1 }
 0x3f1   : > { %v10757_v47 = vadd.f32 %v3234_v28, %v10382_v17  ;;  %v8272_v43 = vpop.f32.mrb[51].mxu1  ;;  %8454 = vmatmul.mubr.msk.f32.gmra.mrb[156].mxu1 %vm1261_vm5, %v3750_v3  ;;  %v3752_v17 = vld [vmem:[#allocation3 + $0x65] sm:$0xff] }
 0x3f2   : > { %8456 = vmatprep.mubr.msk.f32.mxu1 %vm9220_vm1, %v9221_v6 }
 0x3f4   : > { %v3239_v27 = vpop.f32.mrb[52].mxu1 }
 0x3f5   : > { %v10763_v29 = vadd.f32 %v3239_v27, %v10386_v50  ;;  %v8275_v45 = vpop.f32.mrb[53].mxu1  ;;  %8457 = vmatmul.mubr.msk.f32.gmra.mrb[158].mxu1 %vm1261_vm5, %v3751_v54  ;;  %v3753_v50 = vld [vmem:[#allocation3 + $0x6d] sm:$0xff] }
 0x3f6   : > { %8459 = vmatprep.mubr.msk.f32.mxu1 %vm9220_vm1, %v9221_v6 }
 0x3f8   : > { %v3244_v13 = vpop.f32.mrb[54].mxu1 }
 0x3f9   : > { %v10769_v28 = vadd.f32 %v3244_v13, %v10411_v19  ;;  %v8278_v3 = vpop.f32.mrb[55].mxu1  ;;  %8460 = vmatmul.mubr.msk.f32.gmra.mrb[160].mxu1 %vm1261_vm5, %v3752_v17  ;;  %v3754_v13 = vld [vmem:[#allocation3 + $0x75] sm:$0xff] }
 0x3fa   : > { %8462 = vmatprep.mubr.msk.f32.mxu1 %vm9220_vm1, %v9221_v6 }
 0x3fc   : > { %v3249_v43 = vpop.f32.mrb[56].mxu1 }
 0x3fd   : > { %v10775_v27 = vadd.f32 %v3249_v43, %v10419_v37  ;;  %v8281_v54 = vpop.f32.mrb[57].mxu1  ;;  %8463 = vmatmul.mubr.msk.f32.gmra.mrb[162].mxu1 %vm1261_vm5, %v3753_v50  ;;  %v4632_v37 = vld [vmem:[%s12235_s3 + $0x100] sm:$0xff]  ;;  %v4633_v43 = vld [vmem:[%s12235_s3 + $0x108] sm:$0xff] }
 0x3fe   : > { %8465 = vmatprep.mubr.msk.f32.mxu1 %vm9220_vm1, %v9221_v6 }
 0x400   : > { %v3254_v45 = vpop.f32.mrb[58].mxu1  ;;  %v4160_v19 = vpop.f32.mrb[204].mxu0 }
 0x401   : > { %v10781_v3 = vadd.f32 %v3254_v45, %v10481_v42  ;;  %v8284_v17 = vpop.f32.mrb[59].mxu1  ;;  %8466 = vmatmul.mubr.msk.f32.gmra.mrb[164].mxu1 %vm1261_vm5, %v3754_v13  ;;  %v8523_v51 = vpop.f32.mrb[205].mxu0  ;;  %v3755_v42 = vld [vmem:[#allocation3 + $0x7d] sm:$0xff]  ;;  %v8807_v13 = vpack.c.bf16 %v4633_v43, %v4632_v37  ;;  %v12254_v43 = vmov 0.0|0.0  }
 0x402   : > { %8468 = vmatprep.mubr.msk.f32.mxu1 %vm9220_vm1, %v9221_v6  ;;  %v4634_v17 = vld [vmem:[%s12235_s3 + $0x110] sm:$0xff] }
 0x403   : > { %v8810_v37 = vpack.c.bf16 %v4635_v55, %v4634_v17 }
 0x404   : > { %v3259_v50 = vpop.f32.mrb[60].mxu1  ;;  %v10792_v54 = vpop.f32.mrb[206].mxu0 }
 0x405   : > { %12252 = vst [vmem:[#allocation11_spill] sm:$0xff] %v10792_v54  ;;  %v10795_v45 = vadd.f32 %v3259_v50, %v10501_v1  ;;  %v8287_v19 = vpop.f32.mrb[61].mxu1  ;;  %8469 = vmatmul.mubr.msk.f32.gmra.mrb[166].mxu1 %vm1261_vm5, %v3755_v42  ;;  %v8587_v51 = vpop.f32.mrb[207].mxu0 }
 0x406   : > { %8532 = vmatprep.mubr.msk.f32.mxu1 %vm9220_vm1, %v9221_v6 }
 0x408   : > { %v3264_v54 = vpop.f32.mrb[62].mxu1  ;;  %v10806_v31 = vpop.f32.mrb[208].mxu0 }
 0x409   : > { %12253 = vst [vmem:[#allocation12_spill] sm:$0xff] %v10806_v31  ;;  %v10809_v1 = vadd.f32 %v3264_v54, %v10551_v59  ;;  %v8290_v50 = vpop.f32.mrb[63].mxu1  ;;  %8533 = vmatmul.mubr.msk.f32.vlgmr.msra.gmra.mrb[168].mxu1 %vm1261_vm5, %v10369_v53  ;;  %v8590_v42 = vpop.f32.mrb[209].mxu0 }
 0x40a   : > { %8535 = vmatprep.mubr.msk.f32.mxu1 %vm9220_vm1, %v9221_v6  ;;  %8808 = vmatpush3.bf16.msra.mxu1 %v8807_v13 }
 0x40b   : > { %8809 = vmatprep.subr.bf16.mxu1 %v12254_v43 }
 0x40c   : > { %v3269_v19 = vpop.f32.mrb[64].mxu1  ;;  %v10816_v51 = vpop.f32.mrb[210].mxu0 }
 0x40d   : > { %v10819_v31 = vadd.f32 %v3269_v19, %v10605_v23  ;;  %v8293_v59 = vpop.f32.mrb[65].mxu1  ;;  %8536 = vmatmul.mubr.msk.f32.gmra.mrb[170].mxu1 %vm1261_vm5, %v10378_v57  ;;  %v8593_v54 = vpop.f32.mrb[211].mxu0 }
 0x40e   : > { %8538 = vmatprep.mubr.msk.f32.mxu1 %vm9220_vm1, %v9221_v6  ;;  %8811 = vmatpush3.bf16.msra.mxu1 %v8810_v37 }
 0x410   : > { %v3274_v53 = vpop.f32.mrb[66].mxu1  ;;  %v10825_v13 = vpop.f32.mrb[212].mxu0 }
 0x411   : > { %v10828_v55 = vadd.f32 %v3274_v53, %v10615_v52  ;;  %v8296_v17 = vpop.f32.mrb[67].mxu1  ;;  %8539 = vmatmul.mubr.msk.f32.gmra.mrb[172].mxu1 %vm1261_vm5, %v10388_v21  ;;  %v8596_v23 = vpop.f32.mrb[213].mxu0 }
 0x412   : > { %8541 = vmatprep.mubr.msk.f32.mxu1 %vm9220_vm1, %v9221_v6 }
 0x414   : > { %v3279_v57 = vpop.f32.mrb[68].mxu1  ;;  %v10834_v50 = vpop.f32.mrb[214].mxu0 }
 0x415   : > { %v10837_v42 = vadd.f32 %v3279_v57, %v10653_v2  ;;  %v8299_v37 = vpop.f32.mrb[69].mxu1  ;;  %8542 = vmatmul.mubr.msk.f32.gmra.mrb[174].mxu1 %vm1261_vm5, %v10399_v44  ;;  %v8599_v52 = vpop.f32.mrb[215].mxu0 }
 0x416   : > { %8544 = vmatprep.mubr.msk.f32.mxu1 %vm9220_vm1, %v9221_v6 }
 0x418   : > { %v3284_v43 = vpop.f32.mrb[70].mxu1  ;;  %v10843_v21 = vpop.f32.mrb[216].mxu0 }
 0x419   : > { %v10846_v19 = vadd.f32 %v3284_v43, %v10680_v49  ;;  %v8302_v59 = vpop.f32.mrb[71].mxu1  ;;  %8545 = vmatmul.mubr.msk.f32.gmra.mrb[176].mxu1 %vm1261_vm5, %v10413_v63  ;;  %v8602_v2 = vpop.f32.mrb[217].mxu0 }
 0x41a   : > { %8547 = vmatprep.mubr.msk.f32.mxu1 %vm9220_vm1, %v9221_v6 }
 0x41c   : > { %v3289_v54 = vpop.f32.mrb[72].mxu1  ;;  %v10852_v44 = vpop.f32.mrb[218].mxu0 }
 0x41d   : > { %v10855_v53 = vadd.f32 %v3289_v54, %v10687_v61  ;;  %v8305_v17 = vpop.f32.mrb[73].mxu1  ;;  %8548 = vmatmul.mubr.msk.f32.gmra.mrb[178].mxu1 %vm1261_vm5, %v10427_v35  ;;  %v8605_v49 = vpop.f32.mrb[219].mxu0 }
 0x41e   : > { %8550 = vmatprep.mubr.msk.f32.mxu1 %vm9220_vm1, %v9221_v6 }
 0x420   : > { %v3294_v23 = vpop.f32.mrb[74].mxu1  ;;  %v10861_v63 = vpop.f32.mrb[220].mxu0 }
 0x421   : > { %v10864_v57 = vadd.f32 %v3294_v23, %v10716_v40  ;;  %v8308_v37 = vpop.f32.mrb[75].mxu1  ;;  %8551 = vmatmul.mubr.msk.f32.gmra.mrb[180].mxu1 %vm1261_vm5, %v10439_v39  ;;  %v8608_v61 = vpop.f32.mrb[221].mxu0 }
 0x422   : > { %8553 = vmatprep.mubr.msk.f32.mxu1 %vm9220_vm1, %v9221_v6 }
 0x424   : > { %v3299_v52 = vpop.f32.mrb[76].mxu1  ;;  %v10870_v35 = vpop.f32.mrb[222].mxu0 }
 0x425   : > { %v8311_v43 = vpop.f32.mrb[77].mxu1  ;;  %8554 = vmatmul.mubr.msk.f32.gmra.mrb[182].mxu1 %vm1261_vm5, %v10449_v7  ;;  %v8611_v59 = vpop.f32.mrb[223].mxu0 }
 0x426   : > { %8556 = vmatprep.mubr.msk.f32.mxu1 %vm9220_vm1, %v9221_v6 }
 0x428   : > { %v3433_v40 = vpop.f32.mrb[78].mxu1  ;;  %v10876_v2 = vpop.f32.mrb[224].mxu0 }
 0x429   : > { %v10879_v39 = vadd.f32 %v3433_v40, %v10751_v36  ;;  %v8322_v54 = vpop.f32.mrb[79].mxu1  ;;  %8557 = vmatmul.mubr.msk.f32.gmra.mrb[184].mxu1 %vm1261_vm5, %v10459_v8  ;;  %v8614_v17 = vpop.f32.mrb[225].mxu0 }
 0x42a   : > { %8559 = vmatprep.mubr.msk.f32.mxu1 %vm9220_vm1, %v9221_v6 }
 0x42c   : > { %v3438_v49 = vpop.f32.mrb[80].mxu1  ;;  %v10885_v7 = vpop.f32.mrb[226].mxu0 }
 0x42d   : > { %v10888_v23 = vadd.f32 %v3438_v49, %v10757_v47  ;;  %v8325_v37 = vpop.f32.mrb[81].mxu1  ;;  %8560 = vmatmul.mubr.msk.f32.gmra.mrb[186].mxu1 %vm1261_vm5, %v10469_v41  ;;  %v8617_v36 = vpop.f32.mrb[227].mxu0  ;;  %v4191_v49 = vld [vmem:[#allocation3 + $0x78] sm:$0xff] }
 0x42e   : > { %8562 = vmatprep.mubr.msk.f32.mxu1 %vm9220_vm1, %v9221_v6 }
 0x430   : > { %v3443_v61 = vpop.f32.mrb[82].mxu1  ;;  %v10894_v8 = vpop.f32.mrb[228].mxu0 }
 0x431   : > { %v10897_v52 = vadd.f32 %v3443_v61, %v10763_v29  ;;  %v8328_v43 = vpop.f32.mrb[83].mxu1  ;;  %8563 = vmatmul.mubr.msk.f32.gmra.mrb[188].mxu1 %vm1261_vm5, %v10479_v38  ;;  %v8620_v47 = vpop.f32.mrb[229].mxu0 }
 0x432   : > { %8565 = vmatprep.mubr.msk.f32.mxu1 %vm9220_vm1, %v9221_v6 }
 0x434   : > { %v3448_v59 = vpop.f32.mrb[84].mxu1  ;;  %v10903_v41 = vpop.f32.mrb[230].mxu0 }
 0x435   : > { %v10906_v40 = vadd.f32 %v3448_v59, %v10769_v28  ;;  %v8331_v54 = vpop.f32.mrb[85].mxu1  ;;  %8566 = vmatmul.mubr.msk.f32.gmra.mrb[190].mxu1 %vm1261_vm5, %v10493_v46  ;;  %v8623_v29 = vpop.f32.mrb[231].mxu0  ;;  %v4192_v46 = vld [vmem:[#allocation3 + $0x80] sm:$0xff] }
 0x436   : > { %8568 = vmatprep.mubr.msk.f32.mxu1 %vm9220_vm1, %v9221_v6  ;;  %v4193_v29 = vld [vmem:[#allocation3 + $0x88] sm:$0xff] }
 0x438   : > { %v3453_v17 = vpop.f32.mrb[86].mxu1  ;;  %v10912_v38 = vpop.f32.mrb[232].mxu0 }
 0x439   : > { %v10915_v37 = vadd.f32 %v3453_v17, %v10775_v27  ;;  %v8334_v36 = vpop.f32.mrb[87].mxu1  ;;  %8569 = vmatmul.mubr.msk.f32.gmra.mrb[192].mxu1 %vm1261_vm5, %v4191_v49  ;;  %v8626_v28 = vpop.f32.mrb[233].mxu0 }
 0x43a   : > { %8571 = vmatprep.mubr.msk.f32.mxu1 %vm9220_vm1, %v9221_v6 }
 0x43c   : > { %v3458_v61 = vpop.f32.mrb[88].mxu1  ;;  %v4598_v43 = vpop.f32.mrb[234].mxu0 }
 0x43d   : > { %v10921_v47 = vadd.f32 %v3458_v61, %v10781_v3  ;;  %v8337_v59 = vpop.f32.mrb[89].mxu1  ;;  %8572 = vmatmul.mubr.msk.f32.gmra.mrb[194].mxu1 %vm1261_vm5, %v4192_v46  ;;  %v8629_v54 = vpop.f32.mrb[235].mxu0 }
 0x43e   : > { %8574 = vmatprep.mubr.msk.f32.mxu1 %vm9220_vm1, %v9221_v6 }
 0x440   : > { %v3463_v27 = vpop.f32.mrb[90].mxu1 }
 0x441   : > { %v10927_v17 = vadd.f32 %v3463_v27, %v10795_v45  ;;  %v8340_v49 = vpop.f32.mrb[91].mxu1  ;;  %8575 = vmatmul.mubr.msk.f32.gmra.mrb[196].mxu1 %vm1261_vm5, %v4193_v29 }
 0x442   : > { %8638 = vmatprep.mubr.msk.f32.mxu1 %vm9220_vm1, %v9221_v6 }
 0x444   : > { %v3468_v3 = vpop.f32.mrb[92].mxu1 }
 0x445   : > { %v10933_v36 = vadd.f32 %v3468_v3, %v10809_v1  ;;  %v8343_v28 = vpop.f32.mrb[93].mxu1  ;;  %8639 = vmatmul.mubr.msk.f32.vlgmr.msra.gmra.mrb[198].mxu1 %vm1261_vm5, %v10540_v26 }
 0x446   : > { %8641 = vmatprep.mubr.msk.f32.mxu1 %vm9220_vm1, %v9221_v6 }
 0x448   : > { %v3473_v61 = vpop.f32.mrb[94].mxu1 }
 0x449   : > { %v10940_v45 = vadd.f32 %v3473_v61, %v10819_v31  ;;  %v8346_v46 = vpop.f32.mrb[95].mxu1  ;;  %8642 = vmatmul.mubr.msk.f32.gmra.mrb[200].mxu1 %vm1261_vm5, %v10549_v32 }
 0x44a   : > { %8644 = vmatprep.mubr.msk.f32.mxu1 %vm9220_vm1, %v9221_v6 }
 0x44c   : > { %v3478_v1 = vpop.f32.mrb[96].mxu1 }
 0x44d   : > { %v10947_v43 = vadd.f32 %v3478_v1, %v10828_v55  ;;  %v8349_v59 = vpop.f32.mrb[97].mxu1  ;;  %8645 = vmatmul.mubr.msk.f32.gmra.mrb[202].mxu1 %vm1261_vm5, %v10562_v4 }
 0x44e   : > { %8647 = vmatprep.mubr.msk.f32.mxu1 %vm9220_vm1, %v9221_v6  ;;  %v4629_v59 = vld [vmem:[#allocation3 + $0x7a] sm:$0xff] }
 0x450   : > { %v3483_v26 = vpop.f32.mrb[98].mxu1 }
 0x451   : > { %v10954_v31 = vadd.f32 %v3483_v26, %v10837_v42  ;;  %v8352_v54 = vpop.f32.mrb[99].mxu1  ;;  %8648 = vmatmul.mubr.msk.f32.gmra.mrb[204].mxu1 %vm1261_vm5, %v10573_v56 }
 0x452   : > { %8650 = vmatprep.mubr.msk.f32.mxu1 %vm9220_vm1, %v9221_v6  ;;  %v4630_v54 = vld [vmem:[#allocation3 + $0x82] sm:$0xff] }
 0x454   : > { %v3488_v32 = vpop.f32.mrb[100].mxu1 }
 0x455   : > { %v10961_v55 = vadd.f32 %v3488_v32, %v10846_v19  ;;  %v8355_v27 = vpop.f32.mrb[101].mxu1  ;;  %8651 = vmatmul.mubr.msk.f32.gmra.mrb[206].mxu1 %vm1261_vm5, %v10579_v11 }
 0x456   : > { %8653 = vmatprep.mubr.msk.f32.mxu1 %vm9220_vm1, %v9221_v6  ;;  %v4631_v27 = vld [vmem:[#allocation3 + $0x8a] sm:$0xff] }
 0x458   : > { %v3493_v4 = vpop.f32.mrb[102].mxu1 }
 0x459   : > { %v10968_v42 = vadd.f32 %v3493_v4, %v10855_v53  ;;  %v8358_v29 = vpop.f32.mrb[103].mxu1  ;;  %8654 = vmatmul.mubr.msk.f32.gmra.mrb[208].mxu1 %vm1261_vm5, %v10585_v15 }
 0x45a   : > { %8656 = vmatprep.mubr.msk.f32.mxu1 %vm9220_vm1, %v9221_v6 }
 0x45c   : > { %v3498_v56 = vpop.f32.mrb[104].mxu1 }
 0x45d   : > { %v10975_v19 = vadd.f32 %v3498_v56, %v10864_v57  ;;  %v8361_v49 = vpop.f32.mrb[105].mxu1  ;;  %8657 = vmatmul.mubr.msk.f32.gmra.mrb[210].mxu1 %vm1261_vm5, %v10591_v20 }
 0x45e   : > { %8659 = vmatprep.mubr.msk.f32.mxu1 %vm9220_vm1, %v9221_v6 }
 0x460   : > { %v3503_v11 = vpop.f32.mrb[106].mxu1 }
 0x461   : > { %v8364_v53 = vpop.f32.mrb[107].mxu1  ;;  %8660 = vmatmul.mubr.msk.f32.gmra.mrb[212].mxu1 %vm1261_vm5, %v10597_v22 }
 0x462   : > { %8662 = vmatprep.mubr.msk.f32.mxu1 %vm9220_vm1, %v9221_v6 }
 0x464   : > { %v3652_v15 = vpop.f32.mrb[108].mxu1 }
 0x465   : > { %v3726_v3 = vadd.f32 %v3652_v15, %v10879_v39  ;;  %v8375_v57 = vpop.f32.mrb[109].mxu1  ;;  %8663 = vmatmul.mubr.msk.f32.gmra.mrb[214].mxu1 %vm1261_vm5, %v10603_v48 }
 0x466   : > { %8665 = vmatprep.mubr.msk.f32.mxu1 %vm9220_vm1, %v9221_v6 }
 0x468   : > { %v3657_v20 = vpop.f32.mrb[110].mxu1 }
 0x469   : > { %v3727_v28 = vadd.f32 %v3657_v20, %v10888_v23  ;;  %v8378_v61 = vpop.f32.mrb[111].mxu1  ;;  %8666 = vmatmul.mubr.msk.f32.gmra.mrb[216].mxu1 %vm1261_vm5, %v10613_v62 }
 0x46a   : > { %8668 = vmatprep.mubr.msk.f32.mxu1 %vm9220_vm1, %v9221_v6 }
 0x46c   : > { %v3662_v22 = vpop.f32.mrb[112].mxu1 }
 0x46d   : > { %v3728_v39 = vadd.f32 %v3662_v22, %v10897_v52  ;;  %v8381_v46 = vpop.f32.mrb[113].mxu1  ;;  %8669 = vmatmul.mubr.msk.f32.gmra.mrb[218].mxu1 %vm1261_vm5, %v10621_v14 }
 0x46e   : > { %8671 = vmatprep.mubr.msk.f32.mxu1 %vm9220_vm1, %v9221_v6 }
 0x470   : > { %v3667_v48 = vpop.f32.mrb[114].mxu1 }
 0x471   : > { %v3729_v23 = vadd.f32 %v3667_v48, %v10906_v40  ;;  %v8384_v1 = vpop.f32.mrb[115].mxu1  ;;  %8672 = vmatmul.mubr.msk.f32.gmra.mrb[220].mxu1 %vm1261_vm5, %v10633_v33 }
 0x472   : > { %8674 = vmatprep.mubr.msk.f32.mxu1 %vm9220_vm1, %v9221_v6 }
 0x474   : > { %v3672_v62 = vpop.f32.mrb[116].mxu1 }
 0x475   : > { %v3730_v52 = vadd.f32 %v3672_v62, %v10915_v37  ;;  %v8387_v26 = vpop.f32.mrb[117].mxu1  ;;  %8675 = vmatmul.mubr.msk.f32.gmra.mrb[222].mxu1 %vm1261_vm5, %v4629_v59 }
 0x476   : > { %8677 = vmatprep.mubr.msk.f32.mxu1 %vm9220_vm1, %v9221_v6 }
 0x478   : > { %v3677_v14 = vpop.f32.mrb[118].mxu1 }
 0x479   : > { %v3731_v40 = vadd.f32 %v3677_v14, %v10921_v47  ;;  %v8390_v32 = vpop.f32.mrb[119].mxu1  ;;  %8678 = vmatmul.mubr.msk.f32.gmra.mrb[224].mxu1 %vm1261_vm5, %v4630_v54 }
 0x47a   : > { %8680 = vmatprep.mubr.msk.f32.mxu1 %vm9220_vm1, %v9221_v6 }
 0x47c   : > { %v3682_v33 = vpop.f32.mrb[120].mxu1 }
 0x47d   : > { %v3732_v37 = vadd.f32 %v3682_v33, %v10927_v17  ;;  %v8393_v4 = vpop.f32.mrb[121].mxu1  ;;  %8681 = vmatmul.mubr.msk.f32.gmra.mrb[226].mxu1 %vm1261_vm5, %v4631_v27 }
 0x47e   : > { %5286 = vmatprep.mubr.f32.mxu1 %v9221_v6 }
 0x480   : > { %v3687_v29 = vpop.f32.mrb[122].mxu1 }
 0x481   : > { %v3733_v56 = vadd.f32 %v3687_v29, %v10933_v36  ;;  %v8396_v49 = vpop.f32.mrb[123].mxu1 }
 0x484   : > { %v3692_v47 = vpop.f32.mrb[124].mxu1 }
 0x485   : > { %v3734_v11 = vadd.f32 %v3692_v47, %v10940_v45  ;;  %v8399_v53 = vpop.f32.mrb[125].mxu1 }
 0x488   : > { %v3697_v15 = vpop.f32.mrb[126].mxu1 }
 0x489   : > { %v3735_v57 = vadd.f32 %v3697_v15, %v10947_v43  ;;  %v8402_v20 = vpop.f32.mrb[127].mxu1 }
 0x48c   : > { %v3702_v61 = vpop.f32.mrb[128].mxu1 }
 0x48d   : > { %v3736_v17 = vadd.f32 %v3702_v61, %v10954_v31  ;;  %v8405_v22 = vpop.f32.mrb[129].mxu1 }
 0x490   : > { %v3707_v46 = vpop.f32.mrb[130].mxu1 }
 0x491   : > { %v3737_v48 = vadd.f32 %v3707_v46, %v10961_v55  ;;  %v8408_v1 = vpop.f32.mrb[131].mxu1 }
 0x494   : > { %v3712_v62 = vpop.f32.mrb[132].mxu1 }
 0x495   : > { %v3738_v36 = vadd.f32 %v3712_v62, %v10968_v42  ;;  %v8411_v59 = vpop.f32.mrb[133].mxu1 }
 0x498   : > { %v3717_v26 = vpop.f32.mrb[134].mxu1 }
 0x499   : > { %v3739_v45 = vadd.f32 %v3717_v26, %v10975_v19  ;;  %v8414_v14 = vpop.f32.mrb[135].mxu1 }
 0x49c   : > { %v3722_v54 = vpop.f32.mrb[136].mxu1 }
 0x49d   : > { %v8417_v32 = vpop.f32.mrb[137].mxu1 }
 0x4a0   : > { %v3871_v43 = vpop.f32.mrb[138].mxu1 }
 0x4a1   : > { %v3945_v33 = vadd.f32 %v3871_v43, %v3726_v3  ;;  %v8428_v27 = vpop.f32.mrb[139].mxu1 }
 0x4a3   : > { %v11024_v31 = vadd.f32 %v10393_v0, %v3945_v33 }
 0x4a4   : > { %v3876_v4 = vpop.f32.mrb[140].mxu1 }
 0x4a5   : > { %v3946_v29 = vadd.f32 %v3876_v4, %v3727_v28  ;;  %v8431_v55 = vpop.f32.mrb[141].mxu1 }
 0x4a7   : > { %v11027_v49 = vadd.f32 %v10405_v24, %v3946_v29 }
 0x4a8   : > { %v3881_v42 = vpop.f32.mrb[142].mxu1 }
 0x4a9   : > { %v3947_v47 = vadd.f32 %v3881_v42, %v3728_v39  ;;  %v8434_v53 = vpop.f32.mrb[143].mxu1 }
 0x4ab   : > { %v11030_v19 = vadd.f32 %v10421_v30, %v3947_v47 }
 0x4ac   : > { %v3886_v15 = vpop.f32.mrb[144].mxu1 }
 0x4ad   : > { %v3948_v20 = vadd.f32 %v3886_v15, %v3729_v23  ;;  %v8437_v61 = vpop.f32.mrb[145].mxu1 }
 0x4af   : > { %v11033_v3 = vadd.f32 %v10433_v12, %v3948_v20 }
 0x4b0   : > { %v3891_v0 = vpop.f32.mrb[146].mxu1 }
 0x4b1   : > { %v3949_v22 = vadd.f32 %v3891_v0, %v3730_v52  ;;  %v8440_v46 = vpop.f32.mrb[147].mxu1  ;;  %v5208_v0 = vld [vmem:[%s12237_s5 + $0x128] sm:$0xff] }
 0x4b3   : > { %v11036_v28 = vadd.f32 %v10483_v10, %v3949_v22  ;;  %v5210_v22 = vld [vmem:[%s12237_s5 + $0x138] sm:$0xff] }
 0x4b4   : > { %v3896_v24 = vpop.f32.mrb[148].mxu1 }
 0x4b5   : > { %v3950_v1 = vadd.f32 %v3896_v24, %v3731_v40  ;;  %v8443_v62 = vpop.f32.mrb[149].mxu1 }
 0x4b6   : > { %v5207_v62 = vld [vmem:[%s12237_s5 + $0x120] sm:$0xff] }
 0x4b7   : > { %v11039_v39 = vadd.f32 %v10553_v60, %v3950_v1  ;;  %v8848_v1 = vpack.c.bf16 %v5210_v22, %v5208_v0 }
 0x4b8   : > { %v3901_v30 = vpop.f32.mrb[150].mxu1 }
 0x4b9   : > { %v3951_v59 = vadd.f32 %v3901_v30, %v3732_v37  ;;  %v8446_v26 = vpop.f32.mrb[151].mxu1  ;;  %v5209_v30 = vld [vmem:[%s12237_s5 + $0x130] sm:$0xff] }
 0x4ba   : > { %v5214_v26 = vld [vmem:[%s12237_s5 + $0x158] sm:$0xff] }
 0x4bb   : > { %v11042_v23 = vadd.f32 %v10564_v5, %v3951_v59  ;;  %v5212_v59 = vld [vmem:[%s12237_s5 + $0x148] sm:$0xff] }
 0x4bc   : > { %v3906_v12 = vpop.f32.mrb[152].mxu1 }
 0x4bd   : > { %v3952_v14 = vadd.f32 %v3906_v12, %v3733_v56  ;;  %v8449_v54 = vpop.f32.mrb[153].mxu1  ;;  %v8850_v12 = vpack.c.bf16 %v5209_v30, %v5207_v62 }
 0x4be   : > { %v8852_v54 = vpack.c.bf16 %v5214_v26, %v5212_v59 }
 0x4bf   : > { %v11045_v52 = vadd.f32 %v10607_v25, %v3952_v14 }
 0x4c0   : > { %v3911_v10 = vpop.f32.mrb[154].mxu1 }
 0x4c1   : > { %v3953_v32 = vadd.f32 %v3911_v10, %v3734_v11  ;;  %v8452_v43 = vpop.f32.mrb[155].mxu1  ;;  %v5211_v10 = vld [vmem:[%s12237_s5 + $0x140] sm:$0xff] }
 0x4c3   : > { %v11048_v40 = vadd.f32 %v10655_v58, %v3953_v32  ;;  %v5213_v32 = vld [vmem:[%s12237_s5 + $0x150] sm:$0xff] }
 0x4c4   : > { %v3916_v60 = vpop.f32.mrb[156].mxu1 }
 0x4c5   : > { %v3954_v33 = vadd.f32 %v3916_v60, %v3735_v57  ;;  %v8455_v27 = vpop.f32.mrb[157].mxu1 }
 0x4c6   : > { %v5218_v27 = vld [vmem:[%s12237_s5 + $0x178] sm:$0xff] }
 0x4c7   : > { %v11051_v37 = vadd.f32 %v10660_v9, %v3954_v33  ;;  %v5216_v33 = vld [vmem:[%s12237_s5 + $0x168] sm:$0xff] }
 0x4c8   : > { %v3921_v5 = vpop.f32.mrb[158].mxu1 }
 0x4c9   : > { %v3955_v4 = vadd.f32 %v3921_v5, %v3736_v17  ;;  %v8458_v29 = vpop.f32.mrb[159].mxu1  ;;  %v12255_v17 = vld [vmem:[#allocation10_spill] sm:$0xff]  ;;  %v12256_v5 = vld [vmem:[#allocation11_spill] sm:$0xff] }
 0x4ca   : > { %v8854_v29 = vpack.c.bf16 %v5213_v32, %v5211_v10 }
 0x4cb   : > { %v11054_v56 = vadd.f32 %v10682_v34, %v3955_v4  ;;  %v5204_v34 = vld [vmem:[%s12237_s5 + $0x108] sm:$0xff] }
 0x4cc   : > { %v3926_v25 = vpop.f32.mrb[160].mxu1 }
 0x4cd   : > { %v3956_v55 = vadd.f32 %v3926_v25, %v3737_v48  ;;  %v8461_v42 = vpop.f32.mrb[161].mxu1  ;;  %v5203_v48 = vld [vmem:[%s12237_s5 + $0x100] sm:$0xff] }
 0x4ce   : > { %v5217_v42 = vld [vmem:[%s12237_s5 + $0x170] sm:$0xff] }
 0x4cf   : > { %v11057_v11 = vadd.f32 %v10718_v16, %v3956_v55  ;;  %v5206_v16 = vld [vmem:[%s12237_s5 + $0x118] sm:$0xff]  ;;  %v8856_v55 = vpack.c.bf16 %v5218_v27, %v5216_v33 }
 0x4d0   : > { %v3931_v58 = vpop.f32.mrb[162].mxu1 }
 0x4d1   : > { %v3957_v47 = vadd.f32 %v3931_v58, %v3738_v36  ;;  %v8464_v53 = vpop.f32.mrb[163].mxu1  ;;  %v8844_v36 = vpack.c.bf16 %v5206_v16, %v5204_v34 }
 0x4d2   : > { %v12257_v53 = vld [vmem:[#allocation12_spill] sm:$0xff] }
 0x4d3   : > { %v11060_v57 = vadd.f32 %v10724_v18, %v3957_v47  ;;  %8845 = vmatprep.subr.bf16.mxu1 %v8844_v36 }
 0x4d4   : > { %v3936_v9 = vpop.f32.mrb[164].mxu1 }
 0x4d5   : > { %v3958_v15 = vadd.f32 %v3936_v9, %v3739_v45  ;;  %v8467_v20 = vpop.f32.mrb[165].mxu1  ;;  %v5205_v45 = vld [vmem:[%s12237_s5 + $0x110] sm:$0xff] }
 0x4d6   : > { %v8846_v24 = vpack.c.bf16 %v5205_v45, %v5203_v48 }
 0x4d7   : > { %v11063_v61 = vadd.f32 %v12255_v17, %v3958_v15 }
 0x4d8   : > { %v3941_v18 = vpop.f32.mrb[166].mxu1  ;;  %8847 = vmatpush1.bf16.msra.mxu1 %v8846_v24 }
 0x4d9   : > { %v8470_v46 = vpop.f32.mrb[167].mxu1  ;;  %8849 = vmatprep.subr.bf16.mxu1 %v8848_v1 }
 0x4dc   : > { %v4309_v14 = vpop.f32.mrb[168].mxu1  ;;  %8851 = vmatpush1.bf16.msra.mxu1 %v8850_v12 }
 0x4dd   : > { %v4383_v43 = vadd.f32 %v4309_v14, %v11024_v31  ;;  %v8534_v60 = vpop.f32.mrb[169].mxu1  ;;  %8853 = vmatprep.subr.bf16.mxu1 %v8852_v54  ;;  %v5215_v31 = vld [vmem:[%s12237_s5 + $0x160] sm:$0xff] }
 0x4de   : > { %v8858_v15 = vpack.c.bf16 %v5217_v42, %v5215_v31 }
 0x4df   : > { %v11109_v4 = vadd.f32 %v12256_v5, %v4383_v43 }
 0x4e0   : > { %v4314_v25 = vpop.f32.mrb[170].mxu1  ;;  %8855 = vmatpush1.bf16.msra.mxu1 %v8854_v29 }
 0x4e1   : > { %v4384_v58 = vadd.f32 %v4314_v25, %v11027_v49  ;;  %v8537_v47 = vpop.f32.mrb[171].mxu1  ;;  %8857 = vmatprep.subr.bf16.mxu1 %v8856_v55 }
 0x4e3   : > { %v11119_v9 = vadd.f32 %v12257_v53, %v4384_v58 }
 0x4e4   : > { %v4319_v20 = vpop.f32.mrb[172].mxu1  ;;  %8859 = vmatpush1.bf16.msra.mxu1 %v8858_v15 }
 0x4e5   : > { %v4385_v17 = vadd.f32 %v4319_v20, %v11030_v19  ;;  %v8540_v34 = vpop.f32.mrb[173].mxu1  ;;  %8688 = vmatprep.subr.mxu1 %v9221_v6 }
 0x4e7   : > { %v11123_v16 = vadd.f32 %v10816_v51, %v4385_v17 }
 0x4e8   : > { %v4324_v48 = vpop.f32.mrb[174].mxu1 }
 0x4e9   : > { %v4386_v49 = vadd.f32 %v4324_v48, %v11033_v3  ;;  %v8543_v18 = vpop.f32.mrb[175].mxu1 }
 0x4eb   : > { %v11128_v36 = vadd.f32 %v10825_v13, %v4386_v49 }
 0x4ec   : > { %v4329_v45 = vpop.f32.mrb[176].mxu1 }
 0x4ed   : > { %v4387_v0 = vadd.f32 %v4329_v45, %v11036_v28  ;;  %v8546_v22 = vpop.f32.mrb[177].mxu1 }
 0x4ef   : > { %v11132_v19 = vadd.f32 %v10834_v50, %v4387_v0 }
 0x4f0   : > { %v4334_v46 = vpop.f32.mrb[178].mxu1 }
 0x4f1   : > { %v4388_v51 = vadd.f32 %v4334_v46, %v11039_v39  ;;  %v8549_v24 = vpop.f32.mrb[179].mxu1 }
 0x4f3   : > { %v11136_v1 = vadd.f32 %v10843_v21, %v4388_v51 }
 0x4f4   : > { %v4339_v62 = vpop.f32.mrb[180].mxu1 }
 0x4f5   : > { %v4389_v3 = vadd.f32 %v4339_v62, %v11042_v23  ;;  %v8552_v30 = vpop.f32.mrb[181].mxu1 }
 0x4f7   : > { %v11140_v13 = vadd.f32 %v10852_v44, %v4389_v3 }
 0x4f8   : > { %v4344_v59 = vpop.f32.mrb[182].mxu1 }
 0x4f9   : > { %v4390_v28 = vadd.f32 %v4344_v59, %v11045_v52  ;;  %v8555_v26 = vpop.f32.mrb[183].mxu1 }
 0x4fb   : > { %v11144_v50 = vadd.f32 %v10861_v63, %v4390_v28 }
 0x4fc   : > { %v4349_v12 = vpop.f32.mrb[184].mxu1 }
 0x4fd   : > { %v4391_v39 = vadd.f32 %v4349_v12, %v11048_v40  ;;  %v8558_v14 = vpop.f32.mrb[185].mxu1 }
 0x4ff   : > { %v11148_v21 = vadd.f32 %v10870_v35, %v4391_v39 }
 0x500   : > { %v4354_v54 = vpop.f32.mrb[186].mxu1 }
 0x501   : > { %v4392_v23 = vadd.f32 %v4354_v54, %v11051_v37  ;;  %v8561_v10 = vpop.f32.mrb[187].mxu1 }
 0x503   : > { %v11152_v44 = vadd.f32 %v10876_v2, %v4392_v23 }
 0x504   : > { %v4359_v32 = vpop.f32.mrb[188].mxu1 }
 0x505   : > { %v4393_v52 = vadd.f32 %v4359_v32, %v11054_v56  ;;  %v8564_v43 = vpop.f32.mrb[189].mxu1 }
 0x507   : > { %v11156_v63 = vadd.f32 %v10885_v7, %v4393_v52 }
 0x508   : > { %v4364_v60 = vpop.f32.mrb[190].mxu1 }
 0x509   : > { %v4394_v40 = vadd.f32 %v4364_v60, %v11057_v11  ;;  %v8567_v33 = vpop.f32.mrb[191].mxu1 }
 0x50b   : > { %v11160_v35 = vadd.f32 %v10894_v8, %v4394_v40  ;;  %v11173_v8 = vld [vmem:[%s12236_s4] ss:$0 sm:$0xff] }
 0x50c   : > { %v4369_v27 = vpop.f32.mrb[192].mxu1 }
 0x50d   : > { %v4395_v37 = vadd.f32 %v4369_v27, %v11060_v57  ;;  %v8570_v5 = vpop.f32.mrb[193].mxu1 }
 0x50f   : > { %v11164_v2 = vadd.f32 %v10903_v41, %v4395_v37 }
 0x510   : > { %v4374_v29 = vpop.f32.mrb[194].mxu1 }
 0x511   : > { %v4396_v56 = vadd.f32 %v4374_v29, %v11063_v61  ;;  %v8573_v25 = vpop.f32.mrb[195].mxu1 }
 0x513   : > { %v11168_v7 = vadd.f32 %v10912_v38, %v4396_v56 }
 0x514   : > { %v4379_v55 = vpop.f32.mrb[196].mxu1 }
 0x515   : > { %v8576_v11 = vpop.f32.mrb[197].mxu1 }
 0x518   : > { %v4747_v31 = vpop.f32.mrb[198].mxu1 }
 0x519   : > { %v4821_v57 = vadd.f32 %v4747_v31, %v11109_v4  ;;  %v8640_v42 = vpop.f32.mrb[199].mxu1 }
 0x51b   : > { %v4843_v41 = vadd.f32 %v11173_v8, %v4821_v57 }
 0x51c   : > { %v4752_v58 = vpop.f32.mrb[200].mxu1 }
 0x51d   : > { %v4858_v61 = vmax.f32 %v4843_v41, 0.0  ;;  %v4822_v47 = vadd.f32 %v4752_v58, %v11119_v9  ;;  %v8643_v38 = vpop.f32.mrb[201].mxu1 }
 0x51f   : > { %4874 = vst.msk [vmem:[#allocation4] sm:$0xff] %vm4873_vm12, %v4858_v61  ;;  %v4844_v53 = vadd.f32 %v11173_v8, %v4822_v47 }
 0x520   : > { %v4757_v15 = vpop.f32.mrb[202].mxu1 }
 0x521   : > { %v4859_v20 = vmax.f32 %v4844_v53, 0.0  ;;  %v4823_v17 = vadd.f32 %v4757_v15, %v11123_v16  ;;  %v8646_v34 = vpop.f32.mrb[203].mxu1 }
 0x523   : > { %4875 = vst.msk [vmem:[#allocation4 + $0x8] sm:$0xff] %vm4873_vm12, %v4859_v20  ;;  %v4845_v4 = vadd.f32 %v11173_v8, %v4823_v17 }
 0x524   : > { %v4762_v48 = vpop.f32.mrb[204].mxu1 }
 0x525   : > { %v4860_v49 = vmax.f32 %v4845_v4, 0.0  ;;  %v4824_v18 = vadd.f32 %v4762_v48, %v11128_v36  ;;  %v8649_v45 = vpop.f32.mrb[205].mxu1 }
 0x526   : > { %v4890_v39 = vld [vmem:[#allocation4] sm:$0xff] }
 0x527   : > { %4876 = vst.msk [vmem:[#allocation4 + $0x10] sm:$0xff] %vm4873_vm12, %v4860_v49  ;;  %v4846_v9 = vadd.f32 %v11173_v8, %v4824_v18 }
 0x528   : > { %v4767_v0 = vpop.f32.mrb[206].mxu1 }
 0x529   : > { %v4861_v22 = vmax.f32 %v4846_v9, 0.0  ;;  %v4825_v46 = vadd.f32 %v4767_v0, %v11132_v19  ;;  %v8652_v51 = vpop.f32.mrb[207].mxu1 }
 0x52a   : > { %v4891_v32 = vld [vmem:[#allocation4 + $0x8] sm:$0xf] }
 0x52b   : > { %4877 = vst.msk [vmem:[#allocation4 + $0x18] sm:$0xff] %vm4873_vm12, %v4861_v22  ;;  %v4847_v16 = vadd.f32 %v11173_v8, %v4825_v46 }
 0x52c   : > { %v4772_v24 = vpop.f32.mrb[208].mxu1 }
 0x52d   : > { %v4862_v62 = vmax.f32 %v4847_v16, 0.0  ;;  %v4826_v3 = vadd.f32 %v4772_v24, %v11136_v1  ;;  %v8655_v30 = vpop.f32.mrb[209].mxu1 }
 0x52e   : > { %v4892_v59 = vld [vmem:[#allocation4 + $0xc] sm:$0xff]  ;;  %v4893_v14 = vld [vmem:[#allocation4 + $0x14] sm:$0xf] }
 0x52f   : > { %4878 = vst.msk [vmem:[#allocation4 + $0x20] sm:$0xff] %vm4873_vm12, %v4862_v62  ;;  %v4848_v36 = vadd.f32 %v11173_v8, %v4826_v3  ;;  %v4896_v23 = vmax.f32 %v4890_v39, %v4892_v59  ;;  %v4897_v33 = vmax.f32 %v4891_v32, %v4893_v14 }
 0x530   : > { %v4777_v28 = vpop.f32.mrb[210].mxu1 }
 0x531   : > { %v4863_v26 = vmax.f32 %v4848_v36, 0.0  ;;  %v4827_v12 = vadd.f32 %v4777_v28, %v11140_v13  ;;  %v8658_v19 = vpop.f32.mrb[211].mxu1 }
 0x532   : > { %v4894_v54 = vld [vmem:[#allocation4 + $0x18] sm:$0xff] }
 0x533   : > { %4879 = vst.msk [vmem:[#allocation4 + $0x28] sm:$0xff] %vm4873_vm12, %v4863_v26  ;;  %v4849_v10 = vadd.f32 %v11173_v8, %v4827_v12  ;;  %v4898_v52 = vmax.f32 %v4896_v23, %v4894_v54 }
 0x534   : > { %v4782_v1 = vpop.f32.mrb[212].mxu1 }
 0x535   : > { %v4864_v43 = vmax.f32 %v4849_v10, 0.0  ;;  %v4828_v60 = vadd.f32 %v4782_v1, %v11144_v50  ;;  %v8661_v40 = vpop.f32.mrb[213].mxu1  ;;  %v4902_v29 = vrot.slane %v4898_v52, 1  ;;  %v4907_v42 = vrot.slane %v4898_v52, 2 }
 0x536   : > { %v4895_v27 = vld [vmem:[#allocation4 + $0x20] sm:$0xf] }
 0x537   : > { %4880 = vst.msk [vmem:[#allocation4 + $0x30] sm:$0xff] %vm4873_vm12, %v4864_v43  ;;  %v4850_v13 = vadd.f32 %v11173_v8, %v4828_v60  ;;  %v4899_v37 = vmax.f32 %v4897_v33, %v4895_v27 }
 0x538   : > { %v4787_v5 = vpop.f32.mrb[214].mxu1 }
 0x539   : > { %v4865_v56 = vmax.f32 %v4850_v13, 0.0  ;;  %v4829_v25 = vadd.f32 %v4787_v5, %v11148_v21  ;;  %v8664_v55 = vpop.f32.mrb[215].mxu1  ;;  %v4903_v11 = vrot.slane %v4899_v37, 1  ;;  %v4908_v31 = vrot.slane %v4899_v37, 2 }
 0x53a   : > { %v5421_v41 = vld [vmem:[#allocation4 + $0x24] sm:$0xff]  ;;  %v5422_v20 = vld [vmem:[#allocation4 + $0x2c] sm:$0xf] }
 0x53b   : > { %4881 = vst.msk [vmem:[#allocation4 + $0x38] sm:$0xff] %vm4873_vm12, %v4865_v56  ;;  %v4851_v50 = vadd.f32 %v11173_v8, %v4829_v25  ;;  %v4904_v57 = vsel %vm1386_vm8, %v4902_v29, %v4903_v11  ;;  %v4909_v15 = vsel %vm1400_vm9, %v4907_v42, %v4908_v31  ;;  %v5425_v34 = vmax.f32 %v4894_v54, %v5421_v41 }
 0x53c   : > { %v4792_v58 = vpop.f32.mrb[216].mxu1  ;;  %v4906_v61 = vmax.f32 %v4898_v52, %v4904_v57  ;;  %v5426_v0 = vmax.f32 %v4895_v27, %v5422_v20 }
 0x53d   : > { %v4866_v47 = vmax.f32 %v4851_v50, 0.0  ;;  %v4830_v38 = vadd.f32 %v4792_v58, %v11152_v44  ;;  %v8667_v53 = vpop.f32.mrb[217].mxu1  ;;  %v12258_v44 = vld [vmem:[#allocation9_spill] sm:$0xff] }
 0x53e   : > { %v4911_v21 = vmax.f32 %v4906_v61, %v4909_v15  ;;  %v5423_v17 = vld [vmem:[#allocation4 + $0x30] sm:$0xff] }
 0x53f   : > { %4882 = vst.msk [vmem:[#allocation4 + $0x40] sm:$0xff] %vm4873_vm12, %v4866_v47  ;;  %v4852_v4 = vadd.f32 %v11173_v8, %v4830_v38  ;;  %v5427_v49 = vmax.f32 %v5425_v34, %v5423_v17 }
 0x540   : > { %v4797_v48 = vpop.f32.mrb[218].mxu1  ;;  %8684 = vmatpush3.msra.mxu0 %v4911_v21 }
 0x541   : > { %v4867_v18 = vmax.f32 %v4852_v4, 0.0  ;;  %v4831_v45 = vadd.f32 %v4797_v48, %v11156_v63  ;;  %v8670_v9 = vpop.f32.mrb[219].mxu1  ;;  %8686 = vmatmul.mubr.msk.f32.vlgmr.msra.gmra.mrb[236].mxu0 %vm4912_vm13, %v12258_v44  ;;  %v5431_v24 = vrot.slane %v5427_v49, 1  ;;  %v5436_v62 = vrot.slane %v5427_v49, 2 }
 0x542   : > { %v5424_v22 = vld [vmem:[#allocation4 + $0x38] sm:$0xf]  ;;  %5068 = vmatprep.mubr.f32.mxu0 %v9221_v6 }
 0x543   : > { %4883 = vst.msk [vmem:[#allocation4 + $0x48] sm:$0xff] %vm4873_vm12, %v4867_v18  ;;  %v4853_v46 = vadd.f32 %v11173_v8, %v4831_v45  ;;  %v5428_v51 = vmax.f32 %v5426_v0, %v5424_v22  ;;  %v4986_v0 = vld [vmem:[%s12237_s5 + $0x8] sm:$0xff] }
 0x544   : > { %v4802_v16 = vpop.f32.mrb[220].mxu1 }
 0x545   : > { %v4868_v3 = vmax.f32 %v4853_v46, 0.0  ;;  %v4832_v30 = vadd.f32 %v4802_v16, %v11160_v35  ;;  %v8673_v63 = vpop.f32.mrb[221].mxu1  ;;  %v5432_v36 = vrot.slane %v5428_v51, 1  ;;  %v5437_v59 = vrot.slane %v5428_v51, 2  ;;  %v4985_v51 = vld [vmem:[%s12237_s5] sm:$0xff]  ;;  %v4987_v16 = vld [vmem:[%s12237_s5 + $0x10] sm:$0xff] }
 0x546   : > { %v5947_v19 = vld [vmem:[#allocation4 + $0x3c] sm:$0xff]  ;;  %v5948_v35 = vld [vmem:[#allocation4 + $0x44] sm:$0xf] }
 0x547   : > { %4884 = vst.msk [vmem:[#allocation4 + $0x50] sm:$0xff] %vm4873_vm12, %v4868_v3  ;;  %v4854_v28 = vadd.f32 %v11173_v8, %v4832_v30  ;;  %v5433_v26 = vsel %vm1386_vm8, %v5431_v24, %v5432_v36  ;;  %v5438_v12 = vsel %vm1400_vm9, %v5436_v62, %v5437_v59  ;;  %v5951_v52 = vmax.f32 %v5423_v17, %v5947_v19  ;;  %v4990_v62 = vld [vmem:[%s12237_s5 + $0x28] sm:$0xff]  ;;  %v4992_v3 = vld [vmem:[%s12237_s5 + $0x38] sm:$0xff]  ;;  %v4989_v63 = vld [vmem:[%s12237_s5 + $0x20] sm:$0xff] }
 0x548   : > { %v4807_v39 = vpop.f32.mrb[222].mxu1  ;;  %v5435_v14 = vmax.f32 %v5427_v49, %v5433_v26  ;;  %v5952_v37 = vmax.f32 %v5424_v22, %v5948_v35  ;;  %v4988_v22 = vld [vmem:[%s12237_s5 + $0x18] sm:$0xff]  ;;  %v8814_v24 = vpack.c.bf16 %v4987_v16, %v4985_v51  ;;  %v8816_v30 = vpack.c.bf16 %v4992_v3, %v4990_v62  ;;  %v4991_v36 = vld [vmem:[%s12237_s5 + $0x30] sm:$0xff]  ;;  %v4993_v19 = vld [vmem:[%s12237_s5 + $0x40] sm:$0xff] }
 0x549   : > { %v4869_v54 = vmax.f32 %v4854_v28, 0.0  ;;  %v4833_v23 = vadd.f32 %v4807_v39, %v11164_v2  ;;  %v8676_v10 = vpop.f32.mrb[223].mxu1  ;;  %v8812_v46 = vpack.c.bf16 %v4988_v22, %v4986_v0  ;;  %v8818_v59 = vpack.c.bf16 %v4991_v36, %v4989_v63  ;;  %v4994_v28 = vld [vmem:[%s12237_s5 + $0x48] sm:$0xff]  ;;  %v4996_v26 = vld [vmem:[%s12237_s5 + $0x58] sm:$0xff]  ;;  %v4995_v39 = vld [vmem:[%s12237_s5 + $0x50] sm:$0xff] }
 0x54a   : > { %v11218_v1 = vmax.f32 %v5435_v14, %v5438_v12  ;;  %v5949_v32 = vld [vmem:[#allocation4 + $0x48] sm:$0xff]  ;;  %v8820_v12 = vpack.c.bf16 %v4996_v26, %v4994_v28  ;;  %v8822_v14 = vpack.c.bf16 %v4995_v39, %v4993_v19  ;;  %v4997_v35 = vld [vmem:[%s12237_s5 + $0x60] sm:$0xff]  ;;  %v5315_v16 = vld [vmem:[%s12237_s5 + $0x198] sm:$0xff] }
 0x54b   : > { %4885 = vst.msk [vmem:[#allocation4 + $0x58] sm:$0xff] %vm4873_vm12, %v4869_v54  ;;  %v4855_v43 = vadd.f32 %v11173_v8, %v4833_v23  ;;  %v5953_v40 = vmax.f32 %v5951_v52, %v5949_v32  ;;  %8813 = vmatprep.subr.bf16.mxu0 %v8812_v46  ;;  %v4998_v54 = vld [vmem:[%s12237_s5 + $0x68] sm:$0xff]  ;;  %v5000_v23 = vld [vmem:[%s12237_s5 + $0x78] sm:$0xff]  ;;  %v5106_v22 = vld [vmem:[%s12237_s5 + $0xe0] sm:$0xff] }
 0x54c   : > { %v4812_v60 = vpop.f32.mrb[224].mxu1  ;;  %8815 = vmatpush1.bf16.msra.mxu0 %v8814_v24  ;;  %v8824_v10 = vpack.c.bf16 %v5000_v23, %v4998_v54  ;;  %v5108_v46 = vld [vmem:[%s12237_s5 + $0xf0] sm:$0xff]  ;;  %v5313_v51 = vld [vmem:[%s12237_s5 + $0x188] sm:$0xff]  ;;  %v5519_v3 = vld [vmem:[%s12237_s5 + $0x240] sm:$0xff] }
 0x54d   : > { %v4870_v33 = vmax.f32 %v4855_v43, 0.0  ;;  %v4834_v27 = vadd.f32 %v4812_v60, %v11168_v7  ;;  %v8679_v13 = vpop.f32.mrb[225].mxu1  ;;  %v5957_v25 = vrot.slane %v5953_v40, 1  ;;  %v5962_v55 = vrot.slane %v5953_v40, 2  ;;  %8817 = vmatprep.subr.bf16.mxu0 %v8816_v30  ;;  %v5095_v43 = vld [vmem:[%s12237_s5 + $0x88] sm:$0xff]  ;;  %v5097_v60 = vld [vmem:[%s12237_s5 + $0x98] sm:$0xff] }
 0x54e   : > { %v5950_v5 = vld [vmem:[#allocation4 + $0x50] sm:$0xf]  ;;  %v5099_v13 = vld [vmem:[%s12237_s5 + $0xa8] sm:$0xff]  ;;  %v8842_v63 = vpack.c.bf16 %v5108_v46, %v5106_v22  ;;  %v8860_v28 = vpack.c.bf16 %v5315_v16, %v5313_v51  ;;  %v5312_v26 = vld [vmem:[%s12237_s5 + $0x180] sm:$0xff] }
 0x54f   : > { %4886 = vst.msk [vmem:[#allocation4 + $0x60] sm:$0xff] %vm4873_vm12, %v4870_v33  ;;  %v4856_v2 = vadd.f32 %v11173_v8, %v4834_v27  ;;  %v5954_v29 = vmax.f32 %v5952_v37, %v5950_v5  ;;  %v5094_v33 = vld [vmem:[%s12237_s5 + $0x80] sm:$0xff]  ;;  %v5096_v27 = vld [vmem:[%s12237_s5 + $0x90] sm:$0xff]  ;;  %v5101_v37 = vld [vmem:[%s12237_s5 + $0xb8] sm:$0xff] }
 0x550   : > { %v4817_v56 = vpop.f32.mrb[226].mxu1  ;;  %8819 = vmatpush1.bf16.msra.mxu0 %v8818_v59  ;;  %v5521_v30 = vld [vmem:[%s12237_s5 + $0x250] sm:$0xff]  ;;  %v5524_v36 = vld [vmem:[%s12237_s5 + $0x268] sm:$0xff]  ;;  %v5526_v59 = vld [vmem:[%s12237_s5 + $0x278] sm:$0xff] }
 0x551   : > { %v4871_v11 = vmax.f32 %v4856_v2, 0.0  ;;  %v8682_v31 = vpop.f32.mrb[227].mxu1  ;;  %v5958_v50 = vrot.slane %v5954_v29, 1  ;;  %v5963_v57 = vrot.slane %v5954_v29, 2  ;;  %8821 = vmatprep.subr.bf16.mxu0 %v8820_v12  ;;  %v5512_v2 = vld [vmem:[%s12237_s5 + $0x208] sm:$0xff]  ;;  %v5514_v29 = vld [vmem:[%s12237_s5 + $0x218] sm:$0xff]  ;;  %v8832_v56 = vpack.c.bf16 %v5101_v37, %v5099_v13 }
 0x552   : > { %v6473_v58 = vld [vmem:[#allocation4 + $0x54] sm:$0xff]  ;;  %v6474_v47 = vld [vmem:[#allocation4 + $0x5c] sm:$0xf]  ;;  %v5103_v31 = vld [vmem:[%s12237_s5 + $0xc8] sm:$0xff]  ;;  %v8888_v54 = vpack.c.bf16 %v5526_v59, %v5524_v36 }
 0x553   : > { %4887 = vst.msk [vmem:[#allocation4 + $0x68] sm:$0xff] %vm4873_vm12, %v4871_v11  ;;  %v5959_v42 = vsel %vm1386_vm8, %v5957_v25, %v5958_v50  ;;  %v5964_v7 = vsel %vm1400_vm9, %v5962_v55, %v5963_v57  ;;  %v6477_v38 = vmax.f32 %v5949_v32, %v6473_v58  ;;  %v6478_v53 = vmax.f32 %v5950_v5, %v6474_v47  ;;  %v4999_v32 = vld [vmem:[%s12237_s5 + $0x70] sm:$0xff]  ;;  %v5098_v25 = vld [vmem:[%s12237_s5 + $0xa0] sm:$0xff]  ;;  %v5105_v50 = vld [vmem:[%s12237_s5 + $0xd8] sm:$0xff] }
 0x554   : > { %v5961_v41 = vmax.f32 %v5953_v40, %v5959_v42  ;;  %8823 = vmatpush1.bf16.msra.mxu0 %v8822_v14  ;;  %v8826_v52 = vpack.c.bf16 %v4999_v32, %v4997_v35  ;;  %v8828_v40 = vpack.c.bf16 %v5097_v60, %v5095_v43  ;;  %v8830_v5 = vpack.c.bf16 %v5096_v27, %v5094_v33  ;;  %v5100_v55 = vld [vmem:[%s12237_s5 + $0xb0] sm:$0xff]  ;;  %v5317_v19 = vld [vmem:[%s12237_s5 + $0x1a8] sm:$0xff]  ;;  %v5319_v39 = vld [vmem:[%s12237_s5 + $0x1b8] sm:$0xff] }
 0x555   : > { %8825 = vmatprep.subr.bf16.mxu0 %v8824_v10  ;;  %v5513_v58 = vld [vmem:[%s12237_s5 + $0x210] sm:$0xff]  ;;  %v8834_v47 = vpack.c.bf16 %v5100_v55, %v5098_v25  ;;  %v8886_v14 = vpack.c.bf16 %v5521_v30, %v5519_v3  ;;  %v5523_v23 = vld [vmem:[%s12237_s5 + $0x260] sm:$0xff]  ;;  %v5323_v33 = vld [vmem:[%s12237_s5 + $0x1d8] sm:$0xff] }
 0x556   : > { %v11228_v61 = vmax.f32 %v5961_v41, %v5964_v7  ;;  %v6475_v8 = vld [vmem:[#allocation4 + $0x60] sm:$0xff]  ;;  %v8876_v7 = vpack.c.bf16 %v5514_v29, %v5512_v2  ;;  %v5314_v12 = vld [vmem:[%s12237_s5 + $0x190] sm:$0xff]  ;;  %v5325_v29 = vld [vmem:[%s12237_s5 + $0x1e8] sm:$0xff] }
 0x557   : > { %v6479_v15 = vmax.f32 %v6477_v38, %v6475_v8  ;;  %v5511_v41 = vld [vmem:[%s12237_s5 + $0x200] sm:$0xff]  ;;  %v5516_v8 = vld [vmem:[%s12237_s5 + $0x228] sm:$0xff]  ;;  %v5518_v38 = vld [vmem:[%s12237_s5 + $0x238] sm:$0xff]  ;;  %v8862_v35 = vpack.c.bf16 %v5314_v12, %v5312_v26 }
 0x558   : > { %8827 = vmatpush1.bf16.msra.mxu0 %v8826_v52  ;;  %v5525_v10 = vld [vmem:[%s12237_s5 + $0x270] sm:$0xff]  ;;  %v8864_v52 = vpack.c.bf16 %v5319_v39, %v5317_v19  ;;  %v5316_v43 = vld [vmem:[%s12237_s5 + $0x1a0] sm:$0xff]  ;;  %v5839_v30 = vld [vmem:[%s12237_s5 + $0x388] sm:$0xff]  ;;  %v9223_v19 = vmov 1966171168  }
 0x559   : > { %v6483_v17 = vrot.slane %v6479_v15, 1  ;;  %v6488_v4 = vrot.slane %v6479_v15, 2  ;;  %8829 = vmatprep.subr.bf16.mxu0 %v8828_v40  ;;  %v5318_v60 = vld [vmem:[%s12237_s5 + $0x1b0] sm:$0xff]  ;;  %v5321_v40 = vld [vmem:[%s12237_s5 + $0x1c8] sm:$0xff]  ;;  %v8890_v27 = vpack.c.bf16 %v5525_v10, %v5523_v23  ;;  %v5632_v46 = vld [vmem:[%s12237_s5 + $0x2e0] sm:$0xff]  ;;  %v5079_v39 = vunpack.c.l.s4 %v9223_v19 }
 0x55a   : > { %v6476_v21 = vld [vmem:[#allocation4 + $0x68] sm:$0xf]  ;;  %v8866_v13 = vpack.c.bf16 %v5318_v60, %v5316_v43  ;;  %v8868_v37 = vpack.c.bf16 %v5323_v33, %v5321_v40  ;;  %v5322_v2 = vld [vmem:[%s12237_s5 + $0x1d0] sm:$0xff]  ;;  %v5736_v23 = vld [vmem:[%s12237_s5 + $0x338] sm:$0xff] }
 0x55b   : > { %v6480_v20 = vmax.f32 %v6478_v53, %v6476_v21  ;;  %v8836_v53 = vpack.c.bf16 %v5105_v50, %v5103_v31  ;;  %v5104_v21 = vld [vmem:[%s12237_s5 + $0xd0] sm:$0xff]  ;;  %v5324_v31 = vld [vmem:[%s12237_s5 + $0x1e0] sm:$0xff]  ;;  %v5843_v40 = vld [vmem:[%s12237_s5 + $0x3a8] sm:$0xff] }
 0x55c   : > { %v5326_v50 = vld [vmem:[%s12237_s5 + $0x1f0] sm:$0xff]  ;;  %v5845_v33 = vld [vmem:[%s12237_s5 + $0x3b8] sm:$0xff] }
 0x55d   : > { %v6484_v34 = vrot.slane %v6480_v20, 1  ;;  %v6489_v48 = vrot.slane %v6480_v20, 2  ;;  %v5107_v20 = vld [vmem:[%s12237_s5 + $0xe8] sm:$0xff]  ;;  %v5634_v51 = vld [vmem:[%s12237_s5 + $0x2f0] sm:$0xff] }
 0x55e   : > { %v8906_v16 = vpack.c.bf16 %v5634_v51, %v5632_v46  ;;  %v5731_v26 = vld [vmem:[%s12237_s5 + $0x310] sm:$0xff] }
 0x55f   : > { %v6485_v49 = vsel %vm1386_vm8, %v6483_v17, %v6484_v34  ;;  %v6490_v18 = vsel %vm1400_vm9, %v6488_v4, %v6489_v48  ;;  %v5109_v17 = vld [vmem:[%s12237_s5 + $0xf8] sm:$0xff]  ;;  %v8878_v34 = vpack.c.bf16 %v5513_v58, %v5511_v41  ;;  %v8880_v4 = vpack.c.bf16 %v5518_v38, %v5516_v8  ;;  %v5515_v48 = vld [vmem:[%s12237_s5 + $0x220] sm:$0xff]  ;;  %v5625_v8 = vld [vmem:[%s12237_s5 + $0x2a8] sm:$0xff] }
 0x560   : > { %v6487_v45 = vmax.f32 %v6479_v15, %v6485_v49  ;;  %v5102_v15 = vld [vmem:[%s12237_s5 + $0xc0] sm:$0xff]  ;;  %v8840_v0 = vpack.c.bf16 %v5109_v17, %v5107_v20  ;;  %v5627_v38 = vld [vmem:[%s12237_s5 + $0x2b8] sm:$0xff]  ;;  %v5626_v17 = vld [vmem:[%s12237_s5 + $0x2b0] sm:$0xff] }
 0x561   : > { %v8838_v49 = vpack.c.bf16 %v5104_v21, %v5102_v15  ;;  %v5620_v58 = vld [vmem:[%s12237_s5 + $0x280] sm:$0xff]  ;;  %v8896_v21 = vpack.c.bf16 %v5627_v38, %v5625_v8  ;;  %v5739_v38 = vld [vmem:[%s12237_s5 + $0x350] sm:$0xff] }
 0x562   : > { %v11232_v9 = vmax.f32 %v6487_v45, %v6490_v18  ;;  %v5520_v18 = vld [vmem:[%s12237_s5 + $0x248] sm:$0xff]  ;;  %v5522_v45 = vld [vmem:[%s12237_s5 + $0x258] sm:$0xff]  ;;  %v5624_v20 = vld [vmem:[%s12237_s5 + $0x2a0] sm:$0xff] }
 0x563   : > { %v8884_v62 = vpack.c.bf16 %v5522_v45, %v5520_v18  ;;  %v5633_v45 = vld [vmem:[%s12237_s5 + $0x2e8] sm:$0xff]  ;;  %v5737_v8 = vld [vmem:[%s12237_s5 + $0x340] sm:$0xff] }
 0x614   : > { %v11312_v11 = vpop.f32.mrb[236].mxu0 }
 0x615   : > { %v5219_v57 = vrot.slane %v11312_v11, 2  ;;  %7450 = vmatmul.mubr.msk.f32.vlgmr.msra.gmra.mrb[238].mxu0 %vm4873_vm12, %v11312_v11  ;;  %v8687_v42 = vpop.f32.mrb[237].mxu0  ;;  %v5110_v32 = vrot.slane %v11312_v11, 1  ;;  %v5328_v15 = vrot.slane %v11312_v11, 3  ;;  %v8898_v11 = vpack.c.bf16 %v5626_v17, %v5624_v20  ;;  %v5742_v20 = vld [vmem:[%s12237_s5 + $0x368] sm:$0xff]  ;;  %v5744_v17 = vld [vmem:[%s12237_s5 + $0x378] sm:$0xff] }
 0x616   : > { %8831 = vmatpush1.bf16.msra.mxu0 %v8830_v5  ;;  %5177 = vmatprep.mubr.f32.mxu0 %v9221_v6  ;;  %v5320_v5 = vld [vmem:[%s12237_s5 + $0x1c0] sm:$0xff]  ;;  %v5623_v42 = vld [vmem:[%s12237_s5 + $0x298] sm:$0xff] }
 0x617   : > { %7452 = vmatmul.mubr.msk.f32.vlgmr.msra.gmra.mrb[228].mxu1 %vm4873_vm12, %v5219_v57  ;;  %8833 = vmatprep.subr.bf16.mxu0 %v8832_v56  ;;  %v5327_v56 = vld [vmem:[%s12237_s5 + $0x1f8] sm:$0xff]  ;;  %v8870_v25 = vpack.c.bf16 %v5322_v2, %v5320_v5  ;;  %v5621_v57 = vld [vmem:[%s12237_s5 + $0x288] sm:$0xff]  ;;  %v5080_v5 = vunpack.c.0.s8 %v5079_v39 }
 0x618   : > { %8689 = vmatpush3.msra.mxu1 %v11218_v1  ;;  %8690 = vmatprep.mubr.msk.f32.mxu1 %vm9220_vm1, %v9221_v6  ;;  %v5517_v1 = vld [vmem:[%s12237_s5 + $0x230] sm:$0xff]  ;;  %v8872_v55 = vpack.c.bf16 %v5327_v56, %v5325_v29  ;;  %v8892_v41 = vpack.c.bf16 %v5623_v42, %v5621_v57  ;;  %v5738_v56 = vld [vmem:[%s12237_s5 + $0x348] sm:$0xff] }
 0x619   : > { %8877 = vmatprep.subr.bf16.mxu1 %v8876_v7  ;;  %v8882_v24 = vpack.c.bf16 %v5517_v1, %v5515_v48  ;;  %v8874_v7 = vpack.c.bf16 %v5326_v50, %v5324_v31  ;;  %v5628_v1 = vld [vmem:[%s12237_s5 + $0x2c0] sm:$0xff]  ;;  %v8928_v31 = vpack.c.bf16 %v5845_v33, %v5843_v40  ;;  %v5844_v57 = vld [vmem:[%s12237_s5 + $0x3b0] sm:$0xff]  ;;  %v6038_v33 = vld [vmem:[%s12237_s5 + $0x408] sm:$0xff] }
 0x61a   : > { %8835 = vmatpush1.bf16.msra.mxu0 %v8834_v47  ;;  %v5622_v47 = vld [vmem:[%s12237_s5 + $0x290] sm:$0xff]  ;;  %v5842_v50 = vld [vmem:[%s12237_s5 + $0x3a0] sm:$0xff] }
 0x61b   : > { %8691 = vmatmul.mubr.msk.f32.vlgmr.msra.gmra.mrb[230].mxu1 %vm4912_vm13, %v12258_v44  ;;  %8837 = vmatprep.subr.bf16.mxu0 %v8836_v53  ;;  %v8894_v53 = vpack.c.bf16 %v5622_v47, %v5620_v58  ;;  %v5849_v58 = vld [vmem:[%s12237_s5 + $0x3d8] sm:$0xff] }
 0x61c   : > { %8879 = vmatpush1.bf16.msra.mxu1 %v8878_v34  ;;  %5594 = vmatprep.mubr.f32.mxu1 %v9221_v6  ;;  %v5629_v34 = vld [vmem:[%s12237_s5 + $0x2c8] sm:$0xff] }
 0x61d   : > { %8881 = vmatprep.subr.bf16.mxu1 %v8880_v4  ;;  %v5631_v4 = vld [vmem:[%s12237_s5 + $0x2d8] sm:$0xff] }
 0x61e   : > { %8839 = vmatpush1.bf16.msra.mxu0 %v8838_v49  ;;  %v8900_v48 = vpack.c.bf16 %v5631_v4, %v5629_v34  ;;  %v5630_v49 = vld [vmem:[%s12237_s5 + $0x2d0] sm:$0xff]  ;;  %v5846_v4 = vld [vmem:[%s12237_s5 + $0x3c0] sm:$0xff] }
 0x61f   : > { %8841 = vmatprep.subr.bf16.mxu0 %v8840_v0  ;;  %v8902_v18 = vpack.c.bf16 %v5630_v49, %v5628_v1  ;;  %v5635_v0 = vld [vmem:[%s12237_s5 + $0x2f8] sm:$0xff]  ;;  %v5851_v1 = vld [vmem:[%s12237_s5 + $0x3e8] sm:$0xff] }
 0x620   : > { %8883 = vmatpush1.bf16.msra.mxu1 %v8882_v24  ;;  %v8904_v22 = vpack.c.bf16 %v5635_v0, %v5633_v45  ;;  %v5730_v24 = vld [vmem:[%s12237_s5 + $0x308] sm:$0xff]  ;;  %v5853_v49 = vld [vmem:[%s12237_s5 + $0x3f8] sm:$0xff]  ;;  %v5741_v45 = vld [vmem:[%s12237_s5 + $0x360] sm:$0xff] }
 0x621   : > { %8885 = vmatprep.subr.bf16.mxu1 %v8884_v62  ;;  %v5732_v62 = vld [vmem:[%s12237_s5 + $0x318] sm:$0xff]  ;;  %v5743_v0 = vld [vmem:[%s12237_s5 + $0x370] sm:$0xff]  ;;  %v8936_v51 = vpack.c.bf16 %v5853_v49, %v5851_v1 }
 0x622   : > { %8843 = vmatpush1.bf16.msra.mxu0 %v8842_v63  ;;  %v8908_v3 = vpack.c.bf16 %v5732_v62, %v5730_v24  ;;  %v5841_v63 = vld [vmem:[%s12237_s5 + $0x398] sm:$0xff]  ;;  %v5852_v24 = vld [vmem:[%s12237_s5 + $0x3f0] sm:$0xff]  ;;  %v8922_v62 = vpack.c.bf16 %v5743_v0, %v5741_v45 }
 0x623   : > { %8861 = vmatprep.subr.bf16.mxu0 %v8860_v28  ;;  %v8924_v36 = vpack.c.bf16 %v5841_v63, %v5839_v30  ;;  %v5729_v28 = vld [vmem:[%s12237_s5 + $0x300] sm:$0xff]  ;;  %v6047_v49 = vld [vmem:[%s12237_s5 + $0x450] sm:$0xff]  ;;  %v6157_v45 = vld [vmem:[%s12237_s5 + $0x4d8] sm:$0xff] }
 0x624   : > { %8887 = vmatpush1.bf16.msra.mxu1 %v8886_v14  ;;  %v8910_v60 = vpack.c.bf16 %v5731_v26, %v5729_v28  ;;  %v4889_v28 = vld [vmem:[%s12238_s6] sm:$0x3] }
 0x625   : > { %7451 = vmatmul.mubr.msk.f32.vlgmr.msra.gmra.mrb[240].mxu0 %vm4873_vm12, %v5110_v32  ;;  %8889 = vmatprep.subr.bf16.mxu1 %v8888_v54  ;;  %v5734_v54 = vld [vmem:[%s12237_s5 + $0x328] sm:$0xff]  ;;  %v5838_v32 = vld [vmem:[%s12237_s5 + $0x380] sm:$0xff] }
 0x626   : > { %8863 = vmatpush1.bf16.msra.mxu0 %v8862_v35  ;;  %5395 = vmatprep.mubr.f32.mxu0 %v9221_v6 }
 0x627   : > { %8865 = vmatprep.subr.bf16.mxu0 %v8864_v52  ;;  %v5840_v52 = vld [vmem:[%s12237_s5 + $0x390] sm:$0xff] }
 0x628   : > { %8891 = vmatpush1.bf16.msra.mxu1 %v8890_v27  ;;  %v8912_v27 = vpack.c.bf16 %v5736_v23, %v5734_v54  ;;  %v8926_v29 = vpack.c.bf16 %v5840_v52, %v5838_v32 }
 0x629   : > { %8909 = vmatprep.subr.bf16.mxu1 %v8908_v3 }
 0x62a   : > { %8867 = vmatpush1.bf16.msra.mxu0 %v8866_v13  ;;  %v5733_v13 = vld [vmem:[%s12237_s5 + $0x320] sm:$0xff] }
 0x62b   : > { %8869 = vmatprep.subr.bf16.mxu0 %v8868_v37  ;;  %v5735_v37 = vld [vmem:[%s12237_s5 + $0x330] sm:$0xff] }
 0x62e   : > { %8871 = vmatpush1.bf16.msra.mxu0 %v8870_v25  ;;  %v5740_v25 = vld [vmem:[%s12237_s5 + $0x358] sm:$0xff] }
 0x62f   : > { %8873 = vmatprep.subr.bf16.mxu0 %v8872_v55  ;;  %v8916_v47 = vpack.c.bf16 %v5740_v25, %v5738_v56  ;;  %v6149_v56 = vld [vmem:[%s12237_s5 + $0x498] sm:$0xff] }
 0x632   : > { %8875 = vmatpush1.bf16.msra.mxu0 %v8874_v7  ;;  %v8914_v7 = vpack.c.bf16 %v5735_v37, %v5733_v13  ;;  %v6037_v37 = vld [vmem:[%s12237_s5 + $0x400] sm:$0xff] }
 0x633   : > { %8893 = vmatprep.subr.bf16.mxu0 %v8892_v41  ;;  %v5847_v41 = vld [vmem:[%s12237_s5 + $0x3c8] sm:$0xff] }
 0x634   : > { %v8932_v34 = vpack.c.bf16 %v5849_v58, %v5847_v41  ;;  %v6041_v41 = vld [vmem:[%s12237_s5 + $0x420] sm:$0xff]  ;;  %v6043_v58 = vld [vmem:[%s12237_s5 + $0x430] sm:$0xff] }
 0x635   : > { %7453 = vmatmul.mubr.msk.f32.vlgmr.msra.gmra.mrb[242].mxu0 %vm4873_vm12, %v5328_v15 }
 0x636   : > { %8895 = vmatpush1.bf16.msra.mxu0 %v8894_v53  ;;  %5703 = vmatprep.mubr.f32.mxu0 %v9221_v6  ;;  %v12259_v53 = vld [vmem:[#allocation8_spill] sm:$0xff] }
 0x637   : > { %8897 = vmatprep.subr.bf16.mxu0 %v8896_v21  ;;  %v11573_v15 = vsub.s32 %v5080_v5, %v12259_v53  ;;  %v8930_v21 = vpack.c.bf16 %v5844_v57, %v5842_v50  ;;  %v6039_v5 = vld [vmem:[%s12237_s5 + $0x410] sm:$0xff]  ;;  %v6042_v57 = vld [vmem:[%s12237_s5 + $0x428] sm:$0xff] }
 0x63a   : > { %8899 = vmatpush1.bf16.msra.mxu0 %v8898_v11  ;;  %v5848_v11 = vld [vmem:[%s12237_s5 + $0x3d0] sm:$0xff] }
 0x63b   : > { %8901 = vmatprep.subr.bf16.mxu0 %v8900_v48  ;;  %v8918_v48 = vpack.c.bf16 %v5739_v38, %v5737_v8  ;;  %v6151_v8 = vld [vmem:[%s12237_s5 + $0x4a8] sm:$0xff]  ;;  %v6153_v38 = vld [vmem:[%s12237_s5 + $0x4b8] sm:$0xff] }
 0x63e   : > { %8903 = vmatpush1.bf16.msra.mxu0 %v8902_v18  ;;  %v8920_v18 = vpack.c.bf16 %v5744_v17, %v5742_v20  ;;  %v6150_v20 = vld [vmem:[%s12237_s5 + $0x4a0] sm:$0xff]  ;;  %v6152_v17 = vld [vmem:[%s12237_s5 + $0x4b0] sm:$0xff] }
 0x63f   : > { %8905 = vmatprep.subr.bf16.mxu0 %v8904_v22  ;;  %v8934_v22 = vpack.c.bf16 %v5848_v11, %v5846_v4  ;;  %v6046_v4 = vld [vmem:[%s12237_s5 + $0x448] sm:$0xff]  ;;  %v6048_v11 = vld [vmem:[%s12237_s5 + $0x458] sm:$0xff] }
 0x640   : > { %v8948_v1 = vpack.c.bf16 %v6048_v11, %v6046_v4 }
 0x642   : > { %8907 = vmatpush1.bf16.msra.mxu0 %v8906_v16  ;;  %v5850_v16 = vld [vmem:[%s12237_s5 + $0x3e0] sm:$0xff] }
 0x643   : > { %8925 = vmatprep.subr.bf16.mxu0 %v8924_v36  ;;  %v8938_v63 = vpack.c.bf16 %v5852_v24, %v5850_v16  ;;  %v6050_v24 = vld [vmem:[%s12237_s5 + $0x468] sm:$0xff] }
 0x6e8   : > { %v5070_v59 = vpop.f32.mrb[238].mxu0 }
 0x6e9   : > { %v5072_v12 = vpop.f32.mrb[239].mxu0 }
 0x6ea   : > { %v11511_v14 = vpop.f32.mrb[228].mxu1  ;;  %v5077_v10 = vcombine.low %v5070_v59, %v5072_v12 }
 0x6eb   : > { %v11519_v35 = vpop.f32.mrb[229].mxu1 }
 0x6ec   : > { %v5295_v43 = vcombine.low %v11511_v14, %v11519_v35  ;;  %v5084_v46 = vrot.slane %v5077_v10, %v11573_v15 }
 0x6ee   : > { %v11541_v2 = vpop.f32.mrb[230].mxu1  ;;  %v5091_v36 = vrot.slane %v5084_v46, %v11573_v15  ;;  %v5302_v26 = vrot.slane %v5295_v43, %v11573_v15  ;;  %v6154_v46 = vld [vmem:[%s12237_s5 + $0x4c0] sm:$0xff] }
 0x6ef   : > { %v5636_v55 = vrot.slane %v11541_v2, 1  ;;  %7455 = vmatmul.mubr.msk.f32.vlgmr.msra.gmra.mrb[232].mxu1 %vm4873_vm12, %v11541_v2  ;;  %v8692_v42 = vpop.f32.mrb[231].mxu1  ;;  %v5745_v19 = vrot.slane %v11541_v2, 2  ;;  %v5854_v23 = vrot.slane %v11541_v2, 3  ;;  %v8942_v2 = vpack.c.bf16 %v6039_v5, %v6037_v37 }
 0x6f0   : > { %8911 = vmatpush1.bf16.msra.mxu1 %v8910_v60  ;;  %5812 = vmatprep.mubr.f32.mxu1 %v9221_v6  ;;  %v5093_v39 = vadd.f32 %v5091_v36, %v4889_v28  ;;  %v5309_v10 = vrot.slane %v5302_v26, %v11573_v15  ;;  %v6044_v42 = vld [vmem:[%s12237_s5 + $0x438] sm:$0xff] }
 0x6f1   : > { %7456 = vmatmul.mubr.msk.f32.vlgmr.msra.gmra.mrb[244].mxu0 %vm4873_vm12, %v5636_v55  ;;  %8913 = vmatprep.subr.bf16.mxu1 %v8912_v27  ;;  %v6040_v27 = vld [vmem:[%s12237_s5 + $0x418] sm:$0xff]  ;;  %v6146_v55 = vld [vmem:[%s12237_s5 + $0x480] sm:$0xff] }
 0x6f2   : > { %8927 = vmatpush1.bf16.msra.mxu0 %v8926_v29  ;;  %5921 = vmatprep.mubr.f32.mxu0 %v9221_v6  ;;  %v8940_v13 = vpack.c.bf16 %v6040_v27, %v6038_v33  ;;  %v6147_v29 = vld [vmem:[%s12237_s5 + $0x488] sm:$0xff]  ;;  %v6161_v28 = vld [vmem:[%s12237_s5 + $0x4f8] sm:$0xff] }
 0x6f3   : > { %8929 = vmatprep.subr.bf16.mxu0 %v8928_v31  ;;  %v8956_v25 = vpack.c.bf16 %v6149_v56, %v6147_v29  ;;  %v6148_v31 = vld [vmem:[%s12237_s5 + $0x490] sm:$0xff] }
 0x6f4   : > { %8915 = vmatpush1.bf16.msra.mxu1 %v8914_v7  ;;  %v8958_v50 = vpack.c.bf16 %v6148_v31, %v6146_v55  ;;  %v8944_v7 = vpack.c.bf16 %v6044_v42, %v6042_v57  ;;  %v6257_v55 = vld [vmem:[%s12237_s5 + $0x510] sm:$0xff]  ;;  %v6364_v42 = vld [vmem:[%s12237_s5 + $0x580] sm:$0xff] }
 0x6f5   : > { %8917 = vmatprep.subr.bf16.mxu1 %v8916_v47  ;;  %v8946_v47 = vpack.c.bf16 %v6043_v58, %v6041_v41 }
 0x6f6   : > { %8931 = vmatpush1.bf16.msra.mxu0 %v8930_v21  ;;  %v8960_v21 = vpack.c.bf16 %v6153_v38, %v6151_v8  ;;  %v6369_v8 = vld [vmem:[%s12237_s5 + $0x5a8] sm:$0xff]  ;;  %v6371_v38 = vld [vmem:[%s12237_s5 + $0x5b8] sm:$0xff] }
 0x6f7   : > { %8933 = vmatprep.subr.bf16.mxu0 %v8932_v34  ;;  %v8962_v34 = vpack.c.bf16 %v6152_v17, %v6150_v20  ;;  %v6259_v17 = vld [vmem:[%s12237_s5 + $0x520] sm:$0xff] }
 0x6f8   : > { %8919 = vmatpush1.bf16.msra.mxu1 %v8918_v48  ;;  %v5179_v3 = vpop.f32.mrb[240].mxu0  ;;  %v6045_v48 = vld [vmem:[%s12237_s5 + $0x440] sm:$0xff] }
 0x6f9   : > { %8921 = vmatprep.subr.bf16.mxu1 %v8920_v18  ;;  %v5181_v30 = vpop.f32.mrb[241].mxu0  ;;  %v6155_v18 = vld [vmem:[%s12237_s5 + $0x4c8] sm:$0xff]  ;;  %v8950_v0 = vpack.c.bf16 %v6047_v49, %v6045_v48 }
 0x6fa   : > { %8935 = vmatpush1.bf16.msra.mxu0 %v8934_v22  ;;  %v5186_v59 = vcombine.low %v5179_v3, %v5181_v30  ;;  %v8964_v22 = vpack.c.bf16 %v6157_v45, %v6155_v18  ;;  %v6049_v30 = vld [vmem:[%s12237_s5 + $0x460] sm:$0xff]  ;;  %v6264_v49 = vld [vmem:[%s12237_s5 + $0x548] sm:$0xff]  ;;  %v6266_v18 = vld [vmem:[%s12237_s5 + $0x558] sm:$0xff] }
 0x6fb   : > { %8937 = vmatprep.subr.bf16.mxu0 %v8936_v51  ;;  %v6156_v51 = vld [vmem:[%s12237_s5 + $0x4d0] sm:$0xff] }
 0x6fc   : > { %8923 = vmatpush1.bf16.msra.mxu1 %v8922_v62  ;;  %v5193_v12 = vrot.slane %v5186_v59, %v11573_v15  ;;  %v8966_v16 = vpack.c.bf16 %v6156_v51, %v6154_v46  ;;  %v6052_v62 = vld [vmem:[%s12237_s5 + $0x478] sm:$0xff]  ;;  %v6159_v59 = vld [vmem:[%s12237_s5 + $0x4e8] sm:$0xff]  ;;  %v6370_v46 = vld [vmem:[%s12237_s5 + $0x5b0] sm:$0xff] }
 0x6fd   : > { %8693 = vmatprep.subr.mxu1 %v9221_v6  ;;  %v8952_v3 = vpack.c.bf16 %v6052_v62, %v6050_v24  ;;  %v8968_v26 = vpack.c.bf16 %v6161_v28, %v6159_v59  ;;  %v6265_v59 = vld [vmem:[%s12237_s5 + $0x550] sm:$0xff] }
 0x6fe   : > { %8939 = vmatpush1.bf16.msra.mxu0 %v8938_v63  ;;  %v5200_v54 = vrot.slane %v5193_v12, %v11573_v15  ;;  %v6051_v63 = vld [vmem:[%s12237_s5 + $0x470] sm:$0xff]  ;;  %v6158_v12 = vld [vmem:[%s12237_s5 + $0x4e0] sm:$0xff] }
 0x6ff   : > { %7457 = vmatmul.mubr.msk.f32.vlgmr.msra.gmra.mrb[234].mxu1 %vm4873_vm12, %v5745_v19  ;;  %8957 = vmatprep.subr.bf16.mxu0 %v8956_v25  ;;  %v8954_v36 = vpack.c.bf16 %v6051_v63, %v6049_v30  ;;  %v6160_v19 = vld [vmem:[%s12237_s5 + $0x4f0] sm:$0xff]  ;;  %v6255_v25 = vld [vmem:[%s12237_s5 + $0x500] sm:$0xff]  ;;  %v6375_v30 = vld [vmem:[%s12237_s5 + $0x5d8] sm:$0xff]  ;;  %v8980_v63 = vpack.c.bf16 %v6266_v18, %v6264_v49 }
 0x700   : > { %8694 = vmatpush3.msra.mxu1 %v11228_v61  ;;  %8695 = vmatprep.mubr.msk.f32.mxu1 %vm9220_vm1, %v9221_v6  ;;  %v5202_v14 = vadd.f32 %v5200_v54, %v5093_v39  ;;  %v8970_v39 = vpack.c.bf16 %v6160_v19, %v6158_v12  ;;  %v6256_v54 = vld [vmem:[%s12237_s5 + $0x508] sm:$0xff] }
 0x701   : > { %7458 = vmatmul.mubr.msk.f32.vlgmr.msra.gmra.mrb[246].mxu0 %vm4873_vm12, %v5854_v23  ;;  %8941 = vmatprep.subr.bf16.mxu1 %v8940_v13  ;;  %v6258_v23 = vld [vmem:[%s12237_s5 + $0x518] sm:$0xff]  ;;  %v6268_v19 = vld [vmem:[%s12237_s5 + $0x568] sm:$0xff] }
 0x702   : > { %v5311_v35 = vadd.f32 %v5309_v10, %v5202_v14  ;;  %6229 = vmatprep.mubr.f32.mxu0 %v9221_v6  ;;  %8959 = vmatpush1.bf16.msra.mxu0 %v8958_v50  ;;  %v8972_v10 = vpack.c.bf16 %v6258_v23, %v6256_v54  ;;  %v6365_v14 = vld [vmem:[%s12237_s5 + $0x588] sm:$0xff]  ;;  %v6372_v23 = vld [vmem:[%s12237_s5 + $0x5c0] sm:$0xff] }
 0x703   : > { %8696 = vmatmul.mubr.msk.f32.vlgmr.msra.gmra.mrb[236].mxu1 %vm4912_vm13, %v12258_v44  ;;  %8961 = vmatprep.subr.bf16.mxu0 %v8960_v21  ;;  %v6260_v50 = vld [vmem:[%s12237_s5 + $0x528] sm:$0xff] }
 0x704   : > { %6120 = vmatprep.mubr.f32.mxu1 %v9221_v6  ;;  %8943 = vmatpush1.bf16.msra.mxu1 %v8942_v2  ;;  %v6572_v18 = vld [vmem:[%s12237_s5 + $0x648] sm:$0xff] }
 0x705   : > { %8945 = vmatprep.subr.bf16.mxu1 %v8944_v7  ;;  %v6366_v7 = vld [vmem:[%s12237_s5 + $0x590] sm:$0xff] }
 0x706   : > { %8963 = vmatpush1.bf16.msra.mxu0 %v8962_v34  ;;  %v6261_v34 = vld [vmem:[%s12237_s5 + $0x530] sm:$0xff] }
 0x707   : > { %8965 = vmatprep.subr.bf16.mxu0 %v8964_v22  ;;  %v6368_v22 = vld [vmem:[%s12237_s5 + $0x5a0] sm:$0xff]  ;;  %v8978_v62 = vpack.c.bf16 %v6261_v34, %v6259_v17  ;;  %v6677_v34 = vld [vmem:[%s12237_s5 + $0x6a8] sm:$0xff] }
 0x708   : > { %v5397_v32 = vpop.f32.mrb[242].mxu0  ;;  %8947 = vmatpush1.bf16.msra.mxu1 %v8946_v47  ;;  %v8974_v47 = vpack.c.bf16 %v6257_v55, %v6255_v25  ;;  %v8994_v12 = vpack.c.bf16 %v6370_v46, %v6368_v22  ;;  %v6564_v25 = vld [vmem:[%s12237_s5 + $0x608] sm:$0xff]  ;;  %v6571_v22 = vld [vmem:[%s12237_s5 + $0x640] sm:$0xff]  ;;  %v6573_v46 = vld [vmem:[%s12237_s5 + $0x650] sm:$0xff] }
 0x709   : > { %v5399_v52 = vpop.f32.mrb[243].mxu0  ;;  %8949 = vmatprep.subr.bf16.mxu1 %v8948_v1  ;;  %v8990_v1 = vpack.c.bf16 %v6366_v7, %v6364_v42  ;;  %v6672_v7 = vld [vmem:[%s12237_s5 + $0x680] sm:$0xff] }
 0x70a   : > { %v5404_v43 = vcombine.low %v5397_v32, %v5399_v52  ;;  %8967 = vmatpush1.bf16.msra.mxu0 %v8966_v16 }
 0x70b   : > { %8969 = vmatprep.subr.bf16.mxu0 %v8968_v26 }
 0x70c   : > { %v5411_v60 = vrot.slane %v5404_v43, %v11573_v15  ;;  %8951 = vmatpush1.bf16.msra.mxu1 %v8950_v0  ;;  %v8992_v0 = vpack.c.bf16 %v6371_v38, %v6369_v8  ;;  %v6570_v8 = vld [vmem:[%s12237_s5 + $0x638] sm:$0xff] }
 0x70d   : > { %8953 = vmatprep.subr.bf16.mxu1 %v8952_v3  ;;  %v6373_v3 = vld [vmem:[%s12237_s5 + $0x5c8] sm:$0xff] }
 0x70e   : > { %v5418_v61 = vrot.slane %v5411_v60, %v11573_v15  ;;  %8971 = vmatpush1.bf16.msra.mxu0 %v8970_v39  ;;  %v6270_v39 = vld [vmem:[%s12237_s5 + $0x578] sm:$0xff]  ;;  %v8996_v54 = vpack.c.bf16 %v6375_v30, %v6373_v3  ;;  %v6682_v3 = vld [vmem:[%s12237_s5 + $0x6d0] sm:$0xff] }
 0x710   : > { %v11632_v40 = vadd.f32 %v5418_v61, %v5311_v35  ;;  %8955 = vmatpush1.bf16.msra.mxu1 %v8954_v36  ;;  %v6367_v35 = vld [vmem:[%s12237_s5 + $0x598] sm:$0xff]  ;;  %v6263_v36 = vld [vmem:[%s12237_s5 + $0x540] sm:$0xff] }
 0x711   : > { %8973 = vmatprep.subr.bf16.mxu1 %v8972_v10  ;;  %v8988_v32 = vpack.c.bf16 %v6367_v35, %v6365_v14  ;;  %v6374_v10 = vld [vmem:[%s12237_s5 + $0x5d0] sm:$0xff]  ;;  %v8982_v35 = vpack.c.bf16 %v6265_v59, %v6263_v36  ;;  %v6576_v36 = vld [vmem:[%s12237_s5 + $0x668] sm:$0xff]  ;;  %v6578_v59 = vld [vmem:[%s12237_s5 + $0x678] sm:$0xff] }
 0x713   : > { %8989 = vmatprep.subr.bf16.mxu0 %v8988_v32  ;;  %v6377_v32 = vld [vmem:[%s12237_s5 + $0x5e8] sm:$0xff] }
 0x7c2   : > { %v5596_v52 = vpop.f32.mrb[232].mxu1 }
 0x7c3   : > { %v5598_v43 = vpop.f32.mrb[233].mxu1 }
 0x7c4   : > { %v5603_v60 = vcombine.low %v5596_v52, %v5598_v43  ;;  %v5705_v61 = vpop.f32.mrb[244].mxu0  ;;  %v6379_v52 = vld [vmem:[%s12237_s5 + $0x5f8] sm:$0xff]  ;;  %v8984_v43 = vpack.c.bf16 %v6270_v39, %v6268_v19  ;;  %v6685_v39 = vld [vmem:[%s12237_s5 + $0x6e8] sm:$0xff] }
 0x7c5   : > { %v5707_v33 = vpop.f32.mrb[245].mxu0 }
 0x7c6   : > { %v5610_v27 = vrot.slane %v5603_v60, %v11573_v15  ;;  %v5712_v13 = vcombine.low %v5705_v61, %v5707_v33  ;;  %v6267_v60 = vld [vmem:[%s12237_s5 + $0x560] sm:$0xff]  ;;  %v6269_v61 = vld [vmem:[%s12237_s5 + $0x570] sm:$0xff]  ;;  %v8998_v33 = vpack.c.bf16 %v6374_v10, %v6372_v23 }
 0x7c7   : > { %v6684_v10 = vld [vmem:[%s12237_s5 + $0x6e0] sm:$0xff] }
 0x7c8   : > { %v5617_v37 = vrot.slane %v5610_v27, %v11573_v15  ;;  %v5719_v5 = vrot.slane %v5712_v13, %v11573_v15  ;;  %v9000_v27 = vpack.c.bf16 %v6379_v52, %v6377_v32  ;;  %v6376_v13 = vld [vmem:[%s12237_s5 + $0x5e0] sm:$0xff]  ;;  %v6782_v52 = vld [vmem:[%s12237_s5 + $0x708] sm:$0xff] }
 0x7ca   : > { %v5619_v2 = vadd.f32 %v5617_v37, %v11632_v40  ;;  %v5726_v29 = vrot.slane %v5719_v5, %v11573_v15  ;;  %v6262_v40 = vld [vmem:[%s12237_s5 + $0x538] sm:$0xff]  ;;  %v6378_v37 = vld [vmem:[%s12237_s5 + $0x5f0] sm:$0xff]  ;;  %v8986_v5 = vpack.c.bf16 %v6269_v61, %v6267_v60  ;;  %v6891_v61 = vld [vmem:[%s12237_s5 + $0x788] sm:$0xff] }
 0x7cb   : > { %v8976_v20 = vpack.c.bf16 %v6262_v40, %v6260_v50  ;;  %v6565_v50 = vld [vmem:[%s12237_s5 + $0x610] sm:$0xff]  ;;  %v6673_v40 = vld [vmem:[%s12237_s5 + $0x688] sm:$0xff] }
 0x7cc   : > { %v5728_v56 = vadd.f32 %v5726_v29, %v5619_v2  ;;  %v9002_v2 = vpack.c.bf16 %v6378_v37, %v6376_v13 }
 0x7d2   : > { %v5814_v31 = vpop.f32.mrb[234].mxu1 }
 0x7d3   : > { %v5816_v57 = vpop.f32.mrb[235].mxu1 }
 0x7d4   : > { %v5821_v41 = vcombine.low %v5814_v31, %v5816_v57  ;;  %v5923_v58 = vpop.f32.mrb[246].mxu0  ;;  %v6563_v31 = vld [vmem:[%s12237_s5 + $0x600] sm:$0xff]  ;;  %v6675_v57 = vld [vmem:[%s12237_s5 + $0x698] sm:$0xff] }
 0x7d5   : > { %v5925_v21 = vpop.f32.mrb[247].mxu0  ;;  %v9020_v42 = vpack.c.bf16 %v6675_v57, %v6673_v40  ;;  %v6781_v40 = vld [vmem:[%s12237_s5 + $0x700] sm:$0xff]  ;;  %v6783_v57 = vld [vmem:[%s12237_s5 + $0x710] sm:$0xff] }
 0x7d6   : > { %v5828_v4 = vrot.slane %v5821_v41, %v11573_v15  ;;  %v5930_v11 = vcombine.low %v5923_v58, %v5925_v21  ;;  %v11778_v48 = vpop.f32.mrb[236].mxu1  ;;  %v6674_v41 = vld [vmem:[%s12237_s5 + $0x690] sm:$0xff]  ;;  %v6567_v21 = vld [vmem:[%s12237_s5 + $0x620] sm:$0xff] }
 0x7d7   : > { %v6162_v45 = vrot.slane %v11778_v48, 1  ;;  %7460 = vmatmul.mubr.msk.f32.vlgmr.msra.gmra.mrb[238].mxu1 %vm4873_vm12, %v11778_v48  ;;  %v8697_v51 = vpop.f32.mrb[237].mxu1  ;;  %v6271_v29 = vrot.slane %v11778_v48, 2  ;;  %v9022_v58 = vpack.c.bf16 %v6674_v41, %v6672_v7  ;;  %v6786_v7 = vld [vmem:[%s12237_s5 + $0x728] sm:$0xff] }
 0x7d8   : > { %v5835_v16 = vrot.slane %v5828_v4, %v11573_v15  ;;  %v5937_v24 = vrot.slane %v5930_v11, %v11573_v15  ;;  %8975 = vmatpush1.bf16.msra.mxu1 %v8974_v47  ;;  %6338 = vmatprep.mubr.f32.mxu1 %v9221_v6  ;;  %v6568_v47 = vld [vmem:[%s12237_s5 + $0x628] sm:$0xff]  ;;  %v6679_v4 = vld [vmem:[%s12237_s5 + $0x6b8] sm:$0xff] }
 0x7d9   : > { %7461 = vmatmul.mubr.msk.f32.vlgmr.msra.gmra.mrb[248].mxu0 %vm4873_vm12, %v6162_v45  ;;  %8977 = vmatprep.subr.bf16.mxu1 %v8976_v20  ;;  %v9008_v38 = vpack.c.bf16 %v6570_v8, %v6568_v47  ;;  %v6569_v20 = vld [vmem:[%s12237_s5 + $0x630] sm:$0xff]  ;;  %v9024_v11 = vpack.c.bf16 %v6679_v4, %v6677_v34  ;;  %v6574_v45 = vld [vmem:[%s12237_s5 + $0x658] sm:$0xff]  ;;  %v6681_v51 = vld [vmem:[%s12237_s5 + $0x6c8] sm:$0xff] }
 0x7da   : > { %v5837_v28 = vadd.f32 %v5835_v16, %v5728_v56  ;;  %v5944_v26 = vrot.slane %v5937_v24, %v11573_v15  ;;  %8991 = vmatpush1.bf16.msra.mxu0 %v8990_v1  ;;  %6447 = vmatprep.mubr.f32.mxu0 %v9221_v6  ;;  %v6380_v56 = vrot.slane %v11778_v48, 3  ;;  %v9010_v17 = vpack.c.bf16 %v6569_v20, %v6567_v21  ;;  %v6676_v48 = vld [vmem:[%s12237_s5 + $0x6a0] sm:$0xff]  ;;  %v6678_v1 = vld [vmem:[%s12237_s5 + $0x6b0] sm:$0xff]  ;;  %v6683_v24 = vld [vmem:[%s12237_s5 + $0x6d8] sm:$0xff] }
 0x7db   : > { %8993 = vmatprep.subr.bf16.mxu0 %v8992_v0  ;;  %v9026_v49 = vpack.c.bf16 %v6678_v1, %v6676_v48  ;;  %v9012_v0 = vpack.c.bf16 %v6574_v45, %v6572_v18  ;;  %v9014_v16 = vpack.c.bf16 %v6573_v46, %v6571_v22  ;;  %v9028_v30 = vpack.c.bf16 %v6683_v24, %v6681_v51  ;;  %v6892_v47 = vld [vmem:[%s12237_s5 + $0x790] sm:$0xff]  ;;  %v6895_v20 = vld [vmem:[%s12237_s5 + $0x7a8] sm:$0xff]  ;;  %v6792_v22 = vld [vmem:[%s12237_s5 + $0x758] sm:$0xff] }
 0x7dc   : > { %v11825_v14 = vadd.f32 %v5944_v26, %v5837_v28  ;;  %8979 = vmatpush1.bf16.msra.mxu1 %v8978_v62  ;;  %v6680_v62 = vld [vmem:[%s12237_s5 + $0x6c0] sm:$0xff]  ;;  %v9016_v28 = vpack.c.bf16 %v6578_v59, %v6576_v36  ;;  %v9038_v21 = vpack.c.bf16 %v6783_v57, %v6781_v40  ;;  %v6787_v48 = vld [vmem:[%s12237_s5 + $0x730] sm:$0xff]  ;;  %v6899_v36 = vld [vmem:[%s12237_s5 + $0x7c8] sm:$0xff] }
 0x7dd   : > { %8981 = vmatprep.subr.bf16.mxu1 %v8980_v63  ;;  %v9030_v63 = vpack.c.bf16 %v6682_v3, %v6680_v62  ;;  %v6575_v26 = vld [vmem:[%s12237_s5 + $0x660] sm:$0xff]  ;;  %v6896_v24 = vld [vmem:[%s12237_s5 + $0x7b0] sm:$0xff]  ;;  %v6901_v59 = vld [vmem:[%s12237_s5 + $0x7d8] sm:$0xff] }
 0x7de   : > { %8995 = vmatpush1.bf16.msra.mxu0 %v8994_v12  ;;  %v6577_v12 = vld [vmem:[%s12237_s5 + $0x670] sm:$0xff] }
 0x7df   : > { %8997 = vmatprep.subr.bf16.mxu0 %v8996_v54  ;;  %v9018_v19 = vpack.c.bf16 %v6577_v12, %v6575_v26  ;;  %v6687_v54 = vld [vmem:[%s12237_s5 + $0x6f8] sm:$0xff]  ;;  %v6789_v26 = vld [vmem:[%s12237_s5 + $0x740] sm:$0xff]  ;;  %v6791_v12 = vld [vmem:[%s12237_s5 + $0x750] sm:$0xff] }
 0x7e0   : > { %8983 = vmatpush1.bf16.msra.mxu1 %v8982_v35  ;;  %v9032_v23 = vpack.c.bf16 %v6687_v54, %v6685_v39  ;;  %v6686_v35 = vld [vmem:[%s12237_s5 + $0x6f0] sm:$0xff] }
 0x7e1   : > { %8985 = vmatprep.subr.bf16.mxu1 %v8984_v43  ;;  %v9034_v32 = vpack.c.bf16 %v6686_v35, %v6684_v10  ;;  %v6784_v43 = vld [vmem:[%s12237_s5 + $0x718] sm:$0xff]  ;;  %v9060_v35 = vpack.c.bf16 %v6901_v59, %v6899_v36 }
 0x7e2   : > { %8999 = vmatpush1.bf16.msra.mxu0 %v8998_v33  ;;  %v9036_v60 = vpack.c.bf16 %v6784_v43, %v6782_v52  ;;  %v6893_v33 = vld [vmem:[%s12237_s5 + $0x798] sm:$0xff]  ;;  %v6900_v52 = vld [vmem:[%s12237_s5 + $0x7d0] sm:$0xff] }
 0x7e3   : > { %9001 = vmatprep.subr.bf16.mxu0 %v9000_v27  ;;  %v9052_v27 = vpack.c.bf16 %v6893_v33, %v6891_v61  ;;  %v6796_v10 = vld [vmem:[%s12237_s5 + $0x778] sm:$0xff]  ;;  %v6903_v61 = vld [vmem:[%s12237_s5 + $0x7e8] sm:$0xff] }
 0x7e4   : > { %8987 = vmatpush1.bf16.msra.mxu1 %v8986_v5  ;;  %v7010_v36 = vld [vmem:[%s12239_s7 + $0x58] sm:$0xff] }
 0x7e5   : > { %8698 = vmatprep.subr.mxu1 %v9221_v6 }
 0x7e6   : > { %9003 = vmatpush1.bf16.msra.mxu0 %v9002_v2 }
 0x7e7   : > { %7462 = vmatmul.mubr.msk.f32.vlgmr.msra.gmra.mrb[240].mxu1 %vm4873_vm12, %v6271_v29  ;;  %9021 = vmatprep.subr.bf16.mxu0 %v9020_v42 }
 0x7e8   : > { %8699 = vmatpush3.msra.mxu1 %v11232_v9  ;;  %8700 = vmatprep.mubr.msk.f32.mxu1 %vm9220_vm1, %v9221_v6  ;;  %v6566_v9 = vld [vmem:[%s12237_s5 + $0x618] sm:$0xff] }
 0x7e9   : > { %7463 = vmatmul.mubr.msk.f32.vlgmr.msra.gmra.mrb[250].mxu0 %vm4873_vm12, %v6380_v56  ;;  %v9004_v55 = vpack.c.bf16 %v6566_v9, %v6564_v25 }
 0x7ea   : > { %6755 = vmatprep.mubr.f32.mxu0 %v9221_v6  ;;  %9023 = vmatpush1.bf16.msra.mxu0 %v9022_v58  ;;  %v6890_v58 = vld [vmem:[%s12237_s5 + $0x780] sm:$0xff] }
 0x7eb   : > { %8701 = vmatmul.mubr.msk.f32.vlgmr.msra.gmra.mrb[242].mxu1 %vm4912_vm13, %v12258_v44  ;;  %v9006_v44 = vpack.c.bf16 %v6565_v50, %v6563_v31  ;;  %9005 = vmatprep.subr.bf16.mxu1 %v9004_v55  ;;  %v9054_v45 = vpack.c.bf16 %v6892_v47, %v6890_v58  ;;  %v7001_v58 = vld [vmem:[%s12239_s7 + $0x10] sm:$0xff]  ;;  %v7002_v47 = vld [vmem:[%s12239_s7 + $0x18] sm:$0xff] }
 0x7ec   : > { %6646 = vmatprep.mubr.f32.mxu1 %v9221_v6  ;;  %9025 = vmatprep.subr.bf16.mxu0 %v9024_v11  ;;  %v6785_v11 = vld [vmem:[%s12237_s5 + $0x720] sm:$0xff] }
 0x7ed   : > { %9007 = vmatpush1.bf16.msra.mxu1 %v9006_v44 }
 0x7ee   : > { %9009 = vmatprep.subr.bf16.mxu1 %v9008_v38  ;;  %9027 = vmatpush1.bf16.msra.mxu0 %v9026_v49 }
 0x7ef   : > { %9029 = vmatprep.subr.bf16.mxu0 %v9028_v30 }
 0x7f1   : > { %9011 = vmatpush1.bf16.msra.mxu1 %v9010_v17  ;;  %v6897_v17 = vld [vmem:[%s12237_s5 + $0x7b8] sm:$0xff] }
 0x7f2   : > { %9013 = vmatprep.subr.bf16.mxu1 %v9012_v0  ;;  %9031 = vmatpush1.bf16.msra.mxu0 %v9030_v63  ;;  %v6790_v0 = vld [vmem:[%s12237_s5 + $0x748] sm:$0xff]  ;;  %v9056_v51 = vpack.c.bf16 %v6897_v17, %v6895_v20  ;;  %v9042_v63 = vpack.c.bf16 %v6787_v48, %v6785_v11  ;;  %v7003_v17 = vld [vmem:[%s12239_s7 + $0x20] sm:$0xff]  ;;  %v7021_v11 = vld [vmem:[%s12239_s7 + $0xb0] sm:$0xff] }
 0x7f3   : > { %9033 = vmatprep.subr.bf16.mxu0 %v9032_v23  ;;  %v6794_v23 = vld [vmem:[%s12237_s5 + $0x768] sm:$0xff]  ;;  %v7022_v48 = vld [vmem:[%s12239_s7 + $0xb8] sm:$0xff] }
 0x7f4   : > { %v9048_v33 = vpack.c.bf16 %v6796_v10, %v6794_v23  ;;  %v7029_v23 = vld [vmem:[%s12239_s7 + $0xf0] sm:$0xff]  ;;  %v7030_v10 = vld [vmem:[%s12239_s7 + $0xf8] sm:$0xff] }
 0x7f5   : > { %9015 = vmatpush1.bf16.msra.mxu1 %v9014_v16  ;;  %v6894_v16 = vld [vmem:[%s12237_s5 + $0x7a0] sm:$0xff] }
 0x7f6   : > { %9017 = vmatprep.subr.bf16.mxu1 %v9016_v28  ;;  %9035 = vmatpush1.bf16.msra.mxu0 %v9034_v32  ;;  %v9044_v28 = vpack.c.bf16 %v6792_v22, %v6790_v0  ;;  %v9058_v54 = vpack.c.bf16 %v6896_v24, %v6894_v16  ;;  %v6898_v32 = vld [vmem:[%s12237_s5 + $0x7c0] sm:$0xff]  ;;  %v7024_v22 = vld [vmem:[%s12239_s7 + $0xc8] sm:$0xff] }
 0x7f7   : > { %9053 = vmatprep.subr.bf16.mxu0 %v9052_v27  ;;  %v6793_v27 = vld [vmem:[%s12237_s5 + $0x760] sm:$0xff]  ;;  %v7008_v16 = vld [vmem:[%s12239_s7 + $0x48] sm:$0xff] }
 0x7f8   : > { %v7023_v0 = vld [vmem:[%s12239_s7 + $0xc0] sm:$0xff] }
 0x7f9   : > { %9019 = vmatpush1.bf16.msra.mxu1 %v9018_v19 }
 0x7fa   : > { %9037 = vmatprep.subr.bf16.mxu1 %v9036_v60  ;;  %v9046_v60 = vpack.c.bf16 %v6791_v12, %v6789_v26  ;;  %v7028_v26 = vld [vmem:[%s12239_s7 + $0xe8] sm:$0xff] }
 0x8aa   : > { %v6122_v13 = vpop.f32.mrb[238].mxu1 }
 0x8ab   : > { %v6124_v37 = vpop.f32.mrb[239].mxu1 }
 0x8ac   : > { %v6129_v5 = vcombine.low %v6122_v13, %v6124_v37  ;;  %v6231_v2 = vpop.f32.mrb[248].mxu0  ;;  %v6795_v13 = vld [vmem:[%s12237_s5 + $0x770] sm:$0xff]  ;;  %v9062_v37 = vpack.c.bf16 %v6900_v52, %v6898_v32  ;;  %v9096_v32 = vpack.c.bf16 %v7030_v10, %v7029_v23  ;;  %v7014_v52 = vld [vmem:[%s12239_s7 + $0x78] sm:$0xff] }
 0x8ad   : > { %v6233_v29 = vpop.f32.mrb[249].mxu0 }
 0x8ae   : > { %v6136_v56 = vrot.slane %v6129_v5, %v11573_v15  ;;  %v6238_v25 = vcombine.low %v6231_v2, %v6233_v29  ;;  %v7015_v5 = vld [vmem:[%s12239_s7 + $0x80] sm:$0xff]  ;;  %v7016_v2 = vld [vmem:[%s12239_s7 + $0x88] sm:$0xff] }
 0x8b0   : > { %v6143_v9 = vrot.slane %v6136_v56, %v11573_v15  ;;  %v6245_v55 = vrot.slane %v6238_v25, %v11573_v15  ;;  %v6902_v56 = vld [vmem:[%s12237_s5 + $0x7e0] sm:$0xff]  ;;  %v6904_v25 = vld [vmem:[%s12237_s5 + $0x7f0] sm:$0xff] }
 0x8b2   : > { %v6145_v31 = vadd.f32 %v6143_v9, %v11825_v14  ;;  %v6252_v50 = vrot.slane %v6245_v55, %v11573_v15  ;;  %v6788_v14 = vld [vmem:[%s12237_s5 + $0x738] sm:$0xff]  ;;  %v9050_v9 = vpack.c.bf16 %v6795_v13, %v6793_v27  ;;  %v9068_v55 = vpack.c.bf16 %v7016_v2, %v7015_v5 }
 0x8b3   : > { %v9040_v4 = vpack.c.bf16 %v6788_v14, %v6786_v7  ;;  %v7017_v7 = vld [vmem:[%s12239_s7 + $0x90] sm:$0xff]  ;;  %v7018_v14 = vld [vmem:[%s12239_s7 + $0x98] sm:$0xff] }
 0x8b4   : > { %v6254_v44 = vadd.f32 %v6252_v50, %v6145_v31  ;;  %v6999_v31 = vld [vmem:[%s12239_s7] sm:$0xff]  ;;  %v7000_v50 = vld [vmem:[%s12239_s7 + $0x8] sm:$0xff] }
 0x8b5   : > { %v9070_v40 = vpack.c.bf16 %v7000_v50, %v6999_v31 }
 0x8ba   : > { %v6340_v42 = vpop.f32.mrb[240].mxu1 }
 0x8bb   : > { %v6342_v41 = vpop.f32.mrb[241].mxu1 }
 0x8bc   : > { %v6347_v8 = vcombine.low %v6340_v42, %v6342_v41  ;;  %v6449_v38 = vpop.f32.mrb[250].mxu0  ;;  %v9072_v41 = vpack.c.bf16 %v7018_v14, %v7017_v7 }
 0x8bd   : > { %v6451_v34 = vpop.f32.mrb[251].mxu0 }
 0x8be   : > { %v6354_v1 = vrot.slane %v6347_v8, %v11573_v15  ;;  %v6456_v49 = vcombine.low %v6449_v38, %v6451_v34  ;;  %v12001_v18 = vpop.f32.mrb[242].mxu1  ;;  %v9074_v8 = vpack.c.bf16 %v7002_v47, %v7001_v58  ;;  %v7019_v38 = vld [vmem:[%s12239_s7 + $0xa0] sm:$0xff]  ;;  %v7004_v34 = vld [vmem:[%s12239_s7 + $0x28] sm:$0xff]  ;;  %v7035_v47 = vsub.s32 0, %v12259_v53 }
 0x8bf   : > { %v6688_v46 = vrot.slane %v12001_v18, 1  ;;  %7465 = vmatmul.mubr.msk.f32.vlgmr.msra.gmra.mrb[244].mxu1 %vm4873_vm12, %v12001_v18  ;;  %v8702_v62 = vpop.f32.mrb[243].mxu1  ;;  %v6797_v57 = vrot.slane %v12001_v18, 2  ;;  %v6906_v42 = vrot.slane %v12001_v18, 3  ;;  %v7006_v18 = vld [vmem:[%s12239_s7 + $0x38] sm:$0xff] }
 0x8c0   : > { %v6361_v3 = vrot.slane %v6354_v1, %v11573_v15  ;;  %v6463_v30 = vrot.slane %v6456_v49, %v11573_v15  ;;  %9039 = vmatpush1.bf16.msra.mxu1 %v9038_v21  ;;  %6864 = vmatprep.mubr.f32.mxu1 %v9221_v6  ;;  %v7020_v21 = vld [vmem:[%s12239_s7 + $0xa8] sm:$0xff]  ;;  %v9080_v1 = vpack.c.bf16 %v7022_v48, %v7021_v11  ;;  %v7005_v49 = vld [vmem:[%s12239_s7 + $0x30] sm:$0xff] }
 0x8c1   : > { %7466 = vmatmul.mubr.msk.f32.vlgmr.msra.gmra.mrb[252].mxu0 %vm4873_vm12, %v6688_v46  ;;  %9041 = vmatprep.subr.bf16.mxu1 %v9040_v4  ;;  %v9076_v20 = vpack.c.bf16 %v7020_v21, %v7019_v38  ;;  %v9078_v4 = vpack.c.bf16 %v7004_v34, %v7003_v17  ;;  %v9084_v46 = vpack.c.bf16 %v7024_v22, %v7023_v0  ;;  %v7025_v62 = vld [vmem:[%s12239_s7 + $0xd0] sm:$0xff]  ;;  %v7031_v34 = vld [vmem:[%s12240_s8] sm:$0x1] }
 0x8c2   : > { %v6363_v19 = vadd.f32 %v6361_v3, %v6254_v44  ;;  %v6470_v39 = vrot.slane %v6463_v30, %v11573_v15  ;;  %9055 = vmatpush1.bf16.msra.mxu0 %v9054_v45  ;;  %6973 = vmatprep.mubr.f32.mxu0 %v9221_v6  ;;  %v6905_v6 = vld [vmem:[%s12237_s5 + $0x7f8] sm:$0xff]  ;;  %v9066_v44 = vpack.c.bf16 %v6904_v25, %v6902_v56 }
 0x8c3   : > { %9057 = vmatprep.subr.bf16.mxu0 %v9056_v51  ;;  %v9064_v29 = vpack.c.bf16 %v6905_v6, %v6903_v61  ;;  %v9082_v45 = vpack.c.bf16 %v7006_v18, %v7005_v49  ;;  %v7007_v51 = vld [vmem:[%s12239_s7 + $0x40] sm:$0xff]  ;;  %v7026_v3 = vld [vmem:[%s12239_s7 + $0xd8] sm:$0xff] }
 0x8c4   : > { %v12048_v43 = vadd.f32 %v6470_v39, %v6363_v19  ;;  %9043 = vmatpush1.bf16.msra.mxu1 %v9042_v63  ;;  %v9086_v24 = vpack.c.bf16 %v7008_v16, %v7007_v51  ;;  %v9088_v30 = vpack.c.bf16 %v7026_v3, %v7025_v62  ;;  %v7009_v63 = vld [vmem:[%s12239_s7 + $0x50] sm:$0xff]  ;;  %v7011_v19 = vld [vmem:[%s12239_s7 + $0x60] sm:$0xff]  ;;  %v7012_v39 = vld [vmem:[%s12239_s7 + $0x68] sm:$0xff] }
 0x8c5   : > { %9045 = vmatprep.subr.bf16.mxu1 %v9044_v28  ;;  %v9090_v59 = vpack.c.bf16 %v7010_v36, %v7009_v63  ;;  %v7027_v28 = vld [vmem:[%s12239_s7 + $0xe0] sm:$0xff] }
 0x8c6   : > { %9059 = vmatpush1.bf16.msra.mxu0 %v9058_v54  ;;  %v9092_v12 = vpack.c.bf16 %v7028_v26, %v7027_v28  ;;  %v9094_v54 = vpack.c.bf16 %v7012_v39, %v7011_v19 }
 0x8c7   : > { %9061 = vmatprep.subr.bf16.mxu0 %v9060_v35  ;;  %v7013_v35 = vld [vmem:[%s12239_s7 + $0x70] sm:$0xff] }
 0x8c8   : > { %9047 = vmatpush1.bf16.msra.mxu1 %v9046_v60  ;;  %v9098_v60 = vpack.c.bf16 %v7014_v52, %v7013_v35 }
 0x8c9   : > { %9049 = vmatprep.subr.bf16.mxu1 %v9048_v33 }
 0x8ca   : > { %9063 = vmatpush1.bf16.msra.mxu0 %v9062_v37 }
 0x8cb   : > { %9065 = vmatprep.subr.bf16.mxu0 %v9064_v29 }
 0x8cc   : > { %9051 = vmatpush1.bf16.msra.mxu1 %v9050_v9 }
 0x8cd   : > { %9069 = vmatprep.subr.bf16.mxu1 %v9068_v55 }
 0x8ce   : > { %9067 = vmatpush1.bf16.msra.mxu0 %v9066_v44 }
 0x8cf   : > { %7467 = vmatmul.mubr.msk.f32.vlgmr.msra.gmra.mrb[246].mxu1 %vm4873_vm12, %v6797_v57 }
 0x8d0   : > { %9071 = vmatpush3.bf16.msra.mxu1 %v9070_v40 }
 0x8d1   : > { %7468 = vmatmul.mubr.msk.f32.vlgmr.msra.gmra.mrb[254].mxu0 %vm4873_vm12, %v6906_v42  ;;  %9073 = vmatprep.subr.bf16.mxu1 %v9072_v41 }
 0x8d4   : > { %9075 = vmatpush3.bf16.msra.mxu1 %v9074_v8 }
 0x8d5   : > { %9077 = vmatprep.subr.bf16.mxu1 %v9076_v20 }
 0x8d8   : > { %9079 = vmatpush3.bf16.msra.mxu1 %v9078_v4 }
 0x8d9   : > { %9081 = vmatprep.subr.bf16.mxu1 %v9080_v1 }
 0x8dc   : > { %9083 = vmatpush3.bf16.msra.mxu1 %v9082_v45 }
 0x8dd   : > { %9085 = vmatprep.subr.bf16.mxu1 %v9084_v46 }
 0x8e0   : > { %9087 = vmatpush3.bf16.msra.mxu1 %v9086_v24 }
 0x8e1   : > { %9089 = vmatprep.subr.bf16.mxu1 %v9088_v30 }
 0x8e4   : > { %9091 = vmatpush3.bf16.msra.mxu1 %v9090_v59 }
 0x8e5   : > { %9093 = vmatprep.subr.bf16.mxu1 %v9092_v12 }
 0x8e8   : > { %9095 = vmatpush3.bf16.msra.mxu1 %v9094_v54 }
 0x8e9   : > { %9097 = vmatprep.subr.bf16.mxu1 %v9096_v32 }
 0x8ec   : > { %9099 = vmatpush3.bf16.msra.mxu1 %v9098_v60 }
 0x992   : > { %v6648_v61 = vpop.f32.mrb[244].mxu1 }
 0x993   : > { %v6650_v6 = vpop.f32.mrb[245].mxu1 }
 0x994   : > { %v6655_v33 = vcombine.low %v6648_v61, %v6650_v6  ;;  %v6757_v27 = vpop.f32.mrb[252].mxu0 }
 0x995   : > { %v6759_v13 = vpop.f32.mrb[253].mxu0 }
 0x996   : > { %v6662_v37 = vrot.slane %v6655_v33, %v11573_v15  ;;  %v6764_v5 = vcombine.low %v6757_v27, %v6759_v13 }
 0x998   : > { %v6669_v2 = vrot.slane %v6662_v37, %v11573_v15  ;;  %v6771_v29 = vrot.slane %v6764_v5, %v11573_v15 }
 0x99a   : > { %v6671_v56 = vadd.f32 %v6669_v2, %v12048_v43  ;;  %v6778_v25 = vrot.slane %v6771_v29, %v11573_v15  ;;  %v7039_v43 = vsub.s32 1, %v12259_v53 }
 0x99c   : > { %v6780_v9 = vadd.f32 %v6778_v25, %v6671_v56 }
 0x9a2   : > { %v6866_v55 = vpop.f32.mrb[246].mxu1 }
 0x9a3   : > { %v6868_v31 = vpop.f32.mrb[247].mxu1 }
 0x9a4   : > { %v6873_v50 = vcombine.low %v6866_v55, %v6868_v31  ;;  %v6975_v44 = vpop.f32.mrb[254].mxu0 }
 0x9a5   : > { %v6977_v40 = vpop.f32.mrb[255].mxu0 }
 0x9a6   : > { %v6880_v57 = vrot.slane %v6873_v50, %v11573_v15  ;;  %v6982_v42 = vcombine.low %v6975_v44, %v6977_v40 }
 0x9a8   : > { %v6887_v7 = vrot.slane %v6880_v57, %v11573_v15  ;;  %v6989_v14 = vrot.slane %v6982_v42, %v11573_v15 }
 0x9aa   : > { %v6889_v41 = vadd.f32 %v6887_v7, %v6780_v9  ;;  %v6996_v58 = vrot.slane %v6989_v14, %v11573_v15 }
 0x9ac   : > { %v6998_v8 = vadd.f32 %v6996_v58, %v6889_v41 }
 0x9ae   : > { %v7040_v38 = vrot.slane %v6998_v8, %v7039_v43  ;;  %v7036_v21 = vrot.slane %v6998_v8, %v7035_v47 }
 0x9b0   : > { %7107 = vmatprep.mubr.f32.mxu1 %v7040_v38 }
 0x9b1   : > { %7108 = vmatmul.mubr.f32.vlgmr.msra.gmra.mrb[248].mxu1 %v7036_v21 }
 0xa84   : > { %v7832_v20 = vpop.f32.mrb[248].mxu1 }
 0xa85   : > { %v7833_v17 = vpop.f32.mrb[249].mxu1 }
 0xa86   : > { %v7834_v4 = vadd.f32 %v7833_v17, %v7832_v20 }
 0xa88   : > { %v7110_v15 = vadd.f32 %v7834_v4, %v7031_v34 }
 0xa8a   : > { %v7114_v11 = vsel %vm7113_vm14, %v7110_v15, -inf }
 0xa8b   : > { %7115 = vmax.xlane.f32.xlu0 %v7114_v11 }
 0xb18   : > { %v7116_v53 = vpop.xlane.xlu0 %7115 }
 0xb19   : > { %v7117_v48 = vsub.f32 %v7110_v15, %v7116_v53 }
 0xb1b   : > { %v7118_v1 = vmul.f32 1.442695, %v7117_v48 }
 0xb1d   : > { %9149 = vpow2.f32 %v7118_v1 }
 0xb27   : > { %v9150_v49 = vpop.eup %9149 }
 0xb28   : > { %v7120_v18 = vsel %vm7113_vm14, %v9150_v49, 0.0 }
 0xb29   : > { %7121 = vadd.xlane.f32.xlu0 %v7120_v18 }
 0xbb6   : > { %v7122_v45 = vpop.xlane.xlu0 %7121 }
 0xbb7   : > { %9151 = vlog2.f32 %v7122_v45 }
 0xbc1   : > { %v9152_v0 = vpop.eup %9151 }
 0xbc2   : > { %v7124_v22 = vmul.f32 0.6931472, %v9152_v0 }
 0xbc4   : > { %v7125_v46 = vsub.f32 %v7117_v48, %v7124_v22 }
 0xbc6   : > { %7126 = vst.msk [vmem:[%s324_s24] sm:$0x1] %vm7113_vm14, %v7125_v46 }
 0xbc7   : > { %9168 = shalt.err (!%p9165_p3)
}
 0xbc8   : > { %s9169_s22 = scalar_lea.hbm %s12189_s28, 16  ;;  %s9173_s24 = scalar_lea.hbm %s12241_s9, 32 }
 0xbc9   : > { %p9170_p4 = scmp.ne.s32.totalorder %s12189_s28, %s9169_s22  ;;  %p9174_p9 = scmp.lt.u32.totalorder %s12189_s28, %s12241_s9 }
 0xbca   : > { %p9175_p10 = scmp.lt.u32.totalorder %s9173_s24, %s9169_s22  ;;  %p9177_p12 = scmp.lt.u32.totalorder %s9169_s22, %s12189_s28 }
 0xbcb   : > { %p9171_p7 = pnand %p9170_p4, %p9313_p5 }
 0xbcc   : > { %p9176_p11 = por %p9175_p10, %p9174_p9 }
 0xbcd   : > { %p9172_p8 = pneg %p9171_p7 }
 0xbce   : > { %p9178_p13 = por %p9177_p12, %p9176_p11 }
 0xbd0   : > { %p9179_p0 = pnand %p9178_p13, %p9172_p8 }
 0xbd2   : > { %9182 = shalt.err (!%p9179_p0)
}
 0xbd3   : > { %9105 = dma.vmem_to_hbm [thread:$0]  (%p9313_p5), %s12191_s25, 16, %s12189_s28, %s7128_s29  }
 0xbd4 PF: > { %p9111_p1 = scmp.ge.s32.totalorder %s9217_s12, 2  ;;  %s7152_s14 = sand.u32 1, %s9205_s30  }
 0xbd5   : > { %s7153_s13 = scalar_lea.sflag [#allocation6], %s7152_s14 }
 0xbd6   : > { %p9108_p2 = pnand %p9111_p1, %p9317_p6 }
 0xbd8   : > { %9200 = dma.done.wait (!%p9108_p2), %s7153_s13, 16  }
 0xbd9   : > { %9202 = vsyncadd (!%p9108_p2), %s7153_s13, 4294967280  ;;  %p19_p3 = scmp.ge.s32.totalorder %s9300_s15, 4   ;;  %s12260_s30 = smov %s9209_s10 }
 0xbda   : > { %s12261_s10 = smov %s9213_s11  ;;  %s12262_s11 = smov %s9311_s18 }
 0xbdb   : > { %s12263_s12 = smov %s9300_s15  ;;  %21 = sbr.rel (!%p19_p3) target bundleno = 3 (0x3), region = 91 }
 0xbe2   :  { %7157 = vsyncpa [#allocation6], 1 }
 0xbe3   :  { %7159 = vsyncpa [#allocation6 + $0x1], 1 }

</bundles_post_ra>
